<compile_context>
chip_gen: v6e
topology: v6e:2x2x1
jax: 0.10.0
libtpu: 0.0.40
codegen_flags: <defaults>
</compile_context>

<pallas_src>
import functools

import jax
import jax.numpy as jnp
from jax.experimental import pallas as pl
from jax.experimental.pallas import tpu as pltpu

_EPS = 1e-5
_NUM_LAYERS = 3   # num_layers in both BAM branches (PyTorch default)
_DIA_VAL = 2      # dilation of the 3x3 convs (PyTorch default)


# ---------------------------------------------------------------------------
# Kernel A (fused): global-average-pool + 1x1 reduce conv (+folded BN, ReLU),
# streaming x exactly once over grid (B, HW//T), accumulating the reduced
# (Crp, HW) map into a VMEM scratch; at the last HW step the three dilated
# 3x3 conv layers (+folded BN, ReLU) and the last 1x1 conv run on that scratch
# and write sa (1, HW) directly, so the feat map never touches HBM.
# Each 3x3 tap = lane roll (by dy*W+dx) + validity mask; the 9 taps are
# stacked along sublanes and consumed by ONE (Crp, 9*Crp)@(9*Crp, HW) matmul
# per layer (tap weights pre-concatenated on the host, Cr padded to Crp).
# ---------------------------------------------------------------------------
def _fused_pool_spatial_kernel(x_ref, wred_ref, bred_ref, wconv_ref, bconv_ref,
                               wlast_ref, blast_ref, mask_ref,
                               avg_ref, sa_ref, acc_ref, feat_ref,
                               *, inv_hw, tile, shifts, num_layers):
    k = pl.program_id(1)

    @pl.when(k == 0)
    def _init():
        acc_ref[...] = jnp.zeros_like(acc_ref)

    x = x_ref[0]                                             # (C, T) native dtype
    acc_ref[...] += jnp.sum(x.astype(jnp.float32), axis=1, keepdims=True)

    # 1x1 reduce conv (+folded BN, ReLU); native-dtype MXU operands, f32 acc.
    r = jnp.dot(wred_ref[...], x, preferred_element_type=jnp.float32) + bred_ref[...]
    off = pl.multiple_of(k * tile, 128)
    feat_ref[:, pl.ds(off, tile)] = jnp.maximum(r, 0.0)

    @pl.when(k == pl.num_programs(1) - 1)
    def _finalize():
        avg_ref[0] = (acc_ref[...] * inv_hw).astype(avg_ref.dtype)   # (C, 1)

        f = feat_ref[...]                                    # (Crp, HWp) f32
        hw = f.shape[1]
        for layer in range(num_layers):
            taps = []
            for t, s in enumerate(shifts):
                if s == 0:                                   # center tap: no shift/mask
                    taps.append(f)
                else:
                    taps.append(pltpu.roll(f, (-s) % hw, 1) * mask_ref[t])
            g = jnp.concatenate(taps, axis=0)                # (9*Crp, HWp)
            f = jnp.maximum(
                jnp.dot(wconv_ref[layer], g, preferred_element_type=jnp.float32)
                + bconv_ref[layer], 0.0)
        sa = jnp.dot(wlast_ref[...], f, preferred_element_type=jnp.float32) + blast_ref[...]
        sa_ref[0] = sa.astype(sa_ref.dtype)                  # (1, HWp)


# ---------------------------------------------------------------------------
# Kernel C: out = (1 + sigmoid(sa + ca)) * x   (streaming, HW on lanes).
# ---------------------------------------------------------------------------
def _combine_kernel(x_ref, sa_ref, ca_ref, o_ref):
    gate = 1.0 + jax.nn.sigmoid(sa_ref[0] + ca_ref[0])       # (1,T)+(C,1) -> (C,T) f32
    x = x_ref[0]
    if x.dtype == jnp.float32:
        o_ref[0] = (gate * x).astype(o_ref.dtype)
    else:
        # bf16 serving path: keep the heavy broadcast multiply in the native dtype.
        o_ref[0] = (gate.astype(x.dtype) * x).astype(o_ref.dtype)


# ---------------------------------------------------------------------------
# Host-side helpers.
# ---------------------------------------------------------------------------
def _fold_conv_bn(w, b, gamma, beta, mean, var):
    """Fold an eval-mode BatchNorm into the preceding conv's weight / bias."""
    scale = gamma / jnp.sqrt(var + _EPS)
    return w * scale[:, None, None, None], (b - mean) * scale + beta


def _tpu_vmem_capacity():
    try:
        return int(pltpu.get_tpu_info().vmem_capacity_bytes)
    except Exception:
        return 64 << 20        # conservative fallback (v7x per-TC capacity)


def _pick_hw_tile(hw_pad, c, itemsize, vmem_cap):
    """Largest multiple-of-128 divisor of hw_pad whose double-buffered in+out
    (C, T) blocks fit in ~half the VMEM capacity.  Big tiles amortize the
    ~0.35 us fixed per-grid-step overhead of the streaming kernels."""
    m = hw_pad // 128
    budget = vmem_cap // 2
    best = 128
    for div in range(1, m + 1):
        if m % div:
            continue
        t = 128 * div
        if 4 * c * t * itemsize <= budget:     # x + out blocks, double-buffered
            best = t
    return best


def _vmem_limit(estimate_bytes, cap):
    return int(min(cap - (2 << 20), max(2 * estimate_bytes, 32 << 20)))


def bam_forward(x, p):
    """BAM forward. x: (B, C, H, W) NCHW; p: parameter dict. Returns (B, C, H, W)."""
    B, C, H, W = x.shape
    HW = H * W
    HWp = ((HW + 127) // 128) * 128
    Cr = p['red_w'].shape[0]
    Crp = max(8, ((Cr + 7) // 8) * 8)          # pad reduced channels to sublane mult.
    d = _DIA_VAL
    isz = jnp.dtype(x.dtype).itemsize
    vmem_cap = _tpu_vmem_capacity()

    # Native layout, no transpose: channels on sublanes, HW on the 128 lanes.
    # Pad HW to a multiple of 128 so every streaming block is lane-dense.
    x_f = x.reshape(B, C, HW)
    if HWp != HW:
        x_f = jnp.pad(x_f, ((0, 0), (0, 0), (0, HWp - HW)))

    # Fold eval-mode BN into the spatial-attention conv weights/biases, padded to Crp.
    wr, br = _fold_conv_bn(p['red_w'], p['red_b'], p['red_bn_g'], p['red_bn_b'],
                           p['red_bn_m'], p['red_bn_v'])
    w_red = jnp.zeros((Crp, C), jnp.float32).at[:Cr].set(wr.reshape(Cr, C))
    w_red = w_red.astype(x.dtype)                                  # native MXU operand
    b_red = jnp.zeros((Crp, 1), jnp.float32).at[:Cr].set(br.reshape(Cr, 1))

    w_layers, b_layers = [], []
    for i in range(_NUM_LAYERS):
        wi, bi = _fold_conv_bn(p[f'c{i}_w'], p[f'c{i}_b'], p[f'c{i}_bn_g'],
                               p[f'c{i}_bn_b'], p[f'c{i}_bn_m'], p[f'c{i}_bn_v'])
        wi_p = jnp.zeros((Crp, Crp, 3, 3), jnp.float32).at[:Cr, :Cr].set(wi)
        # (O, KY, KX, I) -> (O, 9*I); column order (t*Crp + i_in) matches the
        # tap-major sublane stacking of the rolled feature copies in-kernel.
        w_layers.append(jnp.transpose(wi_p, (0, 2, 3, 1)).reshape(Crp, 9 * Crp))
        b_layers.append(jnp.zeros((Crp, 1), jnp.float32).at[:Cr].set(bi.reshape(Cr, 1)))
    w_conv = jnp.stack(w_layers, axis=0).astype(jnp.float32)       # (L, Crp, 9*Crp)
    b_conv = jnp.stack(b_layers, axis=0).astype(jnp.float32)       # (L, Crp, 1)
    w_last = jnp.zeros((1, Crp), jnp.float32).at[:, :Cr].set(p['last_w'].reshape(1, Cr))
    b_last = p['last_b'].reshape(1, 1).astype(jnp.float32)

    # Tap shifts (flattened HW) + validity masks for the dilated 3x3 taps
    # (pad = d for "same" output); zero on the HW-pad lanes; shared by all layers.
    yy, xx = jnp.meshgrid(jnp.arange(H), jnp.arange(W), indexing='ij')
    masks, shifts = [], []
    for ky in range(3):
        for kx in range(3):
            dy, dx = d * (ky - 1), d * (kx - 1)
            valid = ((yy + dy >= 0) & (yy + dy < H) &
                     (xx + dx >= 0) & (xx + dx < W)).reshape(HW)
            valid = jnp.pad(valid, (0, HWp - HW))
            masks.append(valid.reshape(1, HWp))
            shifts.append(dy * W + dx)
    masks = jnp.stack(masks, axis=0).astype(jnp.float32)           # (9, 1, HWp)
    shifts = tuple(int(s) for s in shifts)

    T = _pick_hw_tile(HWp, C, isz, vmem_cap)
    n_hw = HWp // T

    # --- Kernel A: pool + reduce conv + (fused) dilated-conv spatial branch ---
    est_a = (2 * C * T * isz + Crp * HWp * 4 + 9 * HWp * 4 + 2 * HWp * 4
             + 2 * C * 4 + 20 * Crp * HWp * 4 + w_conv.size * 4 + w_red.size * isz)
    cost_a = pl.CostEstimate(
        flops=int(2 * B * Crp * C * HWp + B * C * HWp
                  + 2 * B * _NUM_LAYERS * Crp * 9 * Crp * HWp + 2 * B * Crp * HWp),
        transcendentals=0,
        bytes_accessed=int(B * C * HWp * isz + B * HWp * 4 + B * C * 4))
    avg, sa = pl.pallas_call(
        functools.partial(_fused_pool_spatial_kernel, inv_hw=1.0 / HW, tile=T,
                          shifts=shifts, num_layers=_NUM_LAYERS),
        out_shape=(jax.ShapeDtypeStruct((B, C, 1), jnp.float32),
                   jax.ShapeDtypeStruct((B, 1, HWp), jnp.float32)),
        grid_spec=pltpu.PrefetchScalarGridSpec(
            num_scalar_prefetch=0,
            grid=(B, n_hw),
            in_specs=[
                pl.BlockSpec((1, C, T), lambda b, k: (b, 0, k)),
                pl.BlockSpec((Crp, C), lambda b, k: (0, 0)),
                pl.BlockSpec((Crp, 1), lambda b, k: (0, 0)),
                pl.BlockSpec((_NUM_LAYERS, Crp, 9 * Crp), lambda b, k: (0, 0, 0)),
                pl.BlockSpec((_NUM_LAYERS, Crp, 1), lambda b, k: (0, 0, 0)),
                pl.BlockSpec((1, Crp), lambda b, k: (0, 0)),
                pl.BlockSpec((1, 1), lambda b, k: (0, 0)),
                pl.BlockSpec((9, 1, HWp), lambda b, k: (0, 0, 0)),
            ],
            out_specs=[
                pl.BlockSpec((1, C, 1), lambda b, k: (b, 0, 0)),
                pl.BlockSpec((1, 1, HWp), lambda b, k: (b, 0, 0)),
            ],
            scratch_shapes=[pltpu.VMEM((C, 1), jnp.float32),
                            pltpu.VMEM((Crp, HWp), jnp.float32)],
        ),
        compiler_params=pltpu.CompilerParams(
            dimension_semantics=("parallel", "arbitrary"),
            vmem_limit_bytes=_vmem_limit(est_a, vmem_cap)),
        cost_estimate=cost_a,
    )(x_f, w_red, b_red, w_conv, b_conv, w_last, b_last, masks)

    # --- Channel MLP + BatchNorm1d (eval) in plain XLA: tiny (B, C) work -----
    h = avg.reshape(B, C)
    for i in range(_NUM_LAYERS):
        h = h @ p[f'fc{i}_w'].T + p[f'fc{i}_b']
        h = (p[f'bn1d{i}_g'] * (h - p[f'bn1d{i}_m'])
             / jnp.sqrt(p[f'bn1d{i}_v'] + _EPS) + p[f'bn1d{i}_b'])
        h = jnp.maximum(h, 0.0)
    ca = (h @ p['last_fc_w'].T + p['last_fc_b']).reshape(B, C, 1).astype(jnp.float32)

    # --- Kernel C: out = (1 + sigmoid(sa + ca)) * x, streaming over HW -------
    est_c = 4 * C * T * isz + 2 * T * 4 + 2 * C * 4 + 4 * C * T * 4
    cost_c = pl.CostEstimate(
        flops=int(3 * B * C * HWp),
        transcendentals=int(B * C * HWp),
        bytes_accessed=int(2 * B * C * HWp * isz + B * HWp * 4 + B * C * 4))
    out = pl.pallas_call(
        _combine_kernel,
        out_shape=jax.ShapeDtypeStruct((B, C, HWp), x.dtype),
        grid_spec=pltpu.PrefetchScalarGridSpec(
            num_scalar_prefetch=0,
            grid=(B, n_hw),
            in_specs=[
                pl.BlockSpec((1, C, T), lambda b, k: (b, 0, k)),
                pl.BlockSpec((1, 1, T), lambda b, k: (b, 0, k)),
                pl.BlockSpec((1, C, 1), lambda b, k: (b, 0, 0)),
            ],
            out_specs=pl.BlockSpec((1, C, T), lambda b, k: (b, 0, k)),
        ),
        compiler_params=pltpu.CompilerParams(
            dimension_semantics=("parallel", "parallel"),
            vmem_limit_bytes=_vmem_limit(est_c, vmem_cap)),
        cost_estimate=cost_c,
    )(x_f, sa, ca)

    if HWp != HW:
        out = out[:, :, :HW]
    return out.reshape(B, C, H, W)


# ---------------------------------------------------------------------------
# Pure-JAX reference of the PyTorch BAM forward (eval-mode BatchNorm).
# ---------------------------------------------------------------------------
def bam_reference(x, p):
    def conv2d(inp, w, b, dil, pad):
        y = jax.lax.conv_general_dilated(
            inp, w, window_strides=(1, 1), padding=[(pad, pad), (pad, pad)],
            rhs_dilation=(dil, dil), dimension_numbers=('NCHW', 'OIHW', 'NCHW'))
        return y + b[None, :, None, None]

    def bn2d(inp, g, bta, m, v):
        return (g[None, :, None, None] * (inp - m[None, :, None, None])
                / jnp.sqrt(v[None, :, None, None] + _EPS) + bta[None, :, None, None])

    # channel attention
    h = jnp.mean(x, axis=(2, 3))                            # (B, C)
    for i in range(_NUM_LAYERS):
        h = h @ p[f'fc{i}_w'].T + p[f'fc{i}_b']
        h = (p[f'bn1d{i}_g'] * (h - p[f'bn1d{i}_m'])
             / jnp.sqrt(p[f'bn1d{i}_v'] + _EPS) + p[f'bn1d{i}_b'])
        h = jnp.maximum(h, 0.0)
    ca = (h @ p['last_fc_w'].T + p['last_fc_b'])[:, :, None, None]

    # spatial attention
    s = conv2d(x, p['red_w'], p['red_b'], 1, 0)
    s = jnp.maximum(bn2d(s, p['red_bn_g'], p['red_bn_b'],
                         p['red_bn_m'], p['red_bn_v']), 0.0)
    for i in range(_NUM_LAYERS):
        s = conv2d(s, p[f'c{i}_w'], p[f'c{i}_b'], _DIA_VAL, _DIA_VAL)
        s = jnp.maximum(bn2d(s, p[f'c{i}_bn_g'], p[f'c{i}_bn_b'],
                             p[f'c{i}_bn_m'], p[f'c{i}_bn_v']), 0.0)
    sa = conv2d(s, p['last_w'], p['last_b'], 1, 0)          # (B, 1, H, W)

    weight = jax.nn.sigmoid(sa + ca)
    return (1.0 + weight) * x


if __name__ == "__main__":
    key = jax.random.PRNGKey(0)
    B, C, H, W = 2, 32, 32, 32
    reduction = 16
    Cr = C // reduction   # = 2

    kit = iter(jax.random.split(key, 64))

    def nrm(shape, scale=0.1):
        return scale * jax.random.normal(next(kit), shape, dtype=jnp.float32)

    def bn_params(n, prefix, params):
        params[f'{prefix}_g'] = 1.0 + nrm((n,), 0.1)
        params[f'{prefix}_b'] = nrm((n,), 0.1)
        params[f'{prefix}_m'] = nrm((n,), 0.1)
        params[f'{prefix}_v'] = 0.5 + jax.random.uniform(next(kit), (n,),
                                                         dtype=jnp.float32)

    p = {}
    # BAM_ChannelAttention: 3x (Linear + BN1d + ReLU) + last Linear
    dims = [C] + [Cr] * _NUM_LAYERS + [C]
    for i in range(_NUM_LAYERS):
        p[f'fc{i}_w'] = nrm((dims[i + 1], dims[i]), 0.2)
        p[f'fc{i}_b'] = nrm((dims[i + 1],), 0.1)
        bn_params(dims[i + 1], f'bn1d{i}', p)
    p['last_fc_w'] = nrm((C, Cr), 0.2)
    p['last_fc_b'] = nrm((C,), 0.1)

    # BAM_SpatialAttention: 1x1 reduce conv + BN + ReLU, 3x dilated 3x3 conv
    # + BN + ReLU, last 1x1 conv to one channel.
    p['red_w'] = nrm((Cr, C, 1, 1), 0.2)
    p['red_b'] = nrm((Cr,), 0.1)
    bn_params(Cr, 'red_bn', p)
    for i in range(_NUM_LAYERS):
        p[f'c{i}_w'] = nrm((Cr, Cr, 3, 3), 0.2)
        p[f'c{i}_b'] = nrm((Cr,), 0.1)
        bn_params(Cr, f'c{i}_bn', p)
    p['last_w'] = nrm((1, Cr, 1, 1), 0.2)
    p['last_b'] = nrm((1,), 0.1)

    x = jax.random.normal(next(kit), (B, C, H, W), dtype=jnp.float32)

    out = jax.block_until_ready(jax.jit(bam_forward)(x, p))
    ref = bam_reference(x, p)

    assert out.shape == x.shape
    err = float(jnp.max(jnp.abs(out - ref)))
    assert err < 1e-3, f"mismatch vs reference: max abs err {err}"
    print("KERNEL_OK")
</pallas_src>

<mosaic_0001>
module attributes {stable_mosaic.version = 11 : i64} {
  func.func @_fused_pool_spatial_kernel(%arg0: i32, %arg1: i32, %arg2: memref<1x32x1024xf32, #tpu.memory_space<vmem>>, %arg3: memref<8x32xf32, #tpu.memory_space<vmem>>, %arg4: memref<8x1xf32, #tpu.memory_space<vmem>>, %arg5: memref<3x8x72xf32, #tpu.memory_space<vmem>>, %arg6: memref<3x8x1xf32, #tpu.memory_space<vmem>>, %arg7: memref<1x8xf32, #tpu.memory_space<vmem>>, %arg8: memref<1x1xf32, #tpu.memory_space<vmem>>, %arg9: memref<9x1x1024xf32, #tpu.memory_space<vmem>>, %arg10: memref<1x32x1xf32, #tpu.memory_space<vmem>>, %arg11: memref<1x1x1024xf32, #tpu.memory_space<vmem>>, %arg12: memref<32x1xf32, #tpu.memory_space<vmem>>, %arg13: memref<8x1024xf32, #tpu.memory_space<vmem>>) attributes {dimension_semantics = [#tpu.dimension_semantics<parallel>, #tpu.dimension_semantics<arbitrary>], iteration_bounds = array<i64: 2, 1>, scalar_prefetch = 0 : i64, scratch_operands = 2 : i64, tpu.core_type = #tpu.core_type<tc>, window_params = [{transform_indices = @transform_0, window_bounds = array<i64: 1, 32, 1024>}, {pipeline_mode = #tpu.pipeline_mode<synchronous>, transform_indices = @transform_1, window_bounds = array<i64: 8, 32>}, {pipeline_mode = #tpu.pipeline_mode<synchronous>, transform_indices = @transform_2, window_bounds = array<i64: 8, 1>}, {pipeline_mode = #tpu.pipeline_mode<synchronous>, transform_indices = @transform_3, window_bounds = array<i64: 3, 8, 72>}, {pipeline_mode = #tpu.pipeline_mode<synchronous>, transform_indices = @transform_4, window_bounds = array<i64: 3, 8, 1>}, {pipeline_mode = #tpu.pipeline_mode<synchronous>, transform_indices = @transform_5, window_bounds = array<i64: 1, 8>}, {pipeline_mode = #tpu.pipeline_mode<synchronous>, transform_indices = @transform_6, window_bounds = array<i64: 1, 1>}, {pipeline_mode = #tpu.pipeline_mode<synchronous>, transform_indices = @transform_7, window_bounds = array<i64: 9, 1, 1024>}, {transform_indices = @transform_8, window_bounds = array<i64: 1, 32, 1>}, {transform_indices = @transform_9, window_bounds = array<i64: 1, 1, 1024>}]} {
    %c0_i32 = arith.constant 0 : i32
    %0 = arith.cmpi eq, %arg1, %c0_i32 : i32
    %1 = arith.extui %0 : i1 to i32
    %c0_i32_0 = arith.constant 0 : i32
    %2 = arith.cmpi ne, %1, %c0_i32_0 : i32
    scf.if %2 {
      %cst_16 = arith.constant 0.000000e+00 : f32
      %24 = vector.broadcast %cst_16 : f32 to vector<32x1xf32>
      %c0_17 = arith.constant 0 : index
      %c0_18 = arith.constant 0 : index
      %25 = vector.load %arg12[%c0_17, %c0_18] : memref<32x1xf32, #tpu.memory_space<vmem>>, vector<32x1xf32>
      tpu.vector_store %arg12[%c0_17, %c0_18], %24 {strides = array<i32>} : memref<32x1xf32, #tpu.memory_space<vmem>>, vector<32x1xf32>,
    } else {
    }
    %c0 = arith.constant 0 : index
    %c0_1 = arith.constant 0 : index
    %c0_2 = arith.constant 0 : index
    %3 = vector.load %arg2[%c0, %c0_1, %c0_2] : memref<1x32x1024xf32, #tpu.memory_space<vmem>>, vector<1x32x1024xf32>
    %4 = vector.shape_cast %3 : vector<1x32x1024xf32> to vector<32x1024xf32>
    %c0_3 = arith.constant 0 : index
    %c0_4 = arith.constant 0 : index
    %5 = vector.load %arg12[%c0_3, %c0_4] : memref<32x1xf32, #tpu.memory_space<vmem>>, vector<32x1xf32>
    %cst = arith.constant dense<0.000000e+00> : vector<32xf32>
    %6 = vector.multi_reduction <add>, %4, %cst [1] : vector<32x1024xf32> to vector<32xf32>
    %7 = vector.shape_cast %6 : vector<32xf32> to vector<32x1xf32>
    %8 = arith.addf %5, %7 : vector<32x1xf32>
    %c0_5 = arith.constant 0 : index
    %c0_6 = arith.constant 0 : index
    %9 = vector.load %arg12[%c0_5, %c0_6] : memref<32x1xf32, #tpu.memory_space<vmem>>, vector<32x1xf32>
    tpu.vector_store %arg12[%c0_5, %c0_6], %8 {strides = array<i32>} : memref<32x1xf32, #tpu.memory_space<vmem>>, vector<32x1xf32>,
    %c0_7 = arith.constant 0 : index
    %c0_8 = arith.constant 0 : index
    %10 = vector.load %arg3[%c0_7, %c0_8] : memref<8x32xf32, #tpu.memory_space<vmem>>, vector<8x32xf32>
    %cst_9 = arith.constant dense<0.000000e+00> : vector<8x1024xf32>
    %11 = tpu.matmul %10, %4, %cst_9 {dimension_numbers = #tpu.dot_dimension_numbers<[1], [0], [0], [1], [0, 0, 1, 1], [], []>} : vector<8x32xf32>, vector<32x1024xf32>, vector<8x1024xf32> -> vector<8x1024xf32>
    %c0_10 = arith.constant 0 : index
    %c0_11 = arith.constant 0 : index
    %12 = vector.load %arg4[%c0_10, %c0_11] : memref<8x1xf32, #tpu.memory_space<vmem>>, vector<8x1xf32>
    %13 = vector.broadcast %12 : vector<8x1xf32> to vector<8x1024xf32>
    %14 = arith.addf %11, %13 : vector<8x1024xf32>
    %c1024_i32 = arith.constant 1024 : i32
    %15 = arith.muli %arg1, %c1024_i32 : i32
    %16 = tpu.assume_multiple %15, 128 : i32
    %cst_12 = arith.constant 0.000000e+00 : f32
    %17 = vector.broadcast %cst_12 : f32 to vector<8x1024xf32>
    %18 = arith.maximumf %14, %17 : vector<8x1024xf32>
    %c0_13 = arith.constant 0 : index
    %19 = arith.index_cast %16 : i32 to index
    %20 = vector.load %arg13[%c0_13, %19] : memref<8x1024xf32, #tpu.memory_space<vmem>>, vector<8x1024xf32>
    tpu.vector_store %arg13[%c0_13, %19], %18 {strides = array<i32>} : memref<8x1024xf32, #tpu.memory_space<vmem>>, vector<8x1024xf32>,
    %c0_i32_14 = arith.constant 0 : i32
    %21 = arith.cmpi eq, %arg1, %c0_i32_14 : i32
    %22 = arith.extui %21 : i1 to i32
    %c0_i32_15 = arith.constant 0 : i32
    %23 = arith.cmpi ne, %22, %c0_i32_15 : i32
    scf.if %23 {
      %c0_16 = arith.constant 0 : index
      %c0_17 = arith.constant 0 : index
      %24 = vector.load %arg12[%c0_16, %c0_17] : memref<32x1xf32, #tpu.memory_space<vmem>>, vector<32x1xf32>
      %cst_18 = arith.constant 9.765625E-4 : f32
      %25 = vector.broadcast %cst_18 : f32 to vector<32x1xf32>
      %26 = arith.mulf %24, %25 : vector<32x1xf32>
      %c0_19 = arith.constant 0 : index
      %c0_20 = arith.constant 0 : index
      %c0_21 = arith.constant 0 : index
      %27 = vector.load %arg10[%c0_19, %c0_20, %c0_21] : memref<1x32x1xf32, #tpu.memory_space<vmem>>, vector<1x32x1xf32>
      %28 = vector.shape_cast %27 : vector<1x32x1xf32> to vector<32x1xf32>
      %29 = vector.shape_cast %26 : vector<32x1xf32> to vector<1x32x1xf32>
      tpu.vector_store %arg10[%c0_19, %c0_20, %c0_21], %29 {strides = array<i32>} : memref<1x32x1xf32, #tpu.memory_space<vmem>>, vector<1x32x1xf32>,
      %c0_22 = arith.constant 0 : index
      %c0_23 = arith.constant 0 : index
      %30 = vector.load %arg13[%c0_22, %c0_23] : memref<8x1024xf32, #tpu.memory_space<vmem>>, vector<8x1024xf32>
      %c66_i32 = arith.constant 66 : i32
      %31 = tpu.dynamic_rotate %30 by %c66_i32 dim 1 : vector<8x1024xf32>, i32 -> vector<8x1024xf32>
      %c0_24 = arith.constant 0 : index
      %c0_25 = arith.constant 0 : index
      %c0_26 = arith.constant 0 : index
      %32 = vector.load %arg9[%c0_24, %c0_25, %c0_26] : memref<9x1x1024xf32, #tpu.memory_space<vmem>>, vector<1x1x1024xf32>
      %33 = vector.shape_cast %32 : vector<1x1x1024xf32> to vector<1x1024xf32>
      %34 = vector.broadcast %33 : vector<1x1024xf32> to vector<8x1024xf32>
      %35 = arith.mulf %31, %34 : vector<8x1024xf32>
      %c64_i32 = arith.constant 64 : i32
      %36 = tpu.dynamic_rotate %30 by %c64_i32 dim 1 : vector<8x1024xf32>, i32 -> vector<8x1024xf32>
      %c1 = arith.constant 1 : index
      %c0_27 = arith.constant 0 : index
      %c0_28 = arith.constant 0 : index
      %37 = vector.load %arg9[%c1, %c0_27, %c0_28] : memref<9x1x1024xf32, #tpu.memory_space<vmem>>, vector<1x1x1024xf32>
      %38 = vector.shape_cast %37 : vector<1x1x1024xf32> to vector<1x1024xf32>
      %39 = vector.broadcast %38 : vector<1x1024xf32> to vector<8x1024xf32>
      %40 = arith.mulf %36, %39 : vector<8x1024xf32>
      %c62_i32 = arith.constant 62 : i32
      %41 = tpu.dynamic_rotate %30 by %c62_i32 dim 1 : vector<8x1024xf32>, i32 -> vector<8x1024xf32>
      %c2 = arith.constant 2 : index
      %c0_29 = arith.constant 0 : index
      %c0_30 = arith.constant 0 : index
      %42 = vector.load %arg9[%c2, %c0_29, %c0_30] : memref<9x1x1024xf32, #tpu.memory_space<vmem>>, vector<1x1x1024xf32>
      %43 = vector.shape_cast %42 : vector<1x1x1024xf32> to vector<1x1024xf32>
      %44 = vector.broadcast %43 : vector<1x1024xf32> to vector<8x1024xf32>
      %45 = arith.mulf %41, %44 : vector<8x1024xf32>
      %c2_i32 = arith.constant 2 : i32
      %46 = tpu.dynamic_rotate %30 by %c2_i32 dim 1 : vector<8x1024xf32>, i32 -> vector<8x1024xf32>
      %c3 = arith.constant 3 : index
      %c0_31 = arith.constant 0 : index
      %c0_32 = arith.constant 0 : index
      %47 = vector.load %arg9[%c3, %c0_31, %c0_32] : memref<9x1x1024xf32, #tpu.memory_space<vmem>>, vector<1x1x1024xf32>
      %48 = vector.shape_cast %47 : vector<1x1x1024xf32> to vector<1x1024xf32>
      %49 = vector.broadcast %48 : vector<1x1024xf32> to vector<8x1024xf32>
      %50 = arith.mulf %46, %49 : vector<8x1024xf32>
      %c1022_i32 = arith.constant 1022 : i32
      %51 = tpu.dynamic_rotate %30 by %c1022_i32 dim 1 : vector<8x1024xf32>, i32 -> vector<8x1024xf32>
      %c5 = arith.constant 5 : index
      %c0_33 = arith.constant 0 : index
      %c0_34 = arith.constant 0 : index
      %52 = vector.load %arg9[%c5, %c0_33, %c0_34] : memref<9x1x1024xf32, #tpu.memory_space<vmem>>, vector<1x1x1024xf32>
      %53 = vector.shape_cast %52 : vector<1x1x1024xf32> to vector<1x1024xf32>
      %54 = vector.broadcast %53 : vector<1x1024xf32> to vector<8x1024xf32>
      %55 = arith.mulf %51, %54 : vector<8x1024xf32>
      %c962_i32 = arith.constant 962 : i32
      %56 = tpu.dynamic_rotate %30 by %c962_i32 dim 1 : vector<8x1024xf32>, i32 -> vector<8x1024xf32>
      %c6 = arith.constant 6 : index
      %c0_35 = arith.constant 0 : index
      %c0_36 = arith.constant 0 : index
      %57 = vector.load %arg9[%c6, %c0_35, %c0_36] : memref<9x1x1024xf32, #tpu.memory_space<vmem>>, vector<1x1x1024xf32>
      %58 = vector.shape_cast %57 : vector<1x1x1024xf32> to vector<1x1024xf32>
      %59 = vector.broadcast %58 : vector<1x1024xf32> to vector<8x1024xf32>
      %60 = arith.mulf %56, %59 : vector<8x1024xf32>
      %c960_i32 = arith.constant 960 : i32
      %61 = tpu.dynamic_rotate %30 by %c960_i32 dim 1 : vector<8x1024xf32>, i32 -> vector<8x1024xf32>
      %c7 = arith.constant 7 : index
      %c0_37 = arith.constant 0 : index
      %c0_38 = arith.constant 0 : index
      %62 = vector.load %arg9[%c7, %c0_37, %c0_38] : memref<9x1x1024xf32, #tpu.memory_space<vmem>>, vector<1x1x1024xf32>
      %63 = vector.shape_cast %62 : vector<1x1x1024xf32> to vector<1x1024xf32>
      %64 = vector.broadcast %63 : vector<1x1024xf32> to vector<8x1024xf32>
      %65 = arith.mulf %61, %64 : vector<8x1024xf32>
      %c958_i32 = arith.constant 958 : i32
      %66 = tpu.dynamic_rotate %30 by %c958_i32 dim 1 : vector<8x1024xf32>, i32 -> vector<8x1024xf32>
      %c8 = arith.constant 8 : index
      %c0_39 = arith.constant 0 : index
      %c0_40 = arith.constant 0 : index
      %67 = vector.load %arg9[%c8, %c0_39, %c0_40] : memref<9x1x1024xf32, #tpu.memory_space<vmem>>, vector<1x1x1024xf32>
      %68 = vector.shape_cast %67 : vector<1x1x1024xf32> to vector<1x1024xf32>
      %69 = vector.broadcast %68 : vector<1x1024xf32> to vector<8x1024xf32>
      %70 = arith.mulf %66, %69 : vector<8x1024xf32>
      %71 = tpu.concatenate %35, %40, %45, %50, %30, %55, %60, %65, %70 in 0 : vector<8x1024xf32>, vector<8x1024xf32>, vector<8x1024xf32>, vector<8x1024xf32>, vector<8x1024xf32>, vector<8x1024xf32>, vector<8x1024xf32>, vector<8x1024xf32>, vector<8x1024xf32> -> vector<72x1024xf32>
      %c0_41 = arith.constant 0 : index
      %c0_42 = arith.constant 0 : index
      %c0_43 = arith.constant 0 : index
      %72 = vector.load %arg5[%c0_41, %c0_42, %c0_43] : memref<3x8x72xf32, #tpu.memory_space<vmem>>, vector<1x8x72xf32>
      %73 = vector.shape_cast %72 : vector<1x8x72xf32> to vector<8x72xf32>
      %cst_44 = arith.constant dense<0.000000e+00> : vector<8x1024xf32>
      %74 = tpu.matmul %73, %71, %cst_44 {dimension_numbers = #tpu.dot_dimension_numbers<[1], [0], [0], [1], [0, 0, 1, 1], [], []>} : vector<8x72xf32>, vector<72x1024xf32>, vector<8x1024xf32> -> vector<8x1024xf32>
      %c0_45 = arith.constant 0 : index
      %c0_46 = arith.constant 0 : index
      %c0_47 = arith.constant 0 : index
      %75 = vector.load %arg6[%c0_45, %c0_46, %c0_47] : memref<3x8x1xf32, #tpu.memory_space<vmem>>, vector<1x8x1xf32>
      %76 = vector.shape_cast %75 : vector<1x8x1xf32> to vector<8x1xf32>
      %77 = vector.broadcast %76 : vector<8x1xf32> to vector<8x1024xf32>
      %78 = arith.addf %74, %77 : vector<8x1024xf32>
      %cst_48 = arith.constant 0.000000e+00 : f32
      %79 = vector.broadcast %cst_48 : f32 to vector<8x1024xf32>
      %80 = arith.maximumf %78, %79 : vector<8x1024xf32>
      %c66_i32_49 = arith.constant 66 : i32
      %81 = tpu.dynamic_rotate %80 by %c66_i32_49 dim 1 : vector<8x1024xf32>, i32 -> vector<8x1024xf32>
      %c0_50 = arith.constant 0 : index
      %c0_51 = arith.constant 0 : index
      %c0_52 = arith.constant 0 : index
      %82 = vector.load %arg9[%c0_50, %c0_51, %c0_52] : memref<9x1x1024xf32, #tpu.memory_space<vmem>>, vector<1x1x1024xf32>
      %83 = vector.shape_cast %82 : vector<1x1x1024xf32> to vector<1x1024xf32>
      %84 = vector.broadcast %83 : vector<1x1024xf32> to vector<8x1024xf32>
      %85 = arith.mulf %81, %84 : vector<8x1024xf32>
      %c64_i32_53 = arith.constant 64 : i32
      %86 = tpu.dynamic_rotate %80 by %c64_i32_53 dim 1 : vector<8x1024xf32>, i32 -> vector<8x1024xf32>
      %c1_54 = arith.constant 1 : index
      %c0_55 = arith.constant 0 : index
      %c0_56 = arith.constant 0 : index
      %87 = vector.load %arg9[%c1_54, %c0_55, %c0_56] : memref<9x1x1024xf32, #tpu.memory_space<vmem>>, vector<1x1x1024xf32>
      %88 = vector.shape_cast %87 : vector<1x1x1024xf32> to vector<1x1024xf32>
      %89 = vector.broadcast %88 : vector<1x1024xf32> to vector<8x1024xf32>
      %90 = arith.mulf %86, %89 : vector<8x1024xf32>
      %c62_i32_57 = arith.constant 62 : i32
      %91 = tpu.dynamic_rotate %80 by %c62_i32_57 dim 1 : vector<8x1024xf32>, i32 -> vector<8x1024xf32>
      %c2_58 = arith.constant 2 : index
      %c0_59 = arith.constant 0 : index
      %c0_60 = arith.constant 0 : index
      %92 = vector.load %arg9[%c2_58, %c0_59, %c0_60] : memref<9x1x1024xf32, #tpu.memory_space<vmem>>, vector<1x1x1024xf32>
      %93 = vector.shape_cast %92 : vector<1x1x1024xf32> to vector<1x1024xf32>
      %94 = vector.broadcast %93 : vector<1x1024xf32> to vector<8x1024xf32>
      %95 = arith.mulf %91, %94 : vector<8x1024xf32>
      %c2_i32_61 = arith.constant 2 : i32
      %96 = tpu.dynamic_rotate %80 by %c2_i32_61 dim 1 : vector<8x1024xf32>, i32 -> vector<8x1024xf32>
      %c3_62 = arith.constant 3 : index
      %c0_63 = arith.constant 0 : index
      %c0_64 = arith.constant 0 : index
      %97 = vector.load %arg9[%c3_62, %c0_63, %c0_64] : memref<9x1x1024xf32, #tpu.memory_space<vmem>>, vector<1x1x1024xf32>
      %98 = vector.shape_cast %97 : vector<1x1x1024xf32> to vector<1x1024xf32>
      %99 = vector.broadcast %98 : vector<1x1024xf32> to vector<8x1024xf32>
      %100 = arith.mulf %96, %99 : vector<8x1024xf32>
      %c1022_i32_65 = arith.constant 1022 : i32
      %101 = tpu.dynamic_rotate %80 by %c1022_i32_65 dim 1 : vector<8x1024xf32>, i32 -> vector<8x1024xf32>
      %c5_66 = arith.constant 5 : index
      %c0_67 = arith.constant 0 : index
      %c0_68 = arith.constant 0 : index
      %102 = vector.load %arg9[%c5_66, %c0_67, %c0_68] : memref<9x1x1024xf32, #tpu.memory_space<vmem>>, vector<1x1x1024xf32>
      %103 = vector.shape_cast %102 : vector<1x1x1024xf32> to vector<1x1024xf32>
      %104 = vector.broadcast %103 : vector<1x1024xf32> to vector<8x1024xf32>
      %105 = arith.mulf %101, %104 : vector<8x1024xf32>
      %c962_i32_69 = arith.constant 962 : i32
      %106 = tpu.dynamic_rotate %80 by %c962_i32_69 dim 1 : vector<8x1024xf32>, i32 -> vector<8x1024xf32>
      %c6_70 = arith.constant 6 : index
      %c0_71 = arith.constant 0 : index
      %c0_72 = arith.constant 0 : index
      %107 = vector.load %arg9[%c6_70, %c0_71, %c0_72] : memref<9x1x1024xf32, #tpu.memory_space<vmem>>, vector<1x1x1024xf32>
      %108 = vector.shape_cast %107 : vector<1x1x1024xf32> to vector<1x1024xf32>
      %109 = vector.broadcast %108 : vector<1x1024xf32> to vector<8x1024xf32>
      %110 = arith.mulf %106, %109 : vector<8x1024xf32>
      %c960_i32_73 = arith.constant 960 : i32
      %111 = tpu.dynamic_rotate %80 by %c960_i32_73 dim 1 : vector<8x1024xf32>, i32 -> vector<8x1024xf32>
      %c7_74 = arith.constant 7 : index
      %c0_75 = arith.constant 0 : index
      %c0_76 = arith.constant 0 : index
      %112 = vector.load %arg9[%c7_74, %c0_75, %c0_76] : memref<9x1x1024xf32, #tpu.memory_space<vmem>>, vector<1x1x1024xf32>
      %113 = vector.shape_cast %112 : vector<1x1x1024xf32> to vector<1x1024xf32>
      %114 = vector.broadcast %113 : vector<1x1024xf32> to vector<8x1024xf32>
      %115 = arith.mulf %111, %114 : vector<8x1024xf32>
      %c958_i32_77 = arith.constant 958 : i32
      %116 = tpu.dynamic_rotate %80 by %c958_i32_77 dim 1 : vector<8x1024xf32>, i32 -> vector<8x1024xf32>
      %c8_78 = arith.constant 8 : index
      %c0_79 = arith.constant 0 : index
      %c0_80 = arith.constant 0 : index
      %117 = vector.load %arg9[%c8_78, %c0_79, %c0_80] : memref<9x1x1024xf32, #tpu.memory_space<vmem>>, vector<1x1x1024xf32>
      %118 = vector.shape_cast %117 : vector<1x1x1024xf32> to vector<1x1024xf32>
      %119 = vector.broadcast %118 : vector<1x1024xf32> to vector<8x1024xf32>
      %120 = arith.mulf %116, %119 : vector<8x1024xf32>
      %121 = tpu.concatenate %85, %90, %95, %100, %80, %105, %110, %115, %120 in 0 : vector<8x1024xf32>, vector<8x1024xf32>, vector<8x1024xf32>, vector<8x1024xf32>, vector<8x1024xf32>, vector<8x1024xf32>, vector<8x1024xf32>, vector<8x1024xf32>, vector<8x1024xf32> -> vector<72x1024xf32>
      %c1_81 = arith.constant 1 : index
      %c0_82 = arith.constant 0 : index
      %c0_83 = arith.constant 0 : index
      %122 = vector.load %arg5[%c1_81, %c0_82, %c0_83] : memref<3x8x72xf32, #tpu.memory_space<vmem>>, vector<1x8x72xf32>
      %123 = vector.shape_cast %122 : vector<1x8x72xf32> to vector<8x72xf32>
      %cst_84 = arith.constant dense<0.000000e+00> : vector<8x1024xf32>
      %124 = tpu.matmul %123, %121, %cst_84 {dimension_numbers = #tpu.dot_dimension_numbers<[1], [0], [0], [1], [0, 0, 1, 1], [], []>} : vector<8x72xf32>, vector<72x1024xf32>, vector<8x1024xf32> -> vector<8x1024xf32>
      %c1_85 = arith.constant 1 : index
      %c0_86 = arith.constant 0 : index
      %c0_87 = arith.constant 0 : index
      %125 = vector.load %arg6[%c1_85, %c0_86, %c0_87] : memref<3x8x1xf32, #tpu.memory_space<vmem>>, vector<1x8x1xf32>
      %126 = vector.shape_cast %125 : vector<1x8x1xf32> to vector<8x1xf32>
      %127 = vector.broadcast %126 : vector<8x1xf32> to vector<8x1024xf32>
      %128 = arith.addf %124, %127 : vector<8x1024xf32>
      %cst_88 = arith.constant 0.000000e+00 : f32
      %129 = vector.broadcast %cst_88 : f32 to vector<8x1024xf32>
      %130 = arith.maximumf %128, %129 : vector<8x1024xf32>
      %c66_i32_89 = arith.constant 66 : i32
      %131 = tpu.dynamic_rotate %130 by %c66_i32_89 dim 1 : vector<8x1024xf32>, i32 -> vector<8x1024xf32>
      %c0_90 = arith.constant 0 : index
      %c0_91 = arith.constant 0 : index
      %c0_92 = arith.constant 0 : index
      %132 = vector.load %arg9[%c0_90, %c0_91, %c0_92] : memref<9x1x1024xf32, #tpu.memory_space<vmem>>, vector<1x1x1024xf32>
      %133 = vector.shape_cast %132 : vector<1x1x1024xf32> to vector<1x1024xf32>
      %134 = vector.broadcast %133 : vector<1x1024xf32> to vector<8x1024xf32>
      %135 = arith.mulf %131, %134 : vector<8x1024xf32>
      %c64_i32_93 = arith.constant 64 : i32
      %136 = tpu.dynamic_rotate %130 by %c64_i32_93 dim 1 : vector<8x1024xf32>, i32 -> vector<8x1024xf32>
      %c1_94 = arith.constant 1 : index
      %c0_95 = arith.constant 0 : index
      %c0_96 = arith.constant 0 : index
      %137 = vector.load %arg9[%c1_94, %c0_95, %c0_96] : memref<9x1x1024xf32, #tpu.memory_space<vmem>>, vector<1x1x1024xf32>
      %138 = vector.shape_cast %137 : vector<1x1x1024xf32> to vector<1x1024xf32>
      %139 = vector.broadcast %138 : vector<1x1024xf32> to vector<8x1024xf32>
      %140 = arith.mulf %136, %139 : vector<8x1024xf32>
      %c62_i32_97 = arith.constant 62 : i32
      %141 = tpu.dynamic_rotate %130 by %c62_i32_97 dim 1 : vector<8x1024xf32>, i32 -> vector<8x1024xf32>
      %c2_98 = arith.constant 2 : index
      %c0_99 = arith.constant 0 : index
      %c0_100 = arith.constant 0 : index
      %142 = vector.load %arg9[%c2_98, %c0_99, %c0_100] : memref<9x1x1024xf32, #tpu.memory_space<vmem>>, vector<1x1x1024xf32>
      %143 = vector.shape_cast %142 : vector<1x1x1024xf32> to vector<1x1024xf32>
      %144 = vector.broadcast %143 : vector<1x1024xf32> to vector<8x1024xf32>
      %145 = arith.mulf %141, %144 : vector<8x1024xf32>
      %c2_i32_101 = arith.constant 2 : i32
      %146 = tpu.dynamic_rotate %130 by %c2_i32_101 dim 1 : vector<8x1024xf32>, i32 -> vector<8x1024xf32>
      %c3_102 = arith.constant 3 : index
      %c0_103 = arith.constant 0 : index
      %c0_104 = arith.constant 0 : index
      %147 = vector.load %arg9[%c3_102, %c0_103, %c0_104] : memref<9x1x1024xf32, #tpu.memory_space<vmem>>, vector<1x1x1024xf32>
      %148 = vector.shape_cast %147 : vector<1x1x1024xf32> to vector<1x1024xf32>
      %149 = vector.broadcast %148 : vector<1x1024xf32> to vector<8x1024xf32>
      %150 = arith.mulf %146, %149 : vector<8x1024xf32>
      %c1022_i32_105 = arith.constant 1022 : i32
      %151 = tpu.dynamic_rotate %130 by %c1022_i32_105 dim 1 : vector<8x1024xf32>, i32 -> vector<8x1024xf32>
      %c5_106 = arith.constant 5 : index
      %c0_107 = arith.constant 0 : index
      %c0_108 = arith.constant 0 : index
      %152 = vector.load %arg9[%c5_106, %c0_107, %c0_108] : memref<9x1x1024xf32, #tpu.memory_space<vmem>>, vector<1x1x1024xf32>
      %153 = vector.shape_cast %152 : vector<1x1x1024xf32> to vector<1x1024xf32>
      %154 = vector.broadcast %153 : vector<1x1024xf32> to vector<8x1024xf32>
      %155 = arith.mulf %151, %154 : vector<8x1024xf32>
      %c962_i32_109 = arith.constant 962 : i32
      %156 = tpu.dynamic_rotate %130 by %c962_i32_109 dim 1 : vector<8x1024xf32>, i32 -> vector<8x1024xf32>
      %c6_110 = arith.constant 6 : index
      %c0_111 = arith.constant 0 : index
      %c0_112 = arith.constant 0 : index
      %157 = vector.load %arg9[%c6_110, %c0_111, %c0_112] : memref<9x1x1024xf32, #tpu.memory_space<vmem>>, vector<1x1x1024xf32>
      %158 = vector.shape_cast %157 : vector<1x1x1024xf32> to vector<1x1024xf32>
      %159 = vector.broadcast %158 : vector<1x1024xf32> to vector<8x1024xf32>
      %160 = arith.mulf %156, %159 : vector<8x1024xf32>
      %c960_i32_113 = arith.constant 960 : i32
      %161 = tpu.dynamic_rotate %130 by %c960_i32_113 dim 1 : vector<8x1024xf32>, i32 -> vector<8x1024xf32>
      %c7_114 = arith.constant 7 : index
      %c0_115 = arith.constant 0 : index
      %c0_116 = arith.constant 0 : index
      %162 = vector.load %arg9[%c7_114, %c0_115, %c0_116] : memref<9x1x1024xf32, #tpu.memory_space<vmem>>, vector<1x1x1024xf32>
      %163 = vector.shape_cast %162 : vector<1x1x1024xf32> to vector<1x1024xf32>
      %164 = vector.broadcast %163 : vector<1x1024xf32> to vector<8x1024xf32>
      %165 = arith.mulf %161, %164 : vector<8x1024xf32>
      %c958_i32_117 = arith.constant 958 : i32
      %166 = tpu.dynamic_rotate %130 by %c958_i32_117 dim 1 : vector<8x1024xf32>, i32 -> vector<8x1024xf32>
      %c8_118 = arith.constant 8 : index
      %c0_119 = arith.constant 0 : index
      %c0_120 = arith.constant 0 : index
      %167 = vector.load %arg9[%c8_118, %c0_119, %c0_120] : memref<9x1x1024xf32, #tpu.memory_space<vmem>>, vector<1x1x1024xf32>
      %168 = vector.shape_cast %167 : vector<1x1x1024xf32> to vector<1x1024xf32>
      %169 = vector.broadcast %168 : vector<1x1024xf32> to vector<8x1024xf32>
      %170 = arith.mulf %166, %169 : vector<8x1024xf32>
      %171 = tpu.concatenate %135, %140, %145, %150, %130, %155, %160, %165, %170 in 0 : vector<8x1024xf32>, vector<8x1024xf32>, vector<8x1024xf32>, vector<8x1024xf32>, vector<8x1024xf32>, vector<8x1024xf32>, vector<8x1024xf32>, vector<8x1024xf32>, vector<8x1024xf32> -> vector<72x1024xf32>
      %c2_121 = arith.constant 2 : index
      %c0_122 = arith.constant 0 : index
      %c0_123 = arith.constant 0 : index
      %172 = vector.load %arg5[%c2_121, %c0_122, %c0_123] : memref<3x8x72xf32, #tpu.memory_space<vmem>>, vector<1x8x72xf32>
      %173 = vector.shape_cast %172 : vector<1x8x72xf32> to vector<8x72xf32>
      %cst_124 = arith.constant dense<0.000000e+00> : vector<8x1024xf32>
      %174 = tpu.matmul %173, %171, %cst_124 {dimension_numbers = #tpu.dot_dimension_numbers<[1], [0], [0], [1], [0, 0, 1, 1], [], []>} : vector<8x72xf32>, vector<72x1024xf32>, vector<8x1024xf32> -> vector<8x1024xf32>
      %c2_125 = arith.constant 2 : index
      %c0_126 = arith.constant 0 : index
      %c0_127 = arith.constant 0 : index
      %175 = vector.load %arg6[%c2_125, %c0_126, %c0_127] : memref<3x8x1xf32, #tpu.memory_space<vmem>>, vector<1x8x1xf32>
      %176 = vector.shape_cast %175 : vector<1x8x1xf32> to vector<8x1xf32>
      %177 = vector.broadcast %176 : vector<8x1xf32> to vector<8x1024xf32>
      %178 = arith.addf %174, %177 : vector<8x1024xf32>
      %cst_128 = arith.constant 0.000000e+00 : f32
      %179 = vector.broadcast %cst_128 : f32 to vector<8x1024xf32>
      %180 = arith.maximumf %178, %179 : vector<8x1024xf32>
      %c0_129 = arith.constant 0 : index
      %c0_130 = arith.constant 0 : index
      %181 = vector.load %arg7[%c0_129, %c0_130] : memref<1x8xf32, #tpu.memory_space<vmem>>, vector<1x8xf32>
      %cst_131 = arith.constant dense<0.000000e+00> : vector<1x1024xf32>
      %182 = tpu.matmul %181, %180, %cst_131 {dimension_numbers = #tpu.dot_dimension_numbers<[1], [0], [0], [1], [0, 0, 1, 1], [], []>} : vector<1x8xf32>, vector<8x1024xf32>, vector<1x1024xf32> -> vector<1x1024xf32>
      %c0_132 = arith.constant 0 : index
      %c0_133 = arith.constant 0 : index
      %183 = vector.load %arg8[%c0_132, %c0_133] : memref<1x1xf32, #tpu.memory_space<vmem>>, vector<1x1xf32>
      %184 = vector.broadcast %183 : vector<1x1xf32> to vector<1x1024xf32>
      %185 = arith.addf %182, %184 : vector<1x1024xf32>
      %c0_134 = arith.constant 0 : index
      %c0_135 = arith.constant 0 : index
      %c0_136 = arith.constant 0 : index
      %186 = vector.load %arg11[%c0_134, %c0_135, %c0_136] : memref<1x1x1024xf32, #tpu.memory_space<vmem>>, vector<1x1x1024xf32>
      %187 = vector.shape_cast %186 : vector<1x1x1024xf32> to vector<1x1024xf32>
      %188 = vector.shape_cast %185 : vector<1x1024xf32> to vector<1x1x1024xf32>
      tpu.vector_store %arg11[%c0_134, %c0_135, %c0_136], %188 {strides = array<i32>} : memref<1x1x1024xf32, #tpu.memory_space<vmem>>, vector<1x1x1024xf32>,
    } else {
    }
    return
  }
  func.func @transform_0(%arg0: i32, %arg1: i32) -> (i32, i32, i32) {
    %c0_i32 = arith.constant 0 : i32
    %c0_i32_0 = arith.constant 0 : i32
    return %arg0, %c0_i32, %arg1 : i32, i32, i32
  }
  func.func @transform_1(%arg0: i32, %arg1: i32) -> (i32, i32) {
    %c0_i32 = arith.constant 0 : i32
    %c0_i32_0 = arith.constant 0 : i32
    %c0_i32_1 = arith.constant 0 : i32
    return %c0_i32, %c0_i32_0 : i32, i32
  }
  func.func @transform_2(%arg0: i32, %arg1: i32) -> (i32, i32) {
    %c0_i32 = arith.constant 0 : i32
    %c0_i32_0 = arith.constant 0 : i32
    %c0_i32_1 = arith.constant 0 : i32
    return %c0_i32, %c0_i32_0 : i32, i32
  }
  func.func @transform_3(%arg0: i32, %arg1: i32) -> (i32, i32, i32) {
    %c0_i32 = arith.constant 0 : i32
    %c0_i32_0 = arith.constant 0 : i32
    %c0_i32_1 = arith.constant 0 : i32
    %c0_i32_2 = arith.constant 0 : i32
    return %c0_i32, %c0_i32_0, %c0_i32_1 : i32, i32, i32
  }
  func.func @transform_4(%arg0: i32, %arg1: i32) -> (i32, i32, i32) {
    %c0_i32 = arith.constant 0 : i32
    %c0_i32_0 = arith.constant 0 : i32
    %c0_i32_1 = arith.constant 0 : i32
    %c0_i32_2 = arith.constant 0 : i32
    return %c0_i32, %c0_i32_0, %c0_i32_1 : i32, i32, i32
  }
  func.func @transform_5(%arg0: i32, %arg1: i32) -> (i32, i32) {
    %c0_i32 = arith.constant 0 : i32
    %c0_i32_0 = arith.constant 0 : i32
    %c0_i32_1 = arith.constant 0 : i32
    return %c0_i32, %c0_i32_0 : i32, i32
  }
  func.func @transform_6(%arg0: i32, %arg1: i32) -> (i32, i32) {
    %c0_i32 = arith.constant 0 : i32
    %c0_i32_0 = arith.constant 0 : i32
    %c0_i32_1 = arith.constant 0 : i32
    return %c0_i32, %c0_i32_0 : i32, i32
  }
  func.func @transform_7(%arg0: i32, %arg1: i32) -> (i32, i32, i32) {
    %c0_i32 = arith.constant 0 : i32
    %c0_i32_0 = arith.constant 0 : i32
    %c0_i32_1 = arith.constant 0 : i32
    %c0_i32_2 = arith.constant 0 : i32
    return %c0_i32, %c0_i32_0, %c0_i32_1 : i32, i32, i32
  }
  func.func @transform_8(%arg0: i32, %arg1: i32) -> (i32, i32, i32) {
    %c0_i32 = arith.constant 0 : i32
    %c0_i32_0 = arith.constant 0 : i32
    %c0_i32_1 = arith.constant 0 : i32
    return %arg0, %c0_i32, %c0_i32_0 : i32, i32, i32
  }
  func.func @transform_9(%arg0: i32, %arg1: i32) -> (i32, i32, i32) {
    %c0_i32 = arith.constant 0 : i32
    %c0_i32_0 = arith.constant 0 : i32
    %c0_i32_1 = arith.constant 0 : i32
    return %arg0, %c0_i32, %c0_i32_0 : i32, i32, i32
  }
}

module attributes {stable_mosaic.version = 11 : i64} {
  func.func @_combine_kernel(%arg0: i32, %arg1: i32, %arg2: memref<1x32x1024xf32, #tpu.memory_space<vmem>>, %arg3: memref<1x1x1024xf32, #tpu.memory_space<vmem>>, %arg4: memref<1x32x1xf32, #tpu.memory_space<vmem>>, %arg5: memref<1x32x1024xf32, #tpu.memory_space<vmem>>) attributes {dimension_semantics = [#tpu.dimension_semantics<parallel>, #tpu.dimension_semantics<parallel>], iteration_bounds = array<i64: 2, 1>, scalar_prefetch = 0 : i64, scratch_operands = 0 : i64, tpu.core_type = #tpu.core_type<tc>, window_params = [{transform_indices = @transform_0, window_bounds = array<i64: 1, 32, 1024>}, {transform_indices = @transform_1, window_bounds = array<i64: 1, 1, 1024>}, {transform_indices = @transform_2, window_bounds = array<i64: 1, 32, 1>}, {transform_indices = @transform_3, window_bounds = array<i64: 1, 32, 1024>}]} {
    %c0 = arith.constant 0 : index
    %c0_0 = arith.constant 0 : index
    %c0_1 = arith.constant 0 : index
    %0 = vector.load %arg3[%c0, %c0_0, %c0_1] : memref<1x1x1024xf32, #tpu.memory_space<vmem>>, vector<1x1x1024xf32>
    %1 = vector.shape_cast %0 : vector<1x1x1024xf32> to vector<1x1024xf32>
    %c0_2 = arith.constant 0 : index
    %c0_3 = arith.constant 0 : index
    %c0_4 = arith.constant 0 : index
    %2 = vector.load %arg4[%c0_2, %c0_3, %c0_4] : memref<1x32x1xf32, #tpu.memory_space<vmem>>, vector<1x32x1xf32>
    %3 = vector.shape_cast %2 : vector<1x32x1xf32> to vector<32x1xf32>
    %4 = vector.broadcast %1 : vector<1x1024xf32> to vector<32x1024xf32>
    %5 = vector.broadcast %3 : vector<32x1xf32> to vector<32x1024xf32>
    %6 = arith.addf %4, %5 : vector<32x1024xf32>
    %7 = arith.negf %6 : vector<32x1024xf32>
    %8 = math.exp %7 : vector<32x1024xf32>
    %cst = arith.constant 1.000000e+00 : f32
    %9 = vector.broadcast %cst : f32 to vector<32x1024xf32>
    %10 = arith.addf %9, %8 : vector<32x1024xf32>
    %11 = arith.divf %9, %10 : vector<32x1024xf32>
    %cst_5 = arith.constant 1.000000e+00 : f32
    %12 = vector.broadcast %cst_5 : f32 to vector<32x1024xf32>
    %13 = arith.addf %12, %11 : vector<32x1024xf32>
    %c0_6 = arith.constant 0 : index
    %c0_7 = arith.constant 0 : index
    %c0_8 = arith.constant 0 : index
    %14 = vector.load %arg2[%c0_6, %c0_7, %c0_8] : memref<1x32x1024xf32, #tpu.memory_space<vmem>>, vector<1x32x1024xf32>
    %15 = vector.shape_cast %14 : vector<1x32x1024xf32> to vector<32x1024xf32>
    %16 = arith.mulf %13, %15 : vector<32x1024xf32>
    %c0_9 = arith.constant 0 : index
    %c0_10 = arith.constant 0 : index
    %c0_11 = arith.constant 0 : index
    %17 = vector.load %arg5[%c0_9, %c0_10, %c0_11] : memref<1x32x1024xf32, #tpu.memory_space<vmem>>, vector<1x32x1024xf32>
    %18 = vector.shape_cast %17 : vector<1x32x1024xf32> to vector<32x1024xf32>
    %19 = vector.shape_cast %16 : vector<32x1024xf32> to vector<1x32x1024xf32>
    tpu.vector_store %arg5[%c0_9, %c0_10, %c0_11], %19 {strides = array<i32>} : memref<1x32x1024xf32, #tpu.memory_space<vmem>>, vector<1x32x1024xf32>,
    return
  }
  func.func @transform_0(%arg0: i32, %arg1: i32) -> (i32, i32, i32) {
    %c0_i32 = arith.constant 0 : i32
    %c0_i32_0 = arith.constant 0 : i32
    return %arg0, %c0_i32, %arg1 : i32, i32, i32
  }
  func.func @transform_1(%arg0: i32, %arg1: i32) -> (i32, i32, i32) {
    %c0_i32 = arith.constant 0 : i32
    %c0_i32_0 = arith.constant 0 : i32
    return %arg0, %c0_i32, %arg1 : i32, i32, i32
  }
  func.func @transform_2(%arg0: i32, %arg1: i32) -> (i32, i32, i32) {
    %c0_i32 = arith.constant 0 : i32
    %c0_i32_0 = arith.constant 0 : i32
    %c0_i32_1 = arith.constant 0 : i32
    return %arg0, %c0_i32, %c0_i32_0 : i32, i32, i32
  }
  func.func @transform_3(%arg0: i32, %arg1: i32) -> (i32, i32, i32) {
    %c0_i32 = arith.constant 0 : i32
    %c0_i32_0 = arith.constant 0 : i32
    return %arg0, %c0_i32, %arg1 : i32, i32, i32
  }
}

</mosaic_0001>

<bundles_post_ra>
// kernel: bam_forward.3
= control target key start
LH: loop header
LB: loop body
LE: loop exit
PB: predicated region body
PF: predicated region fallthrough
CT: control target
= control target key end

     0   :  { %s1044_s12 = smov 0   ;;  %s1046_s13 = smov 0   ;;  %s1211_s0 = inlined_call_operand.vmem [shape: f32[2,32,1024], index: 0, kind: input, shape index: {}]   ;;  %s1212_s1 = inlined_call_operand.vmem [shape: f32[2,1,1024], index: 1, kind: input, shape index: {}]   ;;  %s1213_s2 = inlined_call_operand.vmem [shape: f32[2,32,1], index: 2, kind: input, shape index: {}]   ;;  %s1214_s3 = inlined_call_operand.vmem [shape: f32[2,32,1024], index: 3, kind: output, shape index: {}]  }
   0x1   :  { %s1048_s14 = smov 0  }
   0x2 LB: > { %s25_s15 = sadd.s32 1, %s1017_s13  ;;  %p799_p0 = scmp.ge.s32.totalorder %s1021_s14, 1  ;;  %s1021_s14 = sphi %s1048_s14, %s13_s14   ;;  %s1017_s13 = sphi %s1046_s13, %s1216_s13   ;;  %s1013_s12 = sphi %s1044_s12, %s1215_s12  }
   0x3   : > { %p27_p1 = scmp.ge.s32.totalorder %s25_s15, 2  ;;  %p184_p2 = scmp.lt.s32.totalorder %s1021_s14, 3 }
   0x5   : > { %s1218_s15 = smov (%p27_p1, %s25_s15), 0  ;;  %p185_p3 = pnand %p799_p0, %p184_p2 }
   0x6   : > { %p230_p4 = scmp.lt.s32.totalorder (!%p185_p3), %s1013_s12, 1 }
   0x7   : > { %188 = sbr.rel (%p185_p3) target bundleno = 226 (0xe2), region = 32 }
   0xc   : > { %v1023_v0 = vmov 0   ;;  %s1220_s12 = smov (!%p230_p4, %s1013_s12), 1  ;;  %v269_v5 = vlaneseq }
   0xd   : > { %870 = vset.pattern.permute.xlu1 %v1023_v0  ;;  %869 = vset.pattern.permute.xlu0 %v1023_v0  ;;  %s842_s16 = sshll.u32 %s1220_s12, 5  ;;  %s802_s20 = sshll.u32 %s1220_s12, 3 }
   0xe   : > { %s252_s19 = scalar_lea.vmem %s1213_s2, %s842_s16  ;;  %v270_v6 = vshrl.u32 %v269_v5, 7  ;;  %s246_s23 = scalar_lea.vmem %s1212_s1, %s802_s20 }
   0xf   : > { %v266_v1 = vld [vmem:[%s252_s19 + $0x10] sm:$0xff]  ;;  %v264_v2 = vld [vmem:[%s252_s19] sm:$0xff]  ;;  %v267_v3 = vld [vmem:[%s252_s19 + $0x18] sm:$0xff]  ;;  %s841_s24 = sshll.u32 %s1220_s12, 8 }
  0x10   : > { %321 = vperm.xlu1 %870, %v266_v1   ;;  %311 = vperm.xlu0 %869, %v264_v2   ;;  %v265_v4 = vld [vmem:[%s252_s19 + $0x8] sm:$0xff]  ;;  %v271_v7 = vsub.s32 0, %v270_v6  ;;  %v275_v8 = vsub.s32 1, %v270_v6  ;;  %v279_v9 = vsub.s32 2, %v270_v6  ;;  %v283_v10 = vsub.s32 3, %v270_v6  ;;  %v263_v11 = vld [vmem:[%s246_s23] sm:$0xff]  ;;  %s1118_s27 = scalar_lea.vmem %s1211_s0, %s841_s24  ;;  %s1131_s30 = scalar_lea.vmem %s1214_s3, %s841_s24 }
  0x11   : > { %v287_v12 = vsub.s32 4, %v270_v6  ;;  %v291_v13 = vsub.s32 5, %v270_v6  ;;  %v295_v14 = vsub.s32 6, %v270_v6  ;;  %v299_v15 = vsub.s32 7, %v270_v6 }
  0x12   : > { %v1072_v16 = vrot.slane %v263_v11, %v271_v7  ;;  %v1074_v17 = vrot.slane %v263_v11, %v275_v8  ;;  %v1076_v18 = vrot.slane %v263_v11, %v279_v9  ;;  %v1078_v19 = vrot.slane %v263_v11, %v283_v10 }
  0x13   : > { %v1080_v20 = vrot.slane %v263_v11, %v287_v12  ;;  %v1082_v21 = vrot.slane %v263_v11, %v291_v13  ;;  %v1084_v22 = vrot.slane %v263_v11, %v295_v14  ;;  %v1086_v24 = vrot.slane %v263_v11, %v299_v15 }
  0x14   : > { %326 = vperm.xlu1 %870, %v267_v3   ;;  %316 = vperm.xlu0 %869, %v265_v4  }
  0x8b   : > { %v322_v23 = vpop.permute.xlu1 %321  ;;  %v312_v31 = vpop.permute.xlu0 %311 }
  0x8c   : > { %v345_v25 = vadd.f32 %v322_v23, %v1072_v16  ;;  %v346_v26 = vadd.f32 %v322_v23, %v1074_v17  ;;  %v347_v27 = vadd.f32 %v322_v23, %v1076_v18  ;;  %v348_v28 = vadd.f32 %v322_v23, %v1078_v19 }
  0x8d   : > { %v349_v29 = vadd.f32 %v322_v23, %v1080_v20  ;;  %v350_v30 = vadd.f32 %v322_v23, %v1082_v21  ;;  %v351_v32 = vadd.f32 %v322_v23, %v1084_v22  ;;  %v352_v36 = vadd.f32 %v322_v23, %v1086_v24 }
  0x8e   : > { %v823_v33 = vmul.f32 -1.442695, %v345_v25  ;;  %v824_v34 = vmul.f32 -1.442695, %v346_v26  ;;  %v825_v35 = vmul.f32 -1.442695, %v347_v27  ;;  %v329_v39 = vadd.f32 %v312_v31, %v1072_v16 }
  0x8f   : > { %v826_v37 = vmul.f32 -1.442695, %v348_v28  ;;  %v827_v38 = vmul.f32 -1.442695, %v349_v29  ;;  %v828_v40 = vmul.f32 -1.442695, %v350_v30  ;;  %v330_v41 = vadd.f32 %v312_v31, %v1074_v17  ;;  %v327_v7 = vpop.permute.xlu1 %326 }
  0x90   : > { %871 = vpow2.f32 %v823_v33  ;;  %v829_v42 = vmul.f32 -1.442695, %v351_v32  ;;  %v331_v43 = vadd.f32 %v312_v31, %v1076_v18  ;;  %v830_v44 = vmul.f32 -1.442695, %v352_v36 }
  0x91   : > { %873 = vpow2.f32 %v824_v34  ;;  %v332_v45 = vadd.f32 %v312_v31, %v1078_v19  ;;  %v333_v46 = vadd.f32 %v312_v31, %v1080_v20  ;;  %v807_v47 = vmul.f32 -1.442695, %v329_v39 }
  0x92   : > { %875 = vpow2.f32 %v825_v35  ;;  %v334_v48 = vadd.f32 %v312_v31, %v1082_v21  ;;  %v808_v49 = vmul.f32 -1.442695, %v330_v41  ;;  %v335_v50 = vadd.f32 %v312_v31, %v1084_v22 }
  0x93   : > { %877 = vpow2.f32 %v826_v37  ;;  %v809_v51 = vmul.f32 -1.442695, %v331_v43  ;;  %v336_v52 = vadd.f32 %v312_v31, %v1086_v24  ;;  %v810_v53 = vmul.f32 -1.442695, %v332_v45 }
  0x94   : > { %879 = vpow2.f32 %v827_v38  ;;  %v811_v54 = vmul.f32 -1.442695, %v333_v46  ;;  %v812_v55 = vmul.f32 -1.442695, %v334_v48  ;;  %v813_v56 = vmul.f32 -1.442695, %v335_v50 }
  0x95   : > { %881 = vpow2.f32 %v828_v40  ;;  %v814_v57 = vmul.f32 -1.442695, %v336_v52  ;;  %v353_v14 = vadd.f32 %v327_v7, %v1072_v16  ;;  %v354_v15 = vadd.f32 %v327_v7, %v1074_v17  ;;  %v601_v50 = vld [vmem:[%s1118_s27 + $0x80] sm:$0xff] }
  0x96   : > { %883 = vpow2.f32 %v829_v42  ;;  %v355_v26 = vadd.f32 %v327_v7, %v1076_v18  ;;  %v356_v27 = vadd.f32 %v327_v7, %v1078_v19  ;;  %v357_v30 = vadd.f32 %v327_v7, %v1080_v20 }
  0x97   : > { %885 = vpow2.f32 %v830_v44  ;;  %v358_v31 = vadd.f32 %v327_v7, %v1082_v21  ;;  %v359_v34 = vadd.f32 %v327_v7, %v1084_v22  ;;  %v360_v35 = vadd.f32 %v327_v7, %v1086_v24  ;;  %v317_v44 = vpop.permute.xlu0 %316 }
  0x98   : > { %887 = vpow2.f32 %v807_v47  ;;  %v831_v38 = vmul.f32 -1.442695, %v353_v14  ;;  %v832_v39 = vmul.f32 -1.442695, %v354_v15  ;;  %v833_v42 = vmul.f32 -1.442695, %v355_v26 }
  0x99   : > { %889 = vpow2.f32 %v808_v49  ;;  %v834_v43 = vmul.f32 -1.442695, %v356_v27  ;;  %v835_v47 = vmul.f32 -1.442695, %v357_v30  ;;  %v836_v48 = vmul.f32 -1.442695, %v358_v31 }
  0x9a   : > { %891 = vpow2.f32 %v809_v51  ;;  %v837_v52 = vmul.f32 -1.442695, %v359_v34 }
  0x9b   : > { %893 = vpow2.f32 %v810_v53  ;;  %v1121_v53 = vmul.f32 -1.442695, %v360_v35 }
  0x9c   : > { %895 = vpow2.f32 %v811_v54 }
  0x9d   : > { %v872_v58 = vpop.eup %871  ;;  %897 = vpow2.f32 %v812_v55 }
  0x9e   : > { %v874_v59 = vpop.eup %873  ;;  %v473_v60 = vadd.f32 1.0, %v872_v58  ;;  %899 = vpow2.f32 %v813_v56  ;;  %v602_v56 = vld [vmem:[%s1118_s27 + $0x88] sm:$0xff]  ;;  %v338_v58 = vadd.f32 %v317_v44, %v1074_v17  ;;  %v604_v17 = vld [vmem:[%s1118_s27 + $0x98] sm:$0xff] }
  0x9f   : > { %v876_v61 = vpop.eup %875  ;;  %v474_v62 = vadd.f32 1.0, %v874_v59  ;;  %901 = vpow2.f32 %v814_v57  ;;  %v337_v57 = vadd.f32 %v317_v44, %v1072_v16 }
  0xa0   : > { %v878_v63 = vpop.eup %877  ;;  %v475_v0 = vadd.f32 1.0, %v876_v61  ;;  %903 = vrcp.f32 %v473_v60  ;;  %v603_v61 = vld [vmem:[%s1118_s27 + $0x90] sm:$0xff]  ;;  %v816_v30 = vmul.f32 -1.442695, %v338_v58 }
  0xa1   : > { %v880_v1 = vpop.eup %879  ;;  %v476_v2 = vadd.f32 1.0, %v878_v63  ;;  %905 = vrcp.f32 %v474_v62  ;;  %v339_v62 = vadd.f32 %v317_v44, %v1076_v18  ;;  %v340_v63 = vadd.f32 %v317_v44, %v1078_v19 }
  0xa2   : > { %v882_v3 = vpop.eup %881  ;;  %v477_v4 = vadd.f32 1.0, %v880_v1  ;;  %907 = vrcp.f32 %v475_v0  ;;  %v342_v18 = vadd.f32 %v317_v44, %v1082_v21  ;;  %v344_v21 = vadd.f32 %v317_v44, %v1086_v24 }
  0xa3   : > { %v884_v5 = vpop.eup %883  ;;  %v478_v6 = vadd.f32 1.0, %v882_v3  ;;  %909 = vrcp.f32 %v476_v2  ;;  %v341_v2 = vadd.f32 %v317_v44, %v1080_v20  ;;  %v815_v26 = vmul.f32 -1.442695, %v337_v57  ;;  %v591_v57 = vld [vmem:[%s1118_s27 + $0x30] sm:$0xff] }
  0xa4   : > { %v886_v8 = vpop.eup %885  ;;  %v479_v9 = vadd.f32 1.0, %v884_v5  ;;  %911 = vrcp.f32 %v477_v4  ;;  %v605_v5 = vld [vmem:[%s1118_s27 + $0xa0] sm:$0xff]  ;;  %v817_v34 = vmul.f32 -1.442695, %v339_v62  ;;  %v592_v62 = vld [vmem:[%s1118_s27 + $0x38] sm:$0xff] }
  0xa5   : > { %v888_v10 = vpop.eup %887  ;;  %v480_v11 = vadd.f32 1.0, %v886_v8  ;;  %913 = vrcp.f32 %v478_v6  ;;  %v606_v8 = vld [vmem:[%s1118_s27 + $0xa8] sm:$0xff] }
  0xa6   : > { %v890_v12 = vpop.eup %889  ;;  %915 = vrcp.f32 %v479_v9  ;;  %v457_v13 = vadd.f32 1.0, %v888_v10  ;;  %v343_v10 = vadd.f32 %v317_v44, %v1084_v22  ;;  %v819_v44 = vmul.f32 -1.442695, %v341_v2 }
  0xa7   : > { %v892_v23 = vpop.eup %891  ;;  %917 = vrcp.f32 %v480_v11  ;;  %v458_v25 = vadd.f32 1.0, %v890_v12  ;;  %v607_v12 = vld [vmem:[%s1118_s27 + $0xb0] sm:$0xff] }
  0xa8   : > { %v894_v28 = vpop.eup %893  ;;  %v459_v29 = vadd.f32 1.0, %v892_v23  ;;  %919 = vrcp.f32 %v457_v13  ;;  %v608_v23 = vld [vmem:[%s1118_s27 + $0xb8] sm:$0xff] }
  0xa9   : > { %v896_v32 = vpop.eup %895  ;;  %v460_v33 = vadd.f32 1.0, %v894_v28  ;;  %921 = vrcp.f32 %v458_v25 }
  0xaa   : > { %v898_v36 = vpop.eup %897  ;;  %v461_v37 = vadd.f32 1.0, %v896_v32  ;;  %923 = vrcp.f32 %v459_v29  ;;  %v585_v29 = vld [vmem:[%s1118_s27] sm:$0xff] }
  0xab   : > { %v900_v40 = vpop.eup %899  ;;  %v462_v41 = vadd.f32 1.0, %v898_v36  ;;  %925 = vrcp.f32 %v460_v33  ;;  %v586_v33 = vld [vmem:[%s1118_s27 + $0x8] sm:$0xff] }
  0xac   : > { %v902_v45 = vpop.eup %901  ;;  %v463_v46 = vadd.f32 1.0, %v900_v40  ;;  %927 = vrcp.f32 %v461_v37 }
  0xad   : > { %v904_v49 = vpop.eup %903  ;;  %v464_v51 = vadd.f32 1.0, %v902_v45  ;;  %929 = vrcp.f32 %v462_v41 }
  0xae   : > { %v906_v54 = vpop.eup %905  ;;  %v569_v55 = vadd.f32 1.0, %v904_v49  ;;  %931 = vrcp.f32 %v463_v46  ;;  %v820_v49 = vmul.f32 -1.442695, %v342_v18 }
  0xaf   : > { %v908_v59 = vpop.eup %907  ;;  %v570_v60 = vadd.f32 1.0, %v906_v54  ;;  %933 = vrcp.f32 %v464_v51  ;;  %v821_v54 = vmul.f32 -1.442695, %v343_v10 }
  0xb0   : > { %v910_v0 = vpop.eup %909  ;;  %v571_v16 = vadd.f32 1.0, %v908_v59  ;;  %v633_v1 = vmul.f32 %v601_v50, %v569_v55  ;;  %935 = vpow2.f32 %v831_v38  ;;  %v587_v38 = vld [vmem:[%s1118_s27 + $0x10] sm:$0xff]  ;;  %v822_v59 = vmul.f32 -1.442695, %v344_v21 }
  0xb1   : > { %v912_v3 = vpop.eup %911  ;;  %v572_v4 = vadd.f32 1.0, %v910_v0  ;;  %v634_v6 = vmul.f32 %v602_v56, %v570_v60  ;;  %937 = vpow2.f32 %v832_v39  ;;  %v818_v39 = vmul.f32 -1.442695, %v340_v63 }
  0xb2   : > { %v914_v7 = vpop.eup %913  ;;  %v573_v19 = vadd.f32 1.0, %v912_v3  ;;  %v635_v9 = vmul.f32 %v603_v61, %v571_v16  ;;  %665 = vst [vmem:[%s1131_s30 + $0x80] sm:$0xff] %v633_v1  ;;  %939 = vpow2.f32 %v833_v42  ;;  %v588_v42 = vld [vmem:[%s1118_s27 + $0x18] sm:$0xff] }
  0xb3   : > { %v916_v20 = vpop.eup %915  ;;  %v574_v11 = vadd.f32 1.0, %v914_v7  ;;  %v636_v13 = vmul.f32 %v604_v17, %v572_v4  ;;  %666 = vst [vmem:[%s1131_s30 + $0x88] sm:$0xff] %v634_v6  ;;  %941 = vpow2.f32 %v834_v43 }
  0xb4   : > { %v918_v14 = vpop.eup %917  ;;  %v575_v15 = vadd.f32 1.0, %v916_v20  ;;  %v637_v25 = vmul.f32 %v605_v5, %v573_v19  ;;  %667 = vst [vmem:[%s1131_s30 + $0x90] sm:$0xff] %v635_v9  ;;  %943 = vpow2.f32 %v835_v47  ;;  %v589_v47 = vld [vmem:[%s1118_s27 + $0x20] sm:$0xff] }
  0xb5   : > { %v920_v22 = vpop.eup %919  ;;  %v576_v27 = vadd.f32 1.0, %v918_v14  ;;  %v638_v28 = vmul.f32 %v606_v8, %v574_v11  ;;  %668 = vst [vmem:[%s1131_s30 + $0x98] sm:$0xff] %v636_v13  ;;  %945 = vpow2.f32 %v836_v48 }
  0xb6   : > { %v922_v24 = vpop.eup %921  ;;  %v639_v31 = vmul.f32 %v607_v12, %v575_v15  ;;  %669 = vst [vmem:[%s1131_s30 + $0xa0] sm:$0xff] %v637_v25  ;;  %v553_v32 = vadd.f32 1.0, %v920_v22  ;;  %947 = vpow2.f32 %v837_v52  ;;  %v590_v52 = vld [vmem:[%s1118_s27 + $0x28] sm:$0xff] }
  0xb7   : > { %v924_v35 = vpop.eup %923  ;;  %v640_v36 = vmul.f32 %v608_v23, %v576_v27  ;;  %670 = vst [vmem:[%s1131_s30 + $0xa8] sm:$0xff] %v638_v28  ;;  %v554_v37 = vadd.f32 1.0, %v922_v24  ;;  %949 = vpow2.f32 %v1121_v53 }
  0xb8   : > { %v926_v40 = vpop.eup %925  ;;  %671 = vst [vmem:[%s1131_s30 + $0xb0] sm:$0xff] %v639_v31  ;;  %v555_v41 = vadd.f32 1.0, %v924_v35  ;;  %v617_v43 = vmul.f32 %v585_v29, %v553_v32  ;;  %951 = vpow2.f32 %v815_v26 }
  0xb9   : > { %v928_v45 = vpop.eup %927  ;;  %672 = vst [vmem:[%s1131_s30 + $0xb8] sm:$0xff] %v640_v36  ;;  %v556_v46 = vadd.f32 1.0, %v926_v40  ;;  %v618_v48 = vmul.f32 %v586_v33, %v554_v37  ;;  %953 = vpow2.f32 %v816_v30  ;;  %v609_v36 = vld [vmem:[%s1118_s27 + $0xc0] sm:$0xff]  ;;  %v610_v40 = vld [vmem:[%s1118_s27 + $0xc8] sm:$0xff] }
  0xba   : > { %v930_v50 = vpop.eup %929  ;;  %v557_v51 = vadd.f32 1.0, %v928_v45  ;;  %v619_v53 = vmul.f32 %v587_v38, %v555_v41  ;;  %649 = vst [vmem:[%s1131_s30] sm:$0xff] %v617_v43  ;;  %955 = vpow2.f32 %v817_v34  ;;  %v611_v43 = vld [vmem:[%s1118_s27 + $0xd0] sm:$0xff] }
  0xbb   : > { %v932_v55 = vpop.eup %931  ;;  %v558_v56 = vadd.f32 1.0, %v930_v50  ;;  %v620_v58 = vmul.f32 %v588_v42, %v556_v46  ;;  %650 = vst [vmem:[%s1131_s30 + $0x8] sm:$0xff] %v618_v48  ;;  %957 = vpow2.f32 %v818_v39  ;;  %v612_v46 = vld [vmem:[%s1118_s27 + $0xd8] sm:$0xff]  ;;  %v613_v50 = vld [vmem:[%s1118_s27 + $0xe0] sm:$0xff] }
  0xbc   : > { %v934_v60 = vpop.eup %933  ;;  %v559_v61 = vadd.f32 1.0, %v932_v55  ;;  %v621_v63 = vmul.f32 %v589_v47, %v557_v51  ;;  %651 = vst [vmem:[%s1131_s30 + $0x10] sm:$0xff] %v619_v53  ;;  %959 = vpow2.f32 %v819_v44 }
  0xbd   : > { %v936_v0 = vpop.eup %935  ;;  %v560_v16 = vadd.f32 1.0, %v934_v60  ;;  %v622_v17 = vmul.f32 %v590_v52, %v558_v56  ;;  %652 = vst [vmem:[%s1131_s30 + $0x18] sm:$0xff] %v620_v58  ;;  %961 = vpow2.f32 %v820_v49  ;;  %v615_v58 = vld [vmem:[%s1118_s27 + $0xf0] sm:$0xff] }
  0xbe   : > { %v938_v1 = vpop.eup %937  ;;  %v623_v2 = vmul.f32 %v591_v57, %v559_v61  ;;  %653 = vst [vmem:[%s1131_s30 + $0x20] sm:$0xff] %v621_v63  ;;  %v481_v3 = vadd.f32 1.0, %v936_v0  ;;  %963 = vpow2.f32 %v821_v54  ;;  %v614_v54 = vld [vmem:[%s1118_s27 + $0xe8] sm:$0xff] }
  0xbf   : > { %v940_v4 = vpop.eup %939  ;;  %v624_v5 = vmul.f32 %v592_v62, %v560_v16  ;;  %654 = vst [vmem:[%s1131_s30 + $0x28] sm:$0xff] %v622_v17  ;;  %v482_v6 = vadd.f32 1.0, %v938_v1  ;;  %965 = vpow2.f32 %v822_v59  ;;  %v616_v62 = vld [vmem:[%s1118_s27 + $0xf8] sm:$0xff]  ;;  %v593_v1 = vld [vmem:[%s1118_s27 + $0x40] sm:$0xff] }
  0xc0   : > { %v942_v18 = vpop.eup %941  ;;  %655 = vst [vmem:[%s1131_s30 + $0x30] sm:$0xff] %v623_v2  ;;  %v483_v7 = vadd.f32 1.0, %v940_v4  ;;  %967 = vrcp.f32 %v481_v3 }
  0xc1   : > { %v944_v19 = vpop.eup %943  ;;  %656 = vst [vmem:[%s1131_s30 + $0x38] sm:$0xff] %v624_v5  ;;  %v484_v8 = vadd.f32 1.0, %v942_v18  ;;  %969 = vrcp.f32 %v482_v6  ;;  %v594_v5 = vld [vmem:[%s1118_s27 + $0x48] sm:$0xff] }
  0xc2   : > { %v946_v9 = vpop.eup %945  ;;  %v485_v10 = vadd.f32 1.0, %v944_v19  ;;  %971 = vrcp.f32 %v483_v7  ;;  %v595_v19 = vld [vmem:[%s1118_s27 + $0x50] sm:$0xff] }
  0xc3   : > { %v948_v20 = vpop.eup %947  ;;  %v486_v11 = vadd.f32 1.0, %v946_v9  ;;  %973 = vrcp.f32 %v484_v8 }
  0xc4   : > { %v950_v12 = vpop.eup %949  ;;  %v487_v13 = vadd.f32 1.0, %v948_v20  ;;  %975 = vrcp.f32 %v485_v10  ;;  %v596_v10 = vld [vmem:[%s1118_s27 + $0x58] sm:$0xff] }
  0xc5   : > { %v952_v21 = vpop.eup %951  ;;  %v488_v14 = vadd.f32 1.0, %v950_v12  ;;  %977 = vrcp.f32 %v486_v11 }
  0xc6   : > { %v954_v15 = vpop.eup %953  ;;  %979 = vrcp.f32 %v487_v13  ;;  %v465_v23 = vadd.f32 1.0, %v952_v21  ;;  %v597_v13 = vld [vmem:[%s1118_s27 + $0x60] sm:$0xff] }
  0xc7   : > { %v956_v25 = vpop.eup %955  ;;  %981 = vrcp.f32 %v488_v14  ;;  %v466_v26 = vadd.f32 1.0, %v954_v15 }
  0xc8   : > { %v958_v22 = vpop.eup %957  ;;  %v467_v27 = vadd.f32 1.0, %v956_v25  ;;  %983 = vrcp.f32 %v465_v23  ;;  %v598_v23 = vld [vmem:[%s1118_s27 + $0x68] sm:$0xff] }
  0xc9   : > { %v960_v28 = vpop.eup %959  ;;  %v468_v29 = vadd.f32 1.0, %v958_v22  ;;  %985 = vrcp.f32 %v466_v26 }
  0xca   : > { %v962_v30 = vpop.eup %961  ;;  %v469_v24 = vadd.f32 1.0, %v960_v28  ;;  %987 = vrcp.f32 %v467_v27  ;;  %v599_v27 = vld [vmem:[%s1118_s27 + $0x70] sm:$0xff] }
  0xcb   : > { %v964_v31 = vpop.eup %963  ;;  %v470_v32 = vadd.f32 1.0, %v962_v30  ;;  %989 = vrcp.f32 %v468_v29 }
  0xcc   : > { %v966_v33 = vpop.eup %965  ;;  %v471_v34 = vadd.f32 1.0, %v964_v31  ;;  %991 = vrcp.f32 %v469_v24  ;;  %v600_v24 = vld [vmem:[%s1118_s27 + $0x78] sm:$0xff] }
  0xcd   : > { %v968_v35 = vpop.eup %967  ;;  %v472_v37 = vadd.f32 1.0, %v966_v33  ;;  %993 = vrcp.f32 %v470_v32 }
  0xce   : > { %v970_v38 = vpop.eup %969  ;;  %v577_v39 = vadd.f32 1.0, %v968_v35  ;;  %995 = vrcp.f32 %v471_v34 }
  0xcf   : > { %v972_v41 = vpop.eup %971  ;;  %v578_v42 = vadd.f32 1.0, %v970_v38  ;;  %997 = vrcp.f32 %v472_v37 }
  0xd0   : > { %v974_v44 = vpop.eup %973  ;;  %v579_v45 = vadd.f32 1.0, %v972_v41  ;;  %v641_v47 = vmul.f32 %v609_v36, %v577_v39 }
  0xd1   : > { %v976_v48 = vpop.eup %975  ;;  %v580_v49 = vadd.f32 1.0, %v974_v44  ;;  %v642_v51 = vmul.f32 %v610_v40, %v578_v42 }
  0xd2   : > { %v978_v52 = vpop.eup %977  ;;  %v581_v53 = vadd.f32 1.0, %v976_v48  ;;  %v643_v55 = vmul.f32 %v611_v43, %v579_v45  ;;  %673 = vst [vmem:[%s1131_s30 + $0xc0] sm:$0xff] %v641_v47 }
  0xd3   : > { %v980_v56 = vpop.eup %979  ;;  %v582_v57 = vadd.f32 1.0, %v978_v52  ;;  %v644_v59 = vmul.f32 %v612_v46, %v580_v49  ;;  %674 = vst [vmem:[%s1131_s30 + $0xc8] sm:$0xff] %v642_v51 }
  0xd4   : > { %v982_v60 = vpop.eup %981  ;;  %v583_v61 = vadd.f32 1.0, %v980_v56  ;;  %v645_v63 = vmul.f32 %v613_v50, %v581_v53  ;;  %675 = vst [vmem:[%s1131_s30 + $0xd0] sm:$0xff] %v643_v55 }
  0xd5   : > { %v984_v0 = vpop.eup %983  ;;  %v584_v16 = vadd.f32 1.0, %v982_v60  ;;  %v646_v17 = vmul.f32 %v614_v54, %v582_v57  ;;  %676 = vst [vmem:[%s1131_s30 + $0xd8] sm:$0xff] %v644_v59 }
  0xd6   : > { %v986_v2 = vpop.eup %985  ;;  %v647_v3 = vmul.f32 %v615_v58, %v583_v61  ;;  %677 = vst [vmem:[%s1131_s30 + $0xe0] sm:$0xff] %v645_v63  ;;  %v561_v4 = vadd.f32 1.0, %v984_v0 }
  0xd7   : > { %v988_v6 = vpop.eup %987  ;;  %v648_v18 = vmul.f32 %v616_v62, %v584_v16  ;;  %678 = vst [vmem:[%s1131_s30 + $0xe8] sm:$0xff] %v646_v17  ;;  %v562_v7 = vadd.f32 1.0, %v986_v2 }
  0xd8   : > { %v990_v8 = vpop.eup %989  ;;  %679 = vst [vmem:[%s1131_s30 + $0xf0] sm:$0xff] %v647_v3  ;;  %v563_v9 = vadd.f32 1.0, %v988_v6  ;;  %v625_v20 = vmul.f32 %v593_v1, %v561_v4 }
  0xd9   : > { %v992_v11 = vpop.eup %991  ;;  %680 = vst [vmem:[%s1131_s30 + $0xf8] sm:$0xff] %v648_v18  ;;  %v564_v12 = vadd.f32 1.0, %v990_v8  ;;  %v626_v21 = vmul.f32 %v594_v5, %v562_v7 }
  0xda   : > { %v994_v14 = vpop.eup %993  ;;  %v565_v15 = vadd.f32 1.0, %v992_v11  ;;  %v627_v25 = vmul.f32 %v595_v19, %v563_v9  ;;  %657 = vst [vmem:[%s1131_s30 + $0x40] sm:$0xff] %v625_v20 }
  0xdb   : > { %v996_v26 = vpop.eup %995  ;;  %v566_v22 = vadd.f32 1.0, %v994_v14  ;;  %v628_v28 = vmul.f32 %v596_v10, %v564_v12  ;;  %658 = vst [vmem:[%s1131_s30 + $0x48] sm:$0xff] %v626_v21 }
  0xdc   : > { %v998_v29 = vpop.eup %997  ;;  %v567_v30 = vadd.f32 1.0, %v996_v26  ;;  %v629_v31 = vmul.f32 %v597_v13, %v565_v15  ;;  %659 = vst [vmem:[%s1131_s30 + $0x50] sm:$0xff] %v627_v25 }
  0xdd   : > { %v568_v32 = vadd.f32 1.0, %v998_v29  ;;  %v630_v33 = vmul.f32 %v598_v23, %v566_v22  ;;  %660 = vst [vmem:[%s1131_s30 + $0x58] sm:$0xff] %v628_v28 }
  0xde   : > { %v631_v34 = vmul.f32 %v599_v27, %v567_v30  ;;  %661 = vst [vmem:[%s1131_s30 + $0x60] sm:$0xff] %v629_v31 }
  0xdf   : > { %v632_v35 = vmul.f32 %v600_v24, %v568_v32  ;;  %662 = vst [vmem:[%s1131_s30 + $0x68] sm:$0xff] %v630_v33 }
  0xe0   : > { %663 = vst [vmem:[%s1131_s30 + $0x70] sm:$0xff] %v631_v34 }
  0xe1   : > { %664 = vst [vmem:[%s1131_s30 + $0x78] sm:$0xff] %v632_v35 }
  0xe2 PF: > { %s13_s14 = sadd.s32 1, %s1021_s14   ;;  %s1215_s12 = smov %s1017_s13 }
  0xe3   : > { %p10_p5 = scmp.ge.s32.totalorder %s13_s14, 4   ;;  %s1216_s13 = smov %s1218_s15 }
  0xe5   :  { %12 = sbr.rel (!%p10_p5) target bundleno = 2 (0x2), region = 68 }

// kernel: bam_forward.2
= control target key start
LH: loop header
LB: loop body
LE: loop exit
PB: predicated region body
PF: predicated region fallthrough
CT: control target
= control target key end

     0   :  { %s3240_s11 = smov 0   ;;  %s3242_s12 = smov 0   ;;  %s4899_s0 = inlined_call_operand.vmem [shape: f32[2,32,1024], index: 0, kind: input, shape index: {}]   ;;  %s4900_s1 = inlined_call_operand.vmem [shape: f32[8,32], index: 1, kind: input, shape index: {}]   ;;  %s4901_s2 = inlined_call_operand.vmem [shape: f32[8,1], index: 2, kind: input, shape index: {}]   ;;  %s4902_s3 = inlined_call_operand.vmem [shape: f32[3,8,72], index: 3, kind: input, shape index: {}]   ;;  %s4903_s4 = inlined_call_operand.vmem [shape: f32[3,8,1], index: 4, kind: input, shape index: {}]   ;;  %s4904_s5 = inlined_call_operand.vmem [shape: f32[1,8], index: 5, kind: input, shape index: {}]   ;;  %s4905_s6 = inlined_call_operand.<no memory space> [shape: f32[1,1], index: 6, kind: input, shape index: {}]   ;;  %s4906_s7 = inlined_call_operand.vmem [shape: f32[9,1,1024], index: 7, kind: input, shape index: {}]   ;;  %s4907_s8 = inlined_call_operand.vmem [shape: f32[2,32,1], index: 8, kind: output, shape index: {0}]   ;;  %s4908_s9 = inlined_call_operand.vmem [shape: f32[2,1,1024], index: 9, kind: output, shape index: {1}]  }
   0x1   :  { %v15_v0 = vstv %s4905_s6  ;;  %s3244_s13 = smov 0  }
   0x2   :  { %16 = vst [vmem:[#allocation4] sm:$0x1] %v15_v0 }
   0x3 LB: > { %s34_s6 = sadd.s32 1, %s3173_s12  ;;  %p3080_p0 = scmp.ge.s32.totalorder %s3177_s13, 1  ;;  %s3177_s13 = sphi %s3244_s13, %s22_s13   ;;  %s3173_s12 = sphi %s3242_s12, %s5205_s12   ;;  %s3169_s11 = sphi %s3240_s11, %s5204_s11  }
   0x4   : > { %p36_p1 = scmp.ge.s32.totalorder %s34_s6, 2  ;;  %p311_p2 = scmp.lt.s32.totalorder %s3177_s13, 3 }
   0x6   : > { %s5207_s6 = smov (%p36_p1, %s34_s6), 0  ;;  %p312_p3 = pnand %p3080_p0, %p311_p2 }
   0x8   : > { %315 = sbr.rel (%p312_p3) target bundleno = 1592 (0x638), region = 52 }
   0xd   : > { %p356_p4 = scmp.lt.s32.totalorder %s3169_s11, 1  ;;  %v465_v1 = vld [vmem:[%s4901_s2] sm:$0xff]  ;;  %v4909_v2 = vmov 0.0   ;;  %v3180_v3 = vmov 0   ;;  %vm471_vm0 = vcmask 261120   ;;  %s3181_s22 = smov 62  }
   0xe   : > { %539 = vmatprep.mubr.f32.mxu0 %v4909_v2  ;;  %610 = vmatprep.mubr.f32.mxu1 %v4909_v2  ;;  %v3290_v28 = vld [vmem:[%s4900_s1] sm:$0xff]  ;;  %s3182_s23 = smov 64   ;;  %s3183_s24 = smov 66   ;;  %vm1344_vm6 = vcmask 588800   ;;  %vm378_vm7 = vcmask 7168   ;;  %vm2627_vm8 = vcmask 64512  }
   0xf   : > { %s5209_s11 = smov (!%p356_p4, %s3169_s11), 1  ;;  %3153 = vset.pattern.permute.xlu0 %v3180_v3  ;;  %3154 = vset.pattern.permute.xlu1 %v3180_v3  ;;  %s3184_s25 = smov 126  }
  0x10   : > { %468 = vperm.xlu0 %3153, %v465_v1   ;;  %s3119_s16 = sshll.u32 %s5209_s11, 8  ;;  %s3185_s26 = smov 2  }
  0x11   : > { %s3269_s19 = scalar_lea.vmem %s4899_s0, %s3119_s16  ;;  %s3085_s30 = sshll.u32 %s5209_s11, 3 }
  0x12   : > { %v408_v4 = vld [vmem:[%s3269_s19 + $0xc8] sm:$0xff]  ;;  %v410_v5 = vld [vmem:[%s3269_s19 + $0xd8] sm:$0xff]  ;;  %v407_v6 = vld [vmem:[%s3269_s19 + $0xc0] sm:$0xff]  ;;  %s373_s15 = scalar_lea.vmem %s4908_s9, %s3085_s30 }
  0x13   : > { %499 = vmatprep.subr.mxu0 %v408_v4  ;;  %570 = vmatprep.subr.mxu1 %v410_v5  ;;  %v446_v7 = vadd.f32 %v408_v4, %v407_v6  ;;  %v409_v8 = vld [vmem:[%s3269_s19 + $0xd0] sm:$0xff]  ;;  %v400_v9 = vld [vmem:[%s3269_s19 + $0x88] sm:$0xff]  ;;  %v402_v10 = vld [vmem:[%s3269_s19 + $0x98] sm:$0xff] }
  0x14   : > { %500 = vmatpush1.msra.mxu0 %v407_v6  ;;  %571 = vmatpush1.msra.mxu1 %v409_v8  ;;  %v399_v11 = vld [vmem:[%s3269_s19 + $0x80] sm:$0xff]  ;;  %v401_v12 = vld [vmem:[%s3269_s19 + $0x90] sm:$0xff]  ;;  %v392_v13 = vld [vmem:[%s3269_s19 + $0x48] sm:$0xff] }
  0x15   : > { %v447_v14 = vadd.f32 %v446_v7, %v409_v8  ;;  %501 = vmatprep.subr.mxu0 %v400_v9  ;;  %572 = vmatprep.subr.mxu1 %v402_v10  ;;  %v437_v15 = vadd.f32 %v400_v9, %v399_v11  ;;  %v394_v16 = vld [vmem:[%s3269_s19 + $0x58] sm:$0xff]  ;;  %v391_v17 = vld [vmem:[%s3269_s19 + $0x40] sm:$0xff]  ;;  %v393_v18 = vld [vmem:[%s3269_s19 + $0x50] sm:$0xff] }
  0x16   : > { %502 = vmatpush1.msra.mxu0 %v399_v11  ;;  %573 = vmatpush1.msra.mxu1 %v401_v12  ;;  %v428_v19 = vadd.f32 %v392_v13, %v391_v17  ;;  %v384_v20 = vld [vmem:[%s3269_s19 + $0x8] sm:$0xff]  ;;  %v386_v21 = vld [vmem:[%s3269_s19 + $0x18] sm:$0xff]  ;;  %v383_v22 = vld [vmem:[%s3269_s19] sm:$0xff] }
  0x17   : > { %v448_v23 = vadd.f32 %v447_v14, %v410_v5  ;;  %v438_v24 = vadd.f32 %v437_v15, %v401_v12  ;;  %503 = vmatprep.subr.mxu0 %v392_v13  ;;  %574 = vmatprep.subr.mxu1 %v394_v16  ;;  %v419_v25 = vadd.f32 %v384_v20, %v383_v22  ;;  %v385_v26 = vld [vmem:[%s3269_s19 + $0x10] sm:$0xff]  ;;  %v411_v29 = vld [vmem:[%s3269_s19 + $0xe0] sm:$0xff]  ;;  %v412_v32 = vld [vmem:[%s3269_s19 + $0xe8] sm:$0xff] }
  0x18   : > { %504 = vmatpush1.msra.mxu0 %v391_v17  ;;  %v429_v27 = vadd.f32 %v428_v19, %v393_v18  ;;  %575 = vmatpush1.msra.mxu1 %v393_v18  ;;  %v414_v34 = vld [vmem:[%s3269_s19 + $0xf8] sm:$0xff]  ;;  %v413_v36 = vld [vmem:[%s3269_s19 + $0xf0] sm:$0xff]  ;;  %v403_v37 = vld [vmem:[%s3269_s19 + $0xa0] sm:$0xff] }
  0x19   : > { %v439_v30 = vadd.f32 %v438_v24, %v402_v10  ;;  %505 = vmatprep.subr.mxu0 %v384_v20  ;;  %576 = vmatprep.subr.mxu1 %v386_v21  ;;  %v420_v31 = vadd.f32 %v419_v25, %v385_v26  ;;  %v449_v33 = vadd.f32 %v448_v23, %v411_v29  ;;  %v404_v40 = vld [vmem:[%s3269_s19 + $0xa8] sm:$0xff]  ;;  %v406_v42 = vld [vmem:[%s3269_s19 + $0xb8] sm:$0xff]  ;;  %v395_v43 = vld [vmem:[%s3269_s19 + $0x60] sm:$0xff] }
  0x1a   : > { %v430_v35 = vadd.f32 %v429_v27, %v394_v16  ;;  %506 = vmatpush1.msra.mxu0 %v383_v22  ;;  %577 = vmatpush1.msra.mxu1 %v385_v26  ;;  %v405_v44 = vld [vmem:[%s3269_s19 + $0xb0] sm:$0xff]  ;;  %v387_v46 = vld [vmem:[%s3269_s19 + $0x20] sm:$0xff]  ;;  %v396_v49 = vld [vmem:[%s3269_s19 + $0x68] sm:$0xff] }
  0x1b   : > { %v421_v38 = vadd.f32 %v420_v31, %v386_v21  ;;  %3086 = vmatmul.mubr.msk.f32.vlgmr.msra.gmra.mxu0 %vm471_vm0, %v3290_v28  ;;  %3087 = vmatmul.mubr.msk.f32.vlgmr.msra.gmra.mxu1 %vm471_vm0, %v3290_v28  ;;  %v450_v39 = vadd.f32 %v449_v33, %v412_v32  ;;  %v440_v41 = vadd.f32 %v439_v30, %v403_v37  ;;  %v398_v50 = vld [vmem:[%s3269_s19 + $0x78] sm:$0xff]  ;;  %v397_v53 = vld [vmem:[%s3269_s19 + $0x70] sm:$0xff]  ;;  %v388_v54 = vld [vmem:[%s3269_s19 + $0x28] sm:$0xff] }
  0x1c   : > { %641 = vmatprep.subr.mxu0 %v412_v32  ;;  %712 = vmatprep.subr.mxu1 %v414_v34  ;;  %v431_v45 = vadd.f32 %v430_v35, %v395_v43  ;;  %v390_v58 = vld [vmem:[%s3269_s19 + $0x38] sm:$0xff]  ;;  %v389_v60 = vld [vmem:[%s3269_s19 + $0x30] sm:$0xff]  ;;  %v1338_v27 = vld [vmem:[%s4903_s4] sm:$0xff] }
  0x1d   : > { %v451_v47 = vadd.f32 %v450_v39, %v413_v36  ;;  %642 = vmatpush1.msra.mxu0 %v411_v29  ;;  %713 = vmatpush1.msra.mxu1 %v413_v36  ;;  %v441_v48 = vadd.f32 %v440_v41, %v404_v40  ;;  %v422_v51 = vadd.f32 %v421_v38, %v387_v46 }
  0x1e   : > { %643 = vmatprep.subr.mxu0 %v404_v40  ;;  %714 = vmatprep.subr.mxu1 %v406_v42  ;;  %v432_v52 = vadd.f32 %v431_v45, %v396_v49 }
  0x1f   : > { %v3310_v55 = vadd.f32 %v451_v47, %v414_v34  ;;  %v442_v56 = vadd.f32 %v441_v48, %v405_v44  ;;  %644 = vmatpush1.msra.mxu0 %v403_v37  ;;  %715 = vmatpush1.msra.mxu1 %v405_v44  ;;  %v423_v57 = vadd.f32 %v422_v51, %v388_v54  ;;  %v3448_v37 = vld [vmem:[%s4906_s7 + $0x40] sm:$0xff] }
  0x20   : > { %645 = vmatprep.subr.mxu0 %v396_v49  ;;  %v433_v59 = vadd.f32 %v432_v52, %v397_v53  ;;  %716 = vmatprep.subr.mxu1 %v398_v50 }
  0x21   : > { %5026 = vst [vmem:[#allocation5_spill] sm:$0xff] %v3310_v55  ;;  %v3314_v61 = vadd.f32 %v442_v56, %v406_v42  ;;  %646 = vmatpush1.msra.mxu0 %v395_v43  ;;  %717 = vmatpush1.msra.mxu1 %v397_v53  ;;  %v424_v62 = vadd.f32 %v423_v57, %v389_v60  ;;  %v3466_v42 = vld [vmem:[%s4906_s7 + $0x38] sm:$0xff] }
  0x22   : > { %v3316_v63 = vadd.f32 %v433_v59, %v398_v50  ;;  %647 = vmatprep.subr.mxu0 %v388_v54  ;;  %718 = vmatprep.subr.mxu1 %v390_v58 }
  0x23   : > { %5027 = vst [vmem:[#allocation6_spill] sm:$0xff] %v3314_v61  ;;  %v3318_v0 = vadd.f32 %v424_v62, %v390_v58  ;;  %648 = vmatpush1.msra.mxu0 %v387_v46  ;;  %681 = vmatprep.mubr.f32.mxu0 %v4909_v2 }
  0x24   : > { %5028 = vst [vmem:[#allocation7_spill] sm:$0xff] %v3316_v63  ;;  %719 = vmatpush1.msra.mxu1 %v389_v60  ;;  %752 = vmatprep.mubr.f32.mxu1 %v4909_v2 }
  0x25   : > { %5029 = vst [vmem:[#allocation8_spill] sm:$0xff] %v3318_v0  ;;  %3088 = vmatmul.mubr.msk.f32.vlgmr.msra.gmra.mxu0 %vm471_vm0, %v3290_v28  ;;  %3089 = vmatmul.mubr.msk.f32.vlgmr.msra.gmra.mxu1 %vm471_vm0, %v3290_v28  ;;  %v819_v28 = vlaneseq }
  0x26   : > { %1483 = vmatprep.mubr.f32.mxu1 %v4909_v2  ;;  %1412 = vmatprep.mubr.f32.mxu0 %v4909_v2 }
  0x27   : > { %v3431_v31 = vshrl.u32 %v819_v28, 7  ;;  %v3437_v34 = vand.u32 127, %v819_v28 }
  0x29   : > { %5030 = vst [vmem:[#allocation9_spill] sm:$0xff] %v3431_v31  ;;  %v3440_v35 = vsub.s32 0, %v3431_v31  ;;  %v3443_v36 = vsub.s32 1, %v3431_v31  ;;  %vm972_vm1 = vcmp.lt.s32.totalorder %v3437_v34, 62  ;;  %vm896_vm2 = vcmp.lt.s32.totalorder %v3437_v34, 64 }
  0x2a   : > { %vm821_vm3 = vcmp.lt.s32.totalorder %v3437_v34, 66  ;;  %vm1124_vm4 = vcmp.lt.s32.totalorder %v3437_v34, 126  ;;  %vm1048_vm5 = vcmp.lt.s32.totalorder %v3437_v34, 2 }
  0x2b   : > { %5031 = vst [vmem:[#allocation10_spill] sm:$0xff] %v3440_v35  ;;  %v3457_v40 = vrot.slane %v3448_v37, %v3440_v35  ;;  %v3461_v41 = vrot.slane %v3448_v37, %v3443_v36  ;;  %v3487_v49 = vrot.slane %v3466_v42, %v3440_v35  ;;  %v3491_v50 = vrot.slane %v3466_v42, %v3443_v36 }
  0x2d   : > { %5032 = vst [vmem:[#allocation11_spill] sm:$0xff] %v3457_v40  ;;  %5033 = vst [vmem:[#allocation12_spill] sm:$0xff] %v3461_v41 }
  0x2e   : > { %5034 = vst [vmem:[#allocation13_spill] sm:$0xff] %v3487_v49  ;;  %5035 = vst [vmem:[#allocation14_spill] sm:$0xff] %v3491_v50 }
  0x8b   : > { %v469_v1 = vpop.permute.xlu0 %468 }
  0xdb   : > { %v541_v3 = vpop.f32.mrf.mxu0  ;;  %v612_v4 = vpop.f32.mrf.mxu1 }
  0xdc   : > { %v542_v5 = vadd.f32 %v541_v3, %v469_v1  ;;  %v613_v6 = vadd.f32 %v612_v4, %v469_v1 }
  0xdd   : > { %v543_v9 = vpop.f32.mrf.mxu0  ;;  %v614_v12 = vpop.f32.mrf.mxu1 }
  0xde   : > { %v3328_v7 = vmax.f32 %v542_v5, 0.0  ;;  %v3330_v8 = vmax.f32 %v613_v6, 0.0  ;;  %v544_v10 = vadd.f32 %v543_v9, %v469_v1  ;;  %v615_v13 = vadd.f32 %v614_v12, %v469_v1  ;;  %v3521_v5 = vld [vmem:[%s4906_s7 + $0x28] sm:$0xff] }
  0xe0   : > { %960 = vrot.lane.b32.xlu1 %v3330_v8, %s3181_s22  ;;  %880 = vrot.lane.b32.xlu0 %v3328_v7, %s3182_s23  ;;  %v3344_v11 = vmax.f32 %v544_v10, 0.0  ;;  %v3354_v14 = vmax.f32 %v615_v13, 0.0  ;;  %v3537_v13 = vrot.slane %v3521_v5, %v3443_v36 }
  0xe2   : > { %5038 = vst [vmem:[#allocation17_spill] sm:$0xff] %v3537_v13 }
  0xe4   : > { %807 = vrot.lane.b32.xlu0 %v3330_v8, %s3183_s24  ;;  %956 = vrot.lane.b32.xlu1 %v3328_v7, %s3181_s22 }
  0xe5   : > { %v683_v15 = vpop.f32.mrf.mxu0  ;;  %v754_v17 = vpop.f32.mrf.mxu1 }
  0xe6   : > { %v684_v16 = vadd.f32 %v683_v15, %v469_v1  ;;  %v755_v20 = vadd.f32 %v754_v17, %v469_v1  ;;  %v3541_v15 = vrot.slane %v3521_v5, %v3440_v35  ;;  %v3549_v17 = vld [vmem:[%s4906_s7 + $0x18] sm:$0xff] }
  0xe7   : > { %v756_v19 = vpop.f32.mrf.mxu1  ;;  %v685_v24 = vpop.f32.mrf.mxu0 }
  0xe8   : > { %1108 = vrot.lane.b32.xlu0 %v3328_v7, %s3184_s25  ;;  %884 = vrot.lane.b32.xlu1 %v3330_v8, %s3182_s23  ;;  %v3376_v18 = vmax.f32 %v684_v16, 0.0  ;;  %v757_v21 = vadd.f32 %v756_v19, %v469_v1  ;;  %v3386_v22 = vmax.f32 %v755_v20, 0.0  ;;  %v686_v25 = vadd.f32 %v685_v24, %v469_v1  ;;  %v3516_v1 = vld [vmem:[%s4906_s7 + $0x30] sm:$0xff]  ;;  %5039 = vst [vmem:[#allocation18_spill] sm:$0xff] %v3541_v15 }
  0xe9   : > { %v3527_v6 = vrot.slane %v3516_v1, %v3440_v35  ;;  %v3531_v9 = vrot.slane %v3516_v1, %v3443_v36 }
  0xea   : > { %v3388_v23 = vmax.f32 %v757_v21, 0.0  ;;  %v3398_v26 = vmax.f32 %v686_v25, 0.0 }
  0xeb   : > { %5036 = vst [vmem:[#allocation15_spill] sm:$0xff] %v3527_v6  ;;  %5037 = vst [vmem:[#allocation16_spill] sm:$0xff] %v3531_v9 }
  0xec   : > { %958 = vrot.lane.b32.xlu0 %v3344_v11, %s3181_s22  ;;  %803 = vrot.lane.b32.xlu1 %v3328_v7, %s3183_s24 }
  0xf0   : > { %882 = vrot.lane.b32.xlu0 %v3344_v11, %s3182_s23  ;;  %1112 = vrot.lane.b32.xlu1 %v3330_v8, %s3184_s25 }
  0xf4   : > { %886 = vrot.lane.b32.xlu0 %v3354_v14, %s3182_s23  ;;  %1032 = vrot.lane.b32.xlu1 %v3328_v7, %s3185_s26 }
  0xf8   : > { %1110 = vrot.lane.b32.xlu0 %v3344_v11, %s3184_s25  ;;  %1036 = vrot.lane.b32.xlu1 %v3330_v8, %s3185_s26 }
  0xfc   : > { %1114 = vrot.lane.b32.xlu0 %v3354_v14, %s3184_s25  ;;  %962 = vrot.lane.b32.xlu1 %v3354_v14, %s3181_s22 }
 0x100   : > { %1034 = vrot.lane.b32.xlu0 %v3344_v11, %s3185_s26  ;;  %805 = vrot.lane.b32.xlu1 %v3344_v11, %s3183_s24 }
 0x104   : > { %1038 = vrot.lane.b32.xlu0 %v3354_v14, %s3185_s26  ;;  %809 = vrot.lane.b32.xlu1 %v3354_v14, %s3183_s24 }
 0x108   : > { %964 = vrot.lane.b32.xlu0 %v3376_v18, %s3181_s22  ;;  %888 = vrot.lane.b32.xlu1 %v3376_v18, %s3182_s23 }
 0x10c   : > { %811 = vrot.lane.b32.xlu0 %v3376_v18, %s3183_s24  ;;  %1116 = vrot.lane.b32.xlu1 %v3376_v18, %s3184_s25 }
 0x110   : > { %968 = vrot.lane.b32.xlu0 %v3386_v22, %s3181_s22  ;;  %1046 = vrot.lane.b32.xlu1 %v3388_v23, %s3185_s26 }
 0x114   : > { %892 = vrot.lane.b32.xlu0 %v3386_v22, %s3182_s23  ;;  %894 = vrot.lane.b32.xlu1 %v3388_v23, %s3182_s23 }
 0x118   : > { %815 = vrot.lane.b32.xlu0 %v3386_v22, %s3183_s24  ;;  %966 = vrot.lane.b32.xlu1 %v3398_v26, %s3181_s22 }
 0x11c   : > { %970 = vrot.lane.b32.xlu0 %v3388_v23, %s3181_s22  ;;  %890 = vrot.lane.b32.xlu1 %v3398_v26, %s3182_s23 }
 0x120   : > { %817 = vrot.lane.b32.xlu0 %v3388_v23, %s3183_s24  ;;  %813 = vrot.lane.b32.xlu1 %v3398_v26, %s3183_s24 }
 0x124   : > { %1120 = vrot.lane.b32.xlu0 %v3386_v22, %s3184_s25  ;;  %1118 = vrot.lane.b32.xlu1 %v3398_v26, %s3184_s25 }
 0x128   : > { %1040 = vrot.lane.b32.xlu0 %v3376_v18, %s3185_s26  ;;  %1122 = vrot.lane.b32.xlu1 %v3388_v23, %s3184_s25 }
 0x12c   : > { %1044 = vrot.lane.b32.xlu0 %v3386_v22, %s3185_s26  ;;  %1042 = vrot.lane.b32.xlu1 %v3398_v26, %s3185_s26 }
 0x130   : > { %1341 = vperm.xlu1 %3154, %v1338_v27  }
 0x152   : > { %v3427_v29 = vpop.permute.xlu1 %960  ;;  %v3429_v30 = vpop.permute.xlu0 %880 }
 0x156   : > { %v3433_v32 = vpop.permute.xlu0 %807  ;;  %v3435_v33 = vpop.permute.xlu1 %956 }
 0x15a   : > { %v3450_v38 = vpop.permute.xlu0 %1108  ;;  %v3452_v39 = vpop.permute.xlu1 %884 }
 0x15e   : > { %v959_v43 = vpop.permute.xlu0 %958  ;;  %v3468_v44 = vpop.permute.xlu1 %803 }
 0x15f   : > { %v3474_v45 = vsel %vm972_vm1, %v959_v43, %v3427_v29  ;;  %v3479_v46 = vsel %vm972_vm1, %v3435_v33, %v959_v43 }
 0x160   : > { %v1329_v47 = vmul.f32 %v3457_v40, %v3479_v46  ;;  %v1330_v48 = vmul.f32 %v3461_v41, %v3474_v45 }
 0x162   : > { %1362 = vmatprep.subr.mxu0 %v1330_v48  ;;  %v883_v51 = vpop.permute.xlu0 %882  ;;  %v3493_v52 = vpop.permute.xlu1 %1112  ;;  %v3577_v48 = vsub.s32 3, %v3431_v31 }
 0x163   : > { %v3498_v53 = vsel %vm896_vm2, %v883_v51, %v3452_v39  ;;  %v3503_v54 = vsel %vm896_vm2, %v3429_v30, %v883_v51  ;;  %1363 = vmatpush1.msra.mxu0 %v1329_v47  ;;  %v3574_v47 = vrot.slane %v3549_v17, %v3443_v36  ;;  %v3580_v51 = vsub.s32 2, %v3431_v31 }
 0x164   : > { %v1278_v56 = vmul.f32 %v3487_v49, %v3503_v54  ;;  %v1279_v57 = vmul.f32 %v3491_v50, %v3498_v53  ;;  %v3660_v0 = vrot.slane %v3521_v5, %v3577_v48 }
 0x165   : > { %5040 = vst [vmem:[#allocation19_spill] sm:$0xff] %v3574_v47  ;;  %v3640_v55 = vrot.slane %v3516_v1, %v3580_v51 }
 0x166   : > { %v887_v58 = vpop.permute.xlu0 %886  ;;  %1364 = vmatprep.subr.mxu0 %v1279_v57  ;;  %v3509_v59 = vpop.permute.xlu1 %1032  ;;  %5047 = vst [vmem:[#allocation26_spill] sm:$0xff] %v3660_v0 }
 0x167   : > { %1365 = vmatpush1.msra.mxu0 %v1278_v56  ;;  %5046 = vst [vmem:[#allocation25_spill] sm:$0xff] %v3640_v55 }
 0x16a   : > { %v1111_v60 = vpop.permute.xlu0 %1110  ;;  %v3511_v62 = vpop.permute.xlu1 %1036 }
 0x16b   : > { %v1130_v16 = vsel %vm1124_vm4, %v1111_v60, %v3493_v52  ;;  %v1131_v21 = vsel %vm1124_vm4, %v3450_v38, %v1111_v60  ;;  %v3589_v60 = vrot.slane %v3448_v37, %v3577_v48 }
 0x16c   : > { %v1177_v43 = vmul.f32 %v3537_v13, %v1130_v16  ;;  %v1176_v56 = vmul.f32 %v3541_v15, %v1131_v21  ;;  %v3736_v13 = vld [vmem:[%s4906_s7] sm:$0xff] }
 0x16d   : > { %5041 = vst [vmem:[#allocation20_spill] sm:$0xff] %v3589_v60 }
 0x16e   : > { %v1115_v3 = vpop.permute.xlu0 %1114  ;;  %v963_v4 = vpop.permute.xlu1 %962 }
 0x16f   : > { %v3598_v16 = vsel %vm972_vm1, %v3427_v29, %v963_v4 }
 0x172   : > { %v3533_v10 = vpop.permute.xlu0 %1034  ;;  %v806_v12 = vpop.permute.xlu1 %805 }
 0x173   : > { %v3554_v19 = vsel %vm821_vm3, %v806_v12, %v3433_v32  ;;  %v3559_v20 = vsel %vm821_vm3, %v3468_v44, %v806_v12  ;;  %v1055_v57 = vsel %vm1048_vm5, %v3509_v59, %v3533_v10  ;;  %v3593_v12 = vrot.slane %v3448_v37, %v3580_v51 }
 0x174   : > { %v1227_v24 = vmul.f32 %v3527_v6, %v3559_v20  ;;  %v1228_v25 = vmul.f32 %v3531_v9, %v3554_v19 }
 0x175   : > { %5042 = vst [vmem:[#allocation21_spill] sm:$0xff] %v3593_v12  ;;  %v1331_v63 = vmul.f32 %v3593_v12, %v3598_v16 }
 0x176   : > { %v3569_v27 = vpop.permute.xlu0 %1038  ;;  %1366 = vmatprep.subr.mxu0 %v1228_v25  ;;  %v810_v28 = vpop.permute.xlu1 %809  ;;  %v1101_v25 = vmul.f32 %v3574_v47, %v1055_v57  ;;  %v3628_v57 = vsel %vm896_vm2, %v3452_v39, %v887_v58  ;;  %v3683_v47 = vrot.slane %v3549_v17, %v3440_v35 }
 0x177   : > { %1367 = vmatpush1.msra.mxu0 %v1227_v24  ;;  %v3650_v39 = vsel %vm821_vm3, %v3433_v32, %v810_v28 }
 0x178   : > { %1368 = vmatprep.subr.mxu0 %v1177_v43  ;;  %v3608_v43 = vrot.slane %v3466_v42, %v3577_v48  ;;  %5049 = vst [vmem:[#allocation28_spill] sm:$0xff] %v3683_v47 }
 0x179   : > { %1369 = vmatpush1.msra.mxu0 %v1176_v56  ;;  %v3612_v56 = vrot.slane %v3466_v42, %v3580_v51 }
 0x17a   : > { %v3600_v21 = vpop.permute.xlu0 %964  ;;  %1370 = vmatprep.subr.mxu0 %v3344_v11  ;;  %v3603_v24 = vpop.permute.xlu1 %888  ;;  %5043 = vst [vmem:[#allocation22_spill] sm:$0xff] %v3608_v43 }
 0x17b   : > { %5044 = vst [vmem:[#allocation23_spill] sm:$0xff] %v3612_v56  ;;  %v3617_v29 = vsel %vm972_vm1, %v963_v4, %v3600_v21  ;;  %v3622_v11 = vsel %vm896_vm2, %v887_v58, %v3603_v24  ;;  %1371 = vmatpush1.msra.mxu0 %v3328_v7  ;;  %v3634_v4 = vrot.slane %v3516_v1, %v3577_v48  ;;  %v3645_v7 = vld [vmem:[%s4906_s7 + $0x10] sm:$0xff] }
 0x17c   : > { %1372 = vmatprep.subr.mxu0 %v1101_v25  ;;  %v1332_v2 = vmul.f32 %v3589_v60, %v3617_v29  ;;  %v1281_v61 = vmul.f32 %v3608_v43, %v3622_v11  ;;  %v1280_v12 = vmul.f32 %v3612_v56, %v3628_v57  ;;  %v3666_v60 = vrot.slane %v3521_v5, %v3580_v51 }
 0x17d   : > { %5045 = vst [vmem:[#allocation24_spill] sm:$0xff] %v3634_v4  ;;  %v1129_v43 = vsel %vm1124_vm4, %v3493_v52, %v1115_v3  ;;  %v3689_v15 = vrot.slane %v3645_v7, %v3443_v36 }
 0x17e   : > { %v3652_v58 = vpop.permute.xlu0 %811  ;;  %1433 = vmatprep.subr.mxu1 %v1332_v2  ;;  %v3654_v25 = vpop.permute.xlu1 %1116  ;;  %5048 = vst [vmem:[#allocation27_spill] sm:$0xff] %v3666_v60 }
 0x17f   : > { %v3671_v2 = vsel %vm821_vm3, %v810_v28, %v3652_v58  ;;  %v1128_v32 = vsel %vm1124_vm4, %v1115_v3, %v3654_v25  ;;  %1434 = vmatpush1.msra.mxu1 %v1331_v63  ;;  %v1229_v28 = vmul.f32 %v3640_v55, %v3650_v39  ;;  %5050 = vst [vmem:[#allocation29_spill] sm:$0xff] %v3689_v15 }
 0x180   : > { %1435 = vmatprep.subr.mxu1 %v1281_v61  ;;  %v1230_v56 = vmul.f32 %v3634_v4, %v3671_v2  ;;  %v1179_v61 = vmul.f32 %v3660_v0, %v1128_v32  ;;  %v3698_v3 = vrot.slane %v3549_v17, %v3577_v48  ;;  %v1178_v4 = vmul.f32 %v3666_v60, %v1129_v43  ;;  %v3716_v32 = vld [vmem:[%s4906_s7 + $0x8] sm:$0xff] }
 0x181   : > { %1436 = vmatpush1.msra.mxu1 %v1280_v12  ;;  %v3703_v12 = vrot.slane %v3549_v17, %v3580_v51  ;;  %v1053_v55 = vsel %vm1048_vm5, %v3511_v62, %v3569_v27  ;;  %v1054_v43 = vsel %vm1048_vm5, %v3533_v10, %v3511_v62  ;;  %v3725_v0 = vrot.slane %v3645_v7, %v3577_v48 }
 0x182   : > { %v3691_v63 = vpop.permute.xlu0 %968  ;;  %1437 = vmatprep.subr.mxu1 %v1230_v56  ;;  %v3693_v52 = vpop.permute.xlu1 %1046  ;;  %5051 = vst [vmem:[#allocation30_spill] sm:$0xff] %v3698_v3 }
 0x183   : > { %5052 = vst [vmem:[#allocation31_spill] sm:$0xff] %v3703_v12  ;;  %v1056_v56 = vsel %vm1048_vm5, %v3693_v52, %v3509_v59  ;;  %1438 = vmatpush1.msra.mxu1 %v1229_v28  ;;  %5053 = vst [vmem:[#allocation32_spill] sm:$0xff] %v3725_v0  ;;  %v3729_v59 = vrot.slane %v3645_v7, %v3580_v51  ;;  %v1025_v28 = vmul.f32 %v3689_v15, %v3479_v46 }
 0x184   : > { %v1100_v60 = vmul.f32 %v3683_v47, %v1056_v56  ;;  %1439 = vmatprep.subr.mxu1 %v1179_v61  ;;  %v1103_v61 = vmul.f32 %v3698_v3, %v1053_v55  ;;  %v3744_v56 = vrot.slane %v3716_v32, %v3577_v48  ;;  %v3748_v46 = vrot.slane %v3716_v32, %v3580_v51 }
 0x185   : > { %5054 = vst [vmem:[#allocation33_spill] sm:$0xff] %v3729_v59  ;;  %1440 = vmatpush1.msra.mxu1 %v1178_v4  ;;  %v1102_v4 = vmul.f32 %v3703_v12, %v1054_v43  ;;  %v3752_v15 = vsub.s32 4, %v3431_v31  ;;  %v1027_v55 = vmul.f32 %v3725_v0, %v3598_v16  ;;  %v3765_v43 = vrot.slane %v3736_v13, %v3580_v51  ;;  %v3821_v0 = vld [vmem:[%s4902_s3] sm:$0xff] }
 0x186   : > { %v3738_v62 = vpop.permute.xlu0 %892  ;;  %1373 = vmatpush1.msra.mxu0 %v1100_v60  ;;  %1441 = vmatprep.subr.mxu1 %v3354_v14  ;;  %v895_v10 = vpop.permute.xlu1 %894  ;;  %5055 = vst [vmem:[#allocation34_spill] sm:$0xff] %v3744_v56  ;;  %5056 = vst [vmem:[#allocation35_spill] sm:$0xff] %v3748_v46  ;;  %v3759_v14 = vrot.slane %v3736_v13, %v3577_v48  ;;  %v1026_v60 = vmul.f32 %v3729_v59, %v3474_v45  ;;  %v3775_v48 = vsub.s32 7, %v3431_v31 }
 0x187   : > { %1374 = vmatprep.subr.mxu0 %v1025_v28  ;;  %1442 = vmatpush1.msra.mxu1 %v3330_v8  ;;  %5058 = vst [vmem:[#allocation37_spill] sm:$0xff] %v3765_v43  ;;  %v3768_v28 = vsub.s32 6, %v3431_v31  ;;  %v951_v16 = vmul.f32 %v3744_v56, %v3628_v57  ;;  %v3779_v45 = vrot.slane %v3716_v32, %v3443_v36  ;;  %v3816_v59 = vsub.s32 5, %v3431_v31 }
 0x188   : > { %1443 = vmatprep.subr.mxu1 %v1103_v61  ;;  %5057 = vst [vmem:[#allocation36_spill] sm:$0xff] %v3759_v14  ;;  %v950_v51 = vmul.f32 %v3748_v46, %v3498_v53  ;;  %v3793_v57 = vrot.slane %v3736_v13, %v3443_v36  ;;  %v3797_v56 = vrot.slane %v3645_v7, %v3440_v35 }
 0x189   : > { %1444 = vmatpush1.msra.mxu1 %v1102_v4  ;;  %5059 = vst [vmem:[#allocation38_spill] sm:$0xff] %v3779_v45  ;;  %v3785_v4 = vrot.slane %v3645_v7, %v3752_v15  ;;  %v3801_v53 = vrot.slane %v3448_v37, %v3768_v28  ;;  %v3805_v46 = vrot.slane %v3448_v37, %v3775_v48 }
 0x18a   : > { %v3770_v8 = vpop.permute.xlu0 %815  ;;  %1445 = vmatprep.subr.mxu1 %v1027_v55  ;;  %v967_v61 = vpop.permute.xlu1 %966  ;;  %v3789_v55 = vrot.slane %v3716_v32, %v3752_v15  ;;  %5062 = vst [vmem:[#allocation41_spill] sm:$0xff] %v3797_v56  ;;  %v874_v36 = vmul.f32 %v3765_v43, %v3554_v19  ;;  %v3829_v19 = vrot.slane %v3448_v37, %v3752_v15 }
 0x18b   : > { %5060 = vst [vmem:[#allocation39_spill] sm:$0xff] %v3785_v4  ;;  %1446 = vmatpush1.msra.mxu1 %v1026_v60  ;;  %5063 = vst [vmem:[#allocation42_spill] sm:$0xff] %v3801_v53  ;;  %v875_v60 = vmul.f32 %v3759_v14, %v3650_v39  ;;  %v3825_v39 = vrot.slane %v3466_v42, %v3768_v28  ;;  %v3833_v31 = vrot.slane %v3466_v42, %v3775_v48 }
 0x18c   : > { %5061 = vst [vmem:[#allocation40_spill] sm:$0xff] %v3789_v55  ;;  %1447 = vmatprep.subr.mxu1 %v951_v16  ;;  %5064 = vst [vmem:[#allocation43_spill] sm:$0xff] %v3805_v46  ;;  %v3813_v16 = vrot.slane %v3716_v32, %v3440_v35  ;;  %v3837_v14 = vrot.slane %v3716_v32, %v3775_v48  ;;  %v3853_v3 = vrot.slane %v3516_v1, %v3775_v48 }
 0x18d   : > { %1448 = vmatpush1.msra.mxu1 %v950_v51  ;;  %5066 = vst [vmem:[#allocation45_spill] sm:$0xff] %v3829_v19  ;;  %v904_v6 = vsel %vm896_vm2, %v895_v10, %v3429_v30  ;;  %v949_v30 = vmul.f32 %v3779_v45, %v3503_v54  ;;  %v3890_v54 = vrot.slane %v3516_v1, %v3752_v15 }
 0x18e   : > { %5065 = vst [vmem:[#allocation44_spill] sm:$0xff] %v3813_v16  ;;  %v971_v43 = vpop.permute.xlu0 %970  ;;  %1449 = vmatprep.subr.mxu1 %v875_v60  ;;  %v891_v51 = vpop.permute.xlu1 %890  ;;  %5067 = vst [vmem:[#allocation46_spill] sm:$0xff] %v3837_v14  ;;  %v3849_v60 = vrot.slane %v3736_v13, %v3440_v35  ;;  %v3876_v35 = vrot.slane %v3448_v37, %v3816_v59  ;;  %v948_v45 = vmul.f32 %v3813_v16, %v904_v6 }
 0x18f   : > { %v3842_v47 = vsel %vm972_vm1, %v3691_v63, %v971_v43  ;;  %v980_v12 = vsel %vm972_vm1, %v971_v43, %v3435_v33  ;;  %1450 = vmatpush1.msra.mxu1 %v874_v36  ;;  %5069 = vst [vmem:[#allocation48_spill] sm:$0xff] %v3853_v3  ;;  %v3866_v43 = vrot.slane %v3466_v42, %v3752_v15 }
 0x190   : > { %5068 = vst [vmem:[#allocation47_spill] sm:$0xff] %v3849_v60  ;;  %v1024_v9 = vmul.f32 %v3797_v56, %v980_v12  ;;  %v1335_v49 = vmul.f32 %v3801_v53, %v3842_v47  ;;  %v1336_v33 = vmul.f32 %v3805_v46, %v980_v12  ;;  %3098 = vmatmul.mubr.msk.f32.vlgmr.msra.gmra.mxu1 %vm1344_vm6, %v3821_v0  ;;  %5072 = vst [vmem:[#allocation51_spill] sm:$0xff] %v3876_v35  ;;  %v5073_v53 = vmov 0.0  }
 0x191   : > { %5070 = vst [vmem:[#allocation49_spill] sm:$0xff] %v3866_v43  ;;  %v3870_v36 = vrot.slane %v3516_v1, %v3768_v28  ;;  %1625 = vmatprep.mubr.f32.mxu1 %v5073_v53  ;;  %v3882_v12 = vsel %vm896_vm2, %v3738_v62, %v895_v10  ;;  %v3886_v46 = vrot.slane %v3466_v42, %v3816_v59  ;;  %380 = vst.msk [vmem:[#allocation2 + $0x8] sm:$0xff] %vm378_vm7, %v5073_v53 }
 0x192   : > { %v818_v56 = vpop.permute.xlu0 %817  ;;  %1375 = vmatpush1.msra.mxu0 %v1024_v9  ;;  %1575 = vmatprep.subr.mxu1 %v1336_v33  ;;  %v814_v37 = vpop.permute.xlu1 %813  ;;  %v873_v9 = vmul.f32 %v3793_v57, %v3559_v20  ;;  %v3906_v10 = vsel %vm972_vm1, %v967_v61, %v3691_v63  ;;  %v1285_v40 = vmul.f32 %v3833_v31, %v904_v6 }
 0x193   : > { %5071 = vst [vmem:[#allocation50_spill] sm:$0xff] %v3870_v36  ;;  %5074 = vst [vmem:[#allocation52_spill] sm:$0xff] %v3886_v46  ;;  %v3896_v50 = vsel %vm821_vm3, %v3770_v8, %v818_v56  ;;  %v829_v42 = vsel %vm821_vm3, %v818_v56, %v3468_v44  ;;  %1376 = vmatprep.subr.mxu0 %v949_v30  ;;  %1576 = vmatpush1.msra.mxu1 %v1335_v49 }
 0x194   : > { %v872_v33 = vmul.f32 %v3849_v60, %v829_v42  ;;  %v1234_v16 = vmul.f32 %v3853_v3, %v829_v42  ;;  %v1284_v41 = vmul.f32 %v3825_v39, %v3882_v12  ;;  %v3916_v44 = vsel %vm972_vm1, %v3600_v21, %v967_v61  ;;  %1377 = vmatpush1.msra.mxu0 %v948_v45 }
 0x195   : > { %v1233_v20 = vmul.f32 %v3870_v36, %v3896_v50  ;;  %v3922_v63 = vrot.slane %v3516_v1, %v3816_v59  ;;  %v3927_v49 = vsel %vm896_vm2, %v891_v51, %v3738_v62  ;;  %1577 = vmatprep.subr.mxu1 %v1285_v40  ;;  %1378 = vmatprep.subr.mxu0 %v873_v9 }
 0x196   : > { %v1121_v6 = vpop.permute.xlu0 %1120  ;;  %v3931_v21 = vrot.slane %v3521_v5, %v3752_v15  ;;  %v3935_v56 = vrot.slane %v3521_v5, %v3816_v59  ;;  %v1119_v61 = vpop.permute.xlu1 %1118  ;;  %v3940_v1 = vsel %vm896_vm2, %v3603_v24, %v891_v51  ;;  %1578 = vmatpush1.msra.mxu1 %v1284_v41  ;;  %1379 = vmatpush1.msra.mxu0 %v872_v33 }
 0x197   : > { %5075 = vst [vmem:[#allocation53_spill] sm:$0xff] %v3922_v63  ;;  %v1334_v40 = vmul.f32 %v3876_v35, %v3906_v10  ;;  %v3946_v62 = vrot.slane %v3521_v5, %v3768_v28  ;;  %v1333_v45 = vmul.f32 %v3829_v19, %v3916_v44  ;;  %v3953_v30 = vsel %vm821_vm3, %v814_v37, %v3770_v8 }
 0x198   : > { %1579 = vmatprep.subr.mxu1 %v1234_v16  ;;  %3097 = vmatmul.mubr.msk.f32.vlgmr.msra.gmra.mxu0 %vm1344_vm6, %v3821_v0  ;;  %v3959_v41 = vrot.slane %v3521_v5, %v3775_v48  ;;  %v1283_v24 = vmul.f32 %v3886_v46, %v3927_v49  ;;  %v3966_v51 = vsel %vm821_vm3, %v3652_v58, %v814_v37 }
 0x199   : > { %5076 = vst [vmem:[#allocation54_spill] sm:$0xff] %v3946_v62  ;;  %1504 = vmatprep.subr.mxu0 %v1334_v40  ;;  %1580 = vmatpush1.msra.mxu1 %v1233_v20  ;;  %v3970_v8 = vrot.slane %v3549_v17, %v3775_v48  ;;  %v1282_v16 = vmul.f32 %v3866_v43, %v3940_v1  ;;  %379 = vst.msk [vmem:[#allocation2] sm:$0xff] %vm378_vm7, %v5073_v53 }
 0x19a   : > { %5077 = vst [vmem:[#allocation55_spill] sm:$0xff] %v3959_v41  ;;  %v1126_v5 = vsel %vm1124_vm4, %v1119_v61, %v1121_v6  ;;  %1505 = vmatpush1.msra.mxu0 %v1333_v45  ;;  %v1041_v42 = vpop.permute.xlu0 %1040  ;;  %v1123_v9 = vpop.permute.xlu1 %1122  ;;  %v3978_v33 = vrot.slane %v3549_v17, %v3816_v59  ;;  %1554 = vmatprep.mubr.f32.mxu0 %v5073_v53  ;;  %381 = vst.msk [vmem:[#allocation2 + $0x10] sm:$0xff] %vm378_vm7, %v5073_v53 }
 0x19b   : > { %5078 = vst [vmem:[#allocation56_spill] sm:$0xff] %v3970_v8  ;;  %v1232_v58 = vmul.f32 %v3922_v63, %v3953_v30  ;;  %v1127_v37 = vsel %vm1124_vm4, %v3654_v25, %v1119_v61  ;;  %1506 = vmatprep.subr.mxu0 %v1283_v24  ;;  %v1125_v20 = vsel %vm1124_vm4, %v1121_v6, %v1123_v9  ;;  %382 = vst.msk [vmem:[#allocation2 + $0x18] sm:$0xff] %vm378_vm7, %v5073_v53 }
 0x19c   : > { %5079 = vst [vmem:[#allocation57_spill] sm:$0xff] %v3978_v33  ;;  %v1132_v40 = vsel %vm1124_vm4, %v1123_v9, %v3450_v38  ;;  %v1231_v45 = vmul.f32 %v3890_v54, %v3966_v51  ;;  %1507 = vmatpush1.msra.mxu0 %v1282_v16  ;;  %v1182_v43 = vmul.f32 %v3946_v62, %v1125_v20 }
 0x19d   : > { %v1183_v3 = vmul.f32 %v3959_v41, %v1132_v40  ;;  %v3997_v63 = vrot.slane %v3549_v17, %v3768_v28  ;;  %v4001_v25 = vrot.slane %v3645_v7, %v3768_v28  ;;  %v4005_v6 = vrot.slane %v3645_v7, %v3775_v48  ;;  %1508 = vmatprep.subr.mxu0 %v1232_v58 }
 0x19e   : > { %v1181_v38 = vmul.f32 %v3935_v56, %v1126_v5  ;;  %v4010_v61 = vrot.slane %v3645_v7, %v3816_v59  ;;  %v1180_v24 = vmul.f32 %v3931_v21, %v1127_v37  ;;  %v4015_v16 = vrot.slane %v3549_v17, %v3752_v15  ;;  %1509 = vmatpush1.msra.mxu0 %v1231_v45  ;;  %v1045_v20 = vpop.permute.xlu0 %1044  ;;  %v1043_v40 = vpop.permute.xlu1 %1042 }
 0x19f   : > { %5080 = vst [vmem:[#allocation58_spill] sm:$0xff] %v3997_v63  ;;  %5081 = vst [vmem:[#allocation59_spill] sm:$0xff] %v4001_v25  ;;  %v1052_v9 = vsel %vm1048_vm5, %v3569_v27, %v1041_v42  ;;  %1581 = vmatprep.subr.mxu1 %v1183_v3  ;;  %v1049_v7 = vsel %vm1048_vm5, %v1045_v20, %v3693_v52  ;;  %v1050_v5 = vsel %vm1048_vm5, %v1043_v40, %v1045_v20 }
 0x1a0   : > { %5082 = vst [vmem:[#allocation60_spill] sm:$0xff] %v4005_v6  ;;  %5083 = vst [vmem:[#allocation61_spill] sm:$0xff] %v4010_v61  ;;  %1510 = vmatprep.subr.mxu0 %v1181_v38  ;;  %v1051_v17 = vsel %vm1048_vm5, %v1041_v42, %v1043_v40  ;;  %1582 = vmatpush1.msra.mxu1 %v1182_v43  ;;  %v1107_v58 = vmul.f32 %v3970_v8, %v1049_v7  ;;  %v5107_v8 = vld [vmem:[#allocation24_spill] sm:$0xff] }
 0x1a1   : > { %5084 = vst [vmem:[#allocation62_spill] sm:$0xff] %v4015_v16  ;;  %1511 = vmatpush1.msra.mxu0 %v1180_v24  ;;  %v1105_v27 = vmul.f32 %v3978_v33, %v1051_v17  ;;  %v1106_v3 = vmul.f32 %v3997_v63, %v1050_v5  ;;  %1583 = vmatprep.subr.mxu1 %v3388_v23 }
 0x1a2   : > { %v4033_v37 = vrot.slane %v3716_v32, %v3816_v59  ;;  %v4037_v52 = vrot.slane %v3716_v32, %v3768_v28  ;;  %v4041_v43 = vrot.slane %v3736_v13, %v3775_v48  ;;  %1512 = vmatprep.subr.mxu0 %v3398_v26  ;;  %1584 = vmatpush1.msra.mxu1 %v3386_v22 }
 0x1a3   : > { %v1031_v42 = vmul.f32 %v4005_v6, %v3842_v47  ;;  %v4049_v23 = vrot.slane %v3736_v13, %v3816_v59  ;;  %v1104_v45 = vmul.f32 %v4015_v16, %v1052_v9  ;;  %1513 = vmatpush1.msra.mxu0 %v3376_v18  ;;  %1585 = vmatprep.subr.mxu1 %v1107_v58  ;;  %v5100_v6 = vld [vmem:[#allocation18_spill] sm:$0xff] }
 0x1a4   : > { %5085 = vst [vmem:[#allocation63_spill] sm:$0xff] %v4033_v37  ;;  %5086 = vst [vmem:[#allocation64_spill] sm:$0xff] %v4037_v52  ;;  %v1030_v32 = vmul.f32 %v4001_v25, %v3906_v10  ;;  %v4057_v26 = vrot.slane %v3736_v13, %v3768_v28  ;;  %1514 = vmatprep.subr.mxu0 %v1105_v27  ;;  %1586 = vmatpush1.msra.mxu1 %v1106_v3 }
 0x1a5   : > { %5087 = vst [vmem:[#allocation65_spill] sm:$0xff] %v4041_v43  ;;  %5088 = vst [vmem:[#allocation66_spill] sm:$0xff] %v4049_v23  ;;  %v1029_v22 = vmul.f32 %v4010_v61, %v3916_v44  ;;  %v1028_v47 = vmul.f32 %v3785_v4, %v3617_v29  ;;  %v4065_v59 = vrot.slane %v3736_v13, %v3752_v15  ;;  %1515 = vmatpush1.msra.mxu0 %v1104_v45 }
 0x1a6   : > { %5089 = vst [vmem:[#allocation67_spill] sm:$0xff] %v4057_v26  ;;  %1587 = vmatprep.subr.mxu1 %v1031_v42  ;;  %v955_v18 = vmul.f32 %v3837_v14, %v3882_v12  ;;  %v953_v28 = vmul.f32 %v4033_v37, %v3940_v1  ;;  %v954_v48 = vmul.f32 %v4037_v52, %v3927_v49 }
 0x1a7   : > { %5090 = vst [vmem:[#allocation68_spill] sm:$0xff] %v4065_v59  ;;  %1516 = vmatprep.subr.mxu0 %v1029_v22  ;;  %1588 = vmatpush1.msra.mxu1 %v1030_v32  ;;  %v952_v29 = vmul.f32 %v3789_v55, %v3622_v11  ;;  %v879_v13 = vmul.f32 %v4041_v43, %v3896_v50  ;;  %v5097_v43 = vld [vmem:[#allocation16_spill] sm:$0xff] }
 0x1a8   : > { %1517 = vmatpush1.msra.mxu0 %v1028_v47  ;;  %1589 = vmatprep.subr.mxu1 %v955_v18  ;;  %v877_v15 = vmul.f32 %v4049_v23, %v3966_v51  ;;  %v878_v12 = vmul.f32 %v4057_v26, %v3953_v30  ;;  %v876_v10 = vmul.f32 %v4065_v59, %v3671_v2  ;;  %v3102_v18 = vld [vmem:[%s4903_s4 + $0x8] sm:$0xff] }
 0x1a9   : > { %1518 = vmatprep.subr.mxu0 %v953_v28  ;;  %1590 = vmatpush1.msra.mxu1 %v954_v48  ;;  %v5108_v23 = vld [vmem:[#allocation25_spill] sm:$0xff] }
 0x1aa   : > { %1519 = vmatpush1.msra.mxu0 %v952_v29  ;;  %1591 = vmatprep.subr.mxu1 %v879_v13 }
 0x1ab   : > { %1520 = vmatprep.subr.mxu0 %v877_v15  ;;  %1592 = vmatpush1.msra.mxu1 %v878_v12  ;;  %v1342_v50 = vpop.permute.xlu1 %1341 }
 0x1ac   : > { %1521 = vmatpush1.msra.mxu0 %v876_v10  ;;  %3100 = vmatmul.mubr.msk.f32.vlgmr.msra.gmra.mxu1 %vm1344_vm6, %v3821_v0 }
 0x1ad   : > { %3099 = vmatmul.mubr.msk.f32.vlgmr.msra.gmra.mxu0 %vm1344_vm6, %v3821_v0  ;;  %1971 = vmatprep.mubr.f32.mxu1 %v5073_v53 }
 0x1ae   : > { %1900 = vmatprep.mubr.f32.mxu0 %v5073_v53 }
 0x250   : > { %v1485_v30 = vpop.f32.mrf.mxu1 }
 0x251   : > { %v1486_v51 = vadd.f32 %v1485_v30, %v1342_v50 }
 0x252   : > { %v1487_v24 = vpop.f32.mrf.mxu1 }
 0x253   : > { %v4113_v38 = vmax.f32 %v1486_v51, 0.0  ;;  %v1488_v9 = vadd.f32 %v1487_v24, %v1342_v50 }
 0x255   : > { %v4123_v20 = vmax.f32 %v1488_v9, 0.0 }
 0x258   : > { %v1414_v11 = vpop.f32.mrf.mxu0 }
 0x259   : > { %v1415_v44 = vadd.f32 %v1414_v11, %v1342_v50 }
 0x25a   : > { %v1416_v2 = vpop.f32.mrf.mxu0 }
 0x25b   : > { %v4089_v49 = vmax.f32 %v1415_v44, 0.0  ;;  %v1417_v1 = vadd.f32 %v1416_v2, %v1342_v50 }
 0x25d   : > { %1672 = vrot.lane.b32.xlu1 %v4089_v49, %s3182_s23  ;;  %1704 = vrot.lane.b32.xlu0 %v4089_v49, %s3181_s22  ;;  %v4099_v0 = vmax.f32 %v1417_v1, 0.0 }
 0x261   : > { %1768 = vrot.lane.b32.xlu1 %v4089_v49, %s3184_s25  ;;  %1640 = vrot.lane.b32.xlu0 %v4089_v49, %s3183_s24 }
 0x265   : > { %1674 = vrot.lane.b32.xlu1 %v4099_v0, %s3182_s23  ;;  %1736 = vrot.lane.b32.xlu0 %v4089_v49, %s3185_s26 }
 0x269   : > { %1770 = vrot.lane.b32.xlu1 %v4099_v0, %s3184_s25  ;;  %1706 = vrot.lane.b32.xlu0 %v4099_v0, %s3181_s22 }
 0x26c   : > { %v1627_v17 = vpop.f32.mrf.mxu1 }
 0x26d   : > { %1738 = vrot.lane.b32.xlu1 %v4099_v0, %s3185_s26  ;;  %1642 = vrot.lane.b32.xlu0 %v4099_v0, %s3183_s24  ;;  %v1556_v40 = vpop.f32.mrf.mxu0  ;;  %v1628_v27 = vadd.f32 %v1627_v17, %v1342_v50  ;;  %v5094_v17 = vld [vmem:[#allocation11_spill] sm:$0xff] }
 0x26e   : > { %v1557_v7 = vadd.f32 %v1556_v40, %v1342_v50  ;;  %v1629_v42 = vpop.f32.mrf.mxu1  ;;  %v5093_v40 = vld [vmem:[#allocation12_spill] sm:$0xff] }
 0x26f   : > { %v1558_v58 = vpop.f32.mrf.mxu0  ;;  %v4147_v45 = vmax.f32 %v1628_v27, 0.0  ;;  %v1630_v22 = vadd.f32 %v1629_v42, %v1342_v50 }
 0x270   : > { %v4137_v5 = vmax.f32 %v1557_v7, 0.0  ;;  %v1559_v3 = vadd.f32 %v1558_v58, %v1342_v50 }
 0x271   : > { %1708 = vrot.lane.b32.xlu1 %v4113_v38, %s3181_s22  ;;  %1676 = vrot.lane.b32.xlu0 %v4113_v38, %s3182_s23  ;;  %5091 = vst [vmem:[#allocation69_spill] sm:$0xff] %v4147_v45  ;;  %v4155_v47 = vmax.f32 %v1630_v22, 0.0 }
 0x272   : > { %v4149_v32 = vmax.f32 %v1559_v3, 0.0  ;;  %v5095_v3 = vld [vmem:[#allocation14_spill] sm:$0xff] }
 0x273   : > { %5092 = vst [vmem:[#allocation70_spill] sm:$0xff] %v4155_v47 }
 0x275   : > { %1644 = vrot.lane.b32.xlu1 %v4113_v38, %s3183_s24  ;;  %1772 = vrot.lane.b32.xlu0 %v4113_v38, %s3184_s25 }
 0x279   : > { %1646 = vrot.lane.b32.xlu1 %v4123_v20, %s3183_s24  ;;  %1740 = vrot.lane.b32.xlu0 %v4113_v38, %s3185_s26 }
 0x27d   : > { %1774 = vrot.lane.b32.xlu1 %v4123_v20, %s3184_s25  ;;  %1710 = vrot.lane.b32.xlu0 %v4123_v20, %s3181_s22 }
 0x281   : > { %1742 = vrot.lane.b32.xlu1 %v4123_v20, %s3185_s26  ;;  %1678 = vrot.lane.b32.xlu0 %v4123_v20, %s3182_s23 }
 0x285   : > { %1712 = vrot.lane.b32.xlu1 %v4137_v5, %s3181_s22  ;;  %1648 = vrot.lane.b32.xlu0 %v4137_v5, %s3183_s24 }
 0x289   : > { %1680 = vrot.lane.b32.xlu1 %v4137_v5, %s3182_s23  ;;  %1776 = vrot.lane.b32.xlu0 %v4137_v5, %s3184_s25 }
 0x28d   : > { %1716 = vrot.lane.b32.xlu1 %v4147_v45, %s3181_s22  ;;  %1714 = vrot.lane.b32.xlu0 %v4149_v32, %s3181_s22 }
 0x291   : > { %1718 = vrot.lane.b32.xlu1 %v4155_v47, %s3181_s22  ;;  %1750 = vrot.lane.b32.xlu0 %v4155_v47, %s3185_s26 }
 0x295   : > { %1684 = vrot.lane.b32.xlu1 %v4147_v45, %s3182_s23  ;;  %1686 = vrot.lane.b32.xlu0 %v4155_v47, %s3182_s23 }
 0x299   : > { %1654 = vrot.lane.b32.xlu1 %v4155_v47, %s3183_s24  ;;  %1682 = vrot.lane.b32.xlu0 %v4149_v32, %s3182_s23 }
 0x29d   : > { %1652 = vrot.lane.b32.xlu1 %v4147_v45, %s3183_s24  ;;  %1650 = vrot.lane.b32.xlu0 %v4149_v32, %s3183_s24 }
 0x2a1   : > { %1780 = vrot.lane.b32.xlu1 %v4147_v45, %s3184_s25  ;;  %1778 = vrot.lane.b32.xlu0 %v4149_v32, %s3184_s25 }
 0x2a5   : > { %1746 = vrot.lane.b32.xlu1 %v4149_v32, %s3185_s26  ;;  %1744 = vrot.lane.b32.xlu0 %v4137_v5, %s3185_s26 }
 0x2a9   : > { %1748 = vrot.lane.b32.xlu1 %v4147_v45, %s3185_s26  ;;  %1782 = vrot.lane.b32.xlu0 %v4155_v47, %s3184_s25 }
 0x2ad   : > { %1830 = vperm.xlu0 %3153, %v3102_v18  }
 0x2cf   : > { %v4188_v28 = vpop.permute.xlu1 %1672  ;;  %v4190_v48 = vpop.permute.xlu0 %1704 }
 0x2d3   : > { %v4192_v29 = vpop.permute.xlu1 %1768  ;;  %v4194_v13 = vpop.permute.xlu0 %1640 }
 0x2d7   : > { %v1675_v15 = vpop.permute.xlu1 %1674  ;;  %v4196_v12 = vpop.permute.xlu0 %1736 }
 0x2d8   : > { %v4216_v9 = vsel %vm896_vm2, %v4188_v28, %v1675_v15 }
 0x2db   : > { %v1771_v10 = vpop.permute.xlu1 %1770  ;;  %v1707_v50 = vpop.permute.xlu0 %1706 }
 0x2dc   : > { %v4203_v2 = vsel %vm972_vm1, %v4190_v48, %v1707_v50  ;;  %v1790_v26 = vsel %vm1124_vm4, %v4192_v29, %v1771_v10 }
 0x2dd   : > { %v1816_v58 = vmul.f32 %v4203_v2, %v5094_v17  ;;  %v1792_v45 = vmul.f32 %v1790_v26, %v5100_v6 }
 0x2df   : > { %v4198_v11 = vpop.permute.xlu1 %1738  ;;  %v1643_v44 = vpop.permute.xlu0 %1642 }
 0x2e0   : > { %v4225_v27 = vsel %vm821_vm3, %v4194_v13, %v1643_v44 }
 0x2e3   : > { %v1709_v1 = vpop.permute.xlu1 %1708  ;;  %v1677_v30 = vpop.permute.xlu0 %1676 }
 0x2e4   : > { %v4207_v51 = vsel %vm972_vm1, %v1707_v50, %v1709_v1  ;;  %v4211_v24 = vsel %vm896_vm2, %v1675_v15, %v1677_v30  ;;  %v5096_v50 = vld [vmem:[#allocation13_spill] sm:$0xff] }
 0x2e5   : > { %v1817_v7 = vmul.f32 %v4207_v51, %v5093_v40  ;;  %v1809_v42 = vmul.f32 %v4211_v24, %v5095_v3  ;;  %v1808_v15 = vmul.f32 %v4216_v9, %v5096_v50  ;;  %v5099_v50 = vld [vmem:[#allocation17_spill] sm:$0xff] }
 0x2e7   : > { %v1645_v22 = vpop.permute.xlu1 %1644  ;;  %1850 = vmatprep.subr.mxu0 %v1817_v7  ;;  %v1773_v18 = vpop.permute.xlu0 %1772  ;;  %v5098_v7 = vld [vmem:[#allocation15_spill] sm:$0xff] }
 0x2e8   : > { %v4233_v40 = vsel %vm821_vm3, %v1643_v44, %v1645_v22  ;;  %v1789_v17 = vsel %vm1124_vm4, %v1771_v10, %v1773_v18  ;;  %1851 = vmatpush1.msra.mxu0 %v1816_v58  ;;  %v1800_v52 = vmul.f32 %v4225_v27, %v5098_v7  ;;  %v1758_v10 = vsel %vm1048_vm5, %v4196_v12, %v4198_v11  ;;  %v5101_v58 = vld [vmem:[#allocation19_spill] sm:$0xff] }
 0x2e9   : > { %v1801_v3 = vmul.f32 %v4233_v40, %v5097_v43  ;;  %1852 = vmatprep.subr.mxu0 %v1809_v42  ;;  %v1793_v14 = vmul.f32 %v1789_v17, %v5099_v50  ;;  %v1761_v42 = vmul.f32 %v1758_v10, %v5101_v58 }
 0x2ea   : > { %1853 = vmatpush1.msra.mxu0 %v1808_v15 }
 0x2eb   : > { %v1647_v44 = vpop.permute.xlu1 %1646  ;;  %1854 = vmatprep.subr.mxu0 %v1801_v3  ;;  %v1741_v25 = vpop.permute.xlu0 %1740 }
 0x2ec   : > { %1855 = vmatpush1.msra.mxu0 %v1800_v52  ;;  %v5102_v52 = vld [vmem:[#allocation20_spill] sm:$0xff] }
 0x2ed   : > { %1856 = vmatprep.subr.mxu0 %v1793_v14 }
 0x2ee   : > { %1857 = vmatpush1.msra.mxu0 %v1792_v45  ;;  %v5103_v45 = vld [vmem:[#allocation21_spill] sm:$0xff] }
 0x2ef   : > { %v1775_v43 = vpop.permute.xlu1 %1774  ;;  %1858 = vmatprep.subr.mxu0 %v4099_v0  ;;  %v1711_v15 = vpop.permute.xlu0 %1710 }
 0x2f0   : > { %1859 = vmatpush1.msra.mxu0 %v4089_v49  ;;  %v1724_v3 = vsel %vm972_vm1, %v1709_v1, %v1711_v15  ;;  %v1788_v47 = vsel %vm1124_vm4, %v1773_v18, %v1775_v43 }
 0x2f1   : > { %1860 = vmatprep.subr.mxu0 %v1761_v42  ;;  %v1818_v10 = vmul.f32 %v1724_v3, %v5103_v45  ;;  %v1660_v45 = vsel %vm821_vm3, %v1645_v22, %v1647_v44 }
 0x2f2   : > { %v1802_v22 = vmul.f32 %v1660_v45, %v5108_v23 }
 0x2f3   : > { %v4253_v17 = vpop.permute.xlu1 %1742  ;;  %v1679_v26 = vpop.permute.xlu0 %1678 }
 0x2f4   : > { %v1692_v49 = vsel %vm896_vm2, %v1677_v30, %v1679_v26  ;;  %v5105_v30 = vld [vmem:[#allocation22_spill] sm:$0xff]  ;;  %v1756_v55 = vsel %vm1048_vm5, %v1741_v25, %v4253_v17 }
 0x2f7   : > { %v1713_v6 = vpop.permute.xlu1 %1712  ;;  %v4257_v50 = vpop.permute.xlu0 %1648 }
 0x2f8   : > { %v4261_v14 = vsel %vm972_vm1, %v1711_v15, %v1713_v6  ;;  %v4275_v1 = vsel %vm821_vm3, %v1647_v44, %v4257_v50  ;;  %v5109_v44 = vld [vmem:[#allocation26_spill] sm:$0xff] }
 0x2f9   : > { %v1819_v0 = vmul.f32 %v4261_v14, %v5102_v52 }
 0x2fb   : > { %v4268_v42 = vpop.permute.xlu1 %1680  ;;  %1921 = vmatprep.subr.mxu1 %v1819_v0  ;;  %v4270_v58 = vpop.permute.xlu0 %1776  ;;  %v5106_v0 = vld [vmem:[#allocation23_spill] sm:$0xff] }
 0x2fc   : > { %v4280_v15 = vsel %vm896_vm2, %v1679_v26, %v4268_v42  ;;  %1922 = vmatpush1.msra.mxu1 %v1818_v10  ;;  %v1810_v7 = vmul.f32 %v1692_v49, %v5106_v0  ;;  %v1787_v63 = vsel %vm1124_vm4, %v1775_v43, %v4270_v58  ;;  %v1803_v26 = vmul.f32 %v4275_v1, %v5107_v8  ;;  %v5110_v0 = vld [vmem:[#allocation27_spill] sm:$0xff] }
 0x2fd   : > { %5104 = vst [vmem:[#allocation71_spill] sm:$0xff] %v4280_v15  ;;  %v1811_v52 = vmul.f32 %v4280_v15, %v5105_v30  ;;  %v1795_v30 = vmul.f32 %v1787_v63, %v5109_v44  ;;  %v1794_v15 = vmul.f32 %v1788_v47, %v5110_v0  ;;  %v1757_v43 = vsel %vm1048_vm5, %v4198_v11, %v1741_v25  ;;  %v5111_v47 = vld [vmem:[#allocation30_spill] sm:$0xff]  ;;  %v5113_v11 = vld [vmem:[#allocation28_spill] sm:$0xff]  ;;  %v5114_v0 = vld [vmem:[#allocation29_spill] sm:$0xff] }
 0x2fe   : > { %v1729_v44 = vmul.f32 %v4203_v2, %v5114_v0  ;;  %v5119_v2 = vld [vmem:[#allocation44_spill] sm:$0xff] }
 0x2ff   : > { %v1717_v59 = vpop.permute.xlu1 %1716  ;;  %1923 = vmatprep.subr.mxu1 %v1811_v52  ;;  %v1715_v10 = vpop.permute.xlu0 %1714 }
 0x300   : > { %1924 = vmatpush1.msra.mxu1 %v1810_v7  ;;  %v1763_v7 = vmul.f32 %v1756_v55, %v5111_v47  ;;  %v5116_v47 = vld [vmem:[#allocation41_spill] sm:$0xff] }
 0x301   : > { %1925 = vmatprep.subr.mxu1 %v1803_v26 }
 0x302   : > { %1926 = vmatpush1.msra.mxu1 %v1802_v22  ;;  %v5112_v22 = vld [vmem:[#allocation31_spill] sm:$0xff] }
 0x303   : > { %v1719_v18 = vpop.permute.xlu1 %1718  ;;  %1927 = vmatprep.subr.mxu1 %v1795_v30  ;;  %v4303_v52 = vpop.permute.xlu0 %1750  ;;  %v1762_v25 = vmul.f32 %v1757_v43, %v5112_v22 }
 0x304   : > { %v1759_v63 = vsel %vm1048_vm5, %v4303_v52, %v4196_v12  ;;  %1928 = vmatpush1.msra.mxu1 %v1794_v15  ;;  %v1727_v26 = vsel %vm972_vm1, %v1719_v18, %v4190_v48  ;;  %v5115_v15 = vld [vmem:[#allocation32_spill] sm:$0xff]  ;;  %v5117_v48 = vld [vmem:[#allocation38_spill] sm:$0xff] }
 0x305   : > { %1929 = vmatprep.subr.mxu1 %v4123_v20  ;;  %v1760_v30 = vmul.f32 %v1759_v63, %v5113_v11  ;;  %v1731_v55 = vmul.f32 %v1724_v3, %v5115_v15  ;;  %v1728_v8 = vmul.f32 %v1727_v26, %v5116_v47  ;;  %v1697_v43 = vmul.f32 %v4216_v9, %v5117_v48 }
 0x306   : > { %1930 = vmatpush1.msra.mxu1 %v4113_v38  ;;  %v5118_v38 = vld [vmem:[#allocation33_spill] sm:$0xff]  ;;  %v1665_v3 = vmul.f32 %v4225_v27, %v3793_v57 }
 0x307   : > { %v1685_v23 = vpop.permute.xlu1 %1684  ;;  %1931 = vmatprep.subr.mxu1 %v1763_v7  ;;  %v1687_v12 = vpop.permute.xlu0 %1686  ;;  %1861 = vmatpush1.msra.mxu0 %v1760_v30  ;;  %v1730_v63 = vmul.f32 %v4207_v51, %v5118_v38  ;;  %v5120_v7 = vld [vmem:[#allocation34_spill] sm:$0xff]  ;;  %v5121_v30 = vld [vmem:[#allocation35_spill] sm:$0xff] }
 0x308   : > { %v1695_v20 = vsel %vm896_vm2, %v1687_v12, %v4188_v28  ;;  %1932 = vmatpush1.msra.mxu1 %v1762_v25  ;;  %1862 = vmatprep.subr.mxu0 %v1729_v44  ;;  %v1699_v11 = vmul.f32 %v1692_v49, %v5120_v7  ;;  %v1698_v28 = vmul.f32 %v4211_v24, %v5121_v30 }
 0x309   : > { %v1696_v0 = vmul.f32 %v1695_v20, %v5119_v2  ;;  %1863 = vmatpush1.msra.mxu0 %v1728_v8  ;;  %1933 = vmatprep.subr.mxu1 %v1731_v55  ;;  %v4336_v25 = vsel %vm972_vm1, %v1713_v6, %v1715_v10  ;;  %v4340_v44 = vsel %vm972_vm1, %v1715_v10, %v1717_v59  ;;  %v5122_v6 = vld [vmem:[#allocation36_spill] sm:$0xff]  ;;  %v4354_v10 = vld [vmem:[%s4902_s3 + $0x8] sm:$0xff] }
 0x30a   : > { %1864 = vmatprep.subr.mxu0 %v1697_v43  ;;  %1934 = vmatpush1.msra.mxu1 %v1730_v63  ;;  %v4344_v8 = vsel %vm972_vm1, %v1717_v59, %v1719_v18  ;;  %v1667_v27 = vmul.f32 %v1660_v45, %v5122_v6  ;;  %v5123_v55 = vld [vmem:[#allocation37_spill] sm:$0xff]  ;;  %v1820_v18 = vmul.f32 %v4336_v25, %v3829_v19  ;;  %v5125_v63 = vld [vmem:[#allocation43_spill] sm:$0xff] }
 0x30b   : > { %v1655_v51 = vpop.permute.xlu1 %1654  ;;  %v1683_v9 = vpop.permute.xlu0 %1682  ;;  %1865 = vmatpush1.msra.mxu0 %v1696_v0  ;;  %1935 = vmatprep.subr.mxu1 %v1699_v11  ;;  %v1666_v59 = vmul.f32 %v4233_v40, %v5123_v55  ;;  %v1821_v0 = vmul.f32 %v4340_v44, %v3876_v35  ;;  %v5124_v11 = vld [vmem:[#allocation42_spill] sm:$0xff]  ;;  %v1823_v40 = vmul.f32 %v1727_v26, %v5125_v63  ;;  %v5128_v35 = vld [vmem:[#allocation49_spill] sm:$0xff] }
 0x30c   : > { %v1663_v24 = vsel %vm821_vm3, %v1655_v51, %v4194_v13  ;;  %1866 = vmatprep.subr.mxu0 %v1665_v3  ;;  %v4362_v13 = vsel %vm896_vm2, %v1685_v23, %v1687_v12  ;;  %v4366_v45 = vsel %vm896_vm2, %v1683_v9, %v1685_v23  ;;  %1936 = vmatpush1.msra.mxu1 %v1698_v28 }
 0x30d   : > { %v1664_v49 = vmul.f32 %v1663_v24, %v3849_v60  ;;  %v1822_v43 = vmul.f32 %v4344_v8, %v5124_v11  ;;  %1937 = vmatprep.subr.mxu1 %v1667_v27  ;;  %v1690_v12 = vsel %vm896_vm2, %v4268_v42, %v1683_v9  ;;  %v1814_v26 = vmul.f32 %v4362_v13, %v3825_v39 }
 0x30e   : > { %1938 = vmatpush1.msra.mxu1 %v1666_v59  ;;  %v1815_v27 = vmul.f32 %v1695_v20, %v3833_v31  ;;  %v1813_v42 = vmul.f32 %v4366_v45, %v3886_v46  ;;  %v5127_v20 = vld [vmem:[#allocation48_spill] sm:$0xff]  ;;  %v1812_v46 = vmul.f32 %v1690_v12, %v5128_v35 }
 0x30f   : > { %v1653_v3 = vpop.permute.xlu1 %1652  ;;  %1867 = vmatpush1.msra.mxu0 %v1664_v49  ;;  %v1651_v19 = vpop.permute.xlu0 %1650  ;;  %3104 = vmatmul.mubr.msk.f32.vlgmr.msra.gmra.mxu1 %vm1344_vm6, %v4354_v10  ;;  %v5126_v49 = vld [vmem:[#allocation53_spill] sm:$0xff] }
 0x310   : > { %v4378_v23 = vsel %vm821_vm3, %v1653_v3, %v1655_v51  ;;  %v4382_v28 = vsel %vm821_vm3, %v1651_v19, %v1653_v3  ;;  %3103 = vmatmul.mubr.msk.f32.vlgmr.msra.gmra.mxu0 %vm1344_vm6, %v4354_v10  ;;  %2063 = vmatprep.subr.mxu1 %v1823_v40  ;;  %v1658_v9 = vsel %vm821_vm3, %v4257_v50, %v1651_v19 }
 0x311   : > { %v1806_v51 = vmul.f32 %v4378_v23, %v3870_v36  ;;  %v1805_v59 = vmul.f32 %v4382_v28, %v5126_v49  ;;  %1992 = vmatprep.subr.mxu0 %v1821_v0  ;;  %2064 = vmatpush1.msra.mxu1 %v1822_v43  ;;  %v1807_v3 = vmul.f32 %v1663_v24, %v5127_v20 }
 0x312   : > { %1993 = vmatpush1.msra.mxu0 %v1820_v18  ;;  %2065 = vmatprep.subr.mxu1 %v1815_v27  ;;  %v1804_v50 = vmul.f32 %v1658_v9, %v3890_v54 }
 0x313   : > { %v1781_v60 = vpop.permute.xlu1 %1780  ;;  %v1779_v40 = vpop.permute.xlu0 %1778  ;;  %1994 = vmatprep.subr.mxu0 %v1813_v42  ;;  %2066 = vmatpush1.msra.mxu1 %v1814_v26 }
 0x314   : > { %v1785_v36 = vsel %vm1124_vm4, %v1779_v40, %v1781_v60  ;;  %v1786_v19 = vsel %vm1124_vm4, %v4270_v58, %v1779_v40  ;;  %1995 = vmatpush1.msra.mxu0 %v1812_v46  ;;  %2067 = vmatprep.subr.mxu1 %v1807_v3  ;;  %v1732_v3 = vmul.f32 %v4261_v14, %v3785_v4  ;;  %v5131_v14 = vld [vmem:[#allocation66_spill] sm:$0xff]  ;;  %v5154_v4 = vld [vmem:[#allocation13_spill] sm:$0xff] }
 0x315   : > { %v1796_v24 = vmul.f32 %v1786_v19, %v3931_v21  ;;  %v1797_v18 = vmul.f32 %v1785_v36, %v3935_v56  ;;  %1996 = vmatprep.subr.mxu0 %v1805_v59  ;;  %2068 = vmatpush1.msra.mxu1 %v1806_v51  ;;  %v1733_v51 = vmul.f32 %v4336_v25, %v4010_v61  ;;  %v5130_v19 = vld [vmem:[#allocation71_spill] sm:$0xff]  ;;  %v5155_v61 = vld [vmem:[#allocation16_spill] sm:$0xff] }
 0x316   : > { %1997 = vmatpush1.msra.mxu0 %v1804_v50  ;;  %2042 = vmatprep.mubr.f32.mxu0 %v5073_v53  ;;  %v1701_v40 = vmul.f32 %v1690_v12, %v4033_v37 }
 0x317   : > { %v1747_v0 = vpop.permute.xlu1 %1746  ;;  %v1745_v43 = vpop.permute.xlu0 %1744  ;;  %1998 = vmatprep.subr.mxu0 %v1797_v18  ;;  %2113 = vmatprep.mubr.f32.mxu1 %v5073_v53  ;;  %v5132_v18 = vld [vmem:[#allocation68_spill] sm:$0xff] }
 0x318   : > { %v1754_v26 = vsel %vm1048_vm5, %v1745_v43, %v1747_v0  ;;  %v1755_v46 = vsel %vm1048_vm5, %v4253_v17, %v1745_v43  ;;  %1999 = vmatpush1.msra.mxu0 %v1796_v24  ;;  %v1669_v24 = vmul.f32 %v1658_v9, %v5131_v14  ;;  %v1668_v12 = vmul.f32 %v4275_v1, %v5132_v18  ;;  %v5133_v43 = vld [vmem:[#allocation56_spill] sm:$0xff]  ;;  %v5138_v9 = vld [vmem:[#allocation59_spill] sm:$0xff]  ;;  %v5139_v1 = vld [vmem:[#allocation46_spill] sm:$0xff] }
 0x319   : > { %v1764_v58 = vmul.f32 %v1755_v46, %v4015_v16  ;;  %v1765_v36 = vmul.f32 %v1754_v26, %v3978_v33  ;;  %2000 = vmatprep.subr.mxu0 %v4149_v32  ;;  %v5135_v46 = vld [vmem:[#allocation58_spill] sm:$0xff] }
 0x31a   : > { %2001 = vmatpush1.msra.mxu0 %v4137_v5 }
 0x31b   : > { %v1749_v27 = vpop.permute.xlu1 %1748  ;;  %v1783_v42 = vpop.permute.xlu0 %1782  ;;  %2002 = vmatprep.subr.mxu0 %v1765_v36  ;;  %v5136_v36 = vld [vmem:[#allocation69_spill] sm:$0xff] }
 0x31c   : > { %v1784_v17 = vsel %vm1124_vm4, %v1781_v60, %v1783_v42  ;;  %v1791_v59 = vsel %vm1124_vm4, %v1783_v42, %v4192_v29  ;;  %2003 = vmatpush1.msra.mxu0 %v1764_v58  ;;  %v1752_v25 = vsel %vm1048_vm5, %v1749_v27, %v4303_v52  ;;  %v5129_v60 = vld [vmem:[#allocation40_spill] sm:$0xff]  ;;  %v1753_v29 = vsel %vm1048_vm5, %v1747_v0, %v1749_v27  ;;  %v5134_v52 = vld [vmem:[#allocation70_spill] sm:$0xff] }
 0x31d   : > { %v1798_v32 = vmul.f32 %v1784_v17, %v3946_v62  ;;  %v1799_v5 = vmul.f32 %v1791_v59, %v3959_v41  ;;  %2004 = vmatprep.subr.mxu0 %v1733_v51  ;;  %v1700_v50 = vmul.f32 %v5130_v19, %v5129_v60  ;;  %v1767_v26 = vmul.f32 %v1752_v25, %v5133_v43  ;;  %v5137_v0 = vld [vmem:[#allocation60_spill] sm:$0xff]  ;;  %v5153_v60 = vld [vmem:[#allocation14_spill] sm:$0xff]  ;;  %v5165_v43 = vld [vmem:[#allocation23_spill] sm:$0xff] }
 0x31e   : > { %2005 = vmatpush1.msra.mxu0 %v1732_v3  ;;  %v1766_v58 = vmul.f32 %v1753_v29, %v5135_v46  ;;  %v1735_v27 = vmul.f32 %v4344_v8, %v5137_v0  ;;  %v1734_v42 = vmul.f32 %v4340_v44, %v5138_v9  ;;  %v1703_v51 = vmul.f32 %v4362_v13, %v5139_v1  ;;  %v5140_v17 = vld [vmem:[#allocation64_spill] sm:$0xff]  ;;  %v5141_v8 = vld [vmem:[#allocation65_spill] sm:$0xff]  ;;  %v5169_v41 = vld [vmem:[#allocation27_spill] sm:$0xff] }
 0x31f   : > { %2069 = vmatprep.subr.mxu1 %v1799_v5  ;;  %2006 = vmatprep.subr.mxu0 %v1701_v40  ;;  %v1702_v59 = vmul.f32 %v4366_v45, %v5140_v17  ;;  %v1671_v3 = vmul.f32 %v4378_v23, %v5141_v8  ;;  %v5152_v8 = vld [vmem:[#allocation11_spill] sm:$0xff] }
 0x320   : > { %2070 = vmatpush1.msra.mxu1 %v1798_v32  ;;  %2007 = vmatpush1.msra.mxu0 %v1700_v50  ;;  %v5142_v32 = vld [vmem:[#allocation67_spill] sm:$0xff] }
 0x321   : > { %2071 = vmatprep.subr.mxu1 %v5134_v52  ;;  %2008 = vmatprep.subr.mxu0 %v1669_v24  ;;  %v1670_v44 = vmul.f32 %v4382_v28, %v5142_v32 }
 0x322   : > { %2072 = vmatpush1.msra.mxu1 %v5136_v36  ;;  %2009 = vmatpush1.msra.mxu0 %v1668_v12 }
 0x323   : > { %2073 = vmatprep.subr.mxu1 %v1767_v26  ;;  %3105 = vmatmul.mubr.msk.f32.vlgmr.msra.gmra.mxu0 %vm1344_vm6, %v4354_v10 }
 0x324   : > { %2074 = vmatpush1.msra.mxu1 %v1766_v58  ;;  %2388 = vmatprep.mubr.f32.mxu0 %v5073_v53 }
 0x325   : > { %2075 = vmatprep.subr.mxu1 %v1735_v27 }
 0x326   : > { %2076 = vmatpush1.msra.mxu1 %v1734_v42 }
 0x327   : > { %2077 = vmatprep.subr.mxu1 %v1703_v51 }
 0x328   : > { %2078 = vmatpush1.msra.mxu1 %v1702_v59  ;;  %v1831_v13 = vpop.permute.xlu0 %1830 }
 0x329   : > { %2079 = vmatprep.subr.mxu1 %v1671_v3 }
 0x32a   : > { %2080 = vmatpush1.msra.mxu1 %v1670_v44 }
 0x32b   : > { %3106 = vmatmul.mubr.msk.f32.vlgmr.msra.gmra.mxu1 %vm1344_vm6, %v4354_v10 }
 0x32c   : > { %2459 = vmatprep.mubr.f32.mxu1 %v5073_v53 }
 0x3cf   : > { %v1973_v28 = vpop.f32.mrf.mxu1 }
 0x3d0   : > { %v1902_v5 = vpop.f32.mrf.mxu0  ;;  %v1974_v19 = vadd.f32 %v1973_v28, %v1831_v13 }
 0x3d1   : > { %v1903_v40 = vadd.f32 %v1902_v5, %v1831_v13  ;;  %v1975_v29 = vpop.f32.mrf.mxu1 }
 0x3d2   : > { %v1904_v25 = vpop.f32.mrf.mxu0  ;;  %v4489_v50 = vmax.f32 %v1974_v19, 0.0  ;;  %v1976_v24 = vadd.f32 %v1975_v29, %v1831_v13  ;;  %v5149_v29 = vld [vmem:[#allocation5_spill] sm:$0xff] }
 0x3d3   : > { %v4465_v45 = vmax.f32 %v1903_v40, 0.0  ;;  %v1905_v23 = vadd.f32 %v1904_v25, %v1831_v13  ;;  %v5147_v25 = vld [vmem:[#allocation8_spill] sm:$0xff] }
 0x3d4   : > { %v4499_v12 = vmax.f32 %v1976_v24, 0.0  ;;  %v5150_v24 = vld [vmem:[#allocation7_spill] sm:$0xff] }
 0x3d5   : > { %2160 = vrot.lane.b32.xlu0 %v4465_v45, %s3182_s23  ;;  %2192 = vrot.lane.b32.xlu1 %v4465_v45, %s3181_s22  ;;  %v4475_v10 = vmax.f32 %v1905_v23, 0.0  ;;  %v5148_v23 = vld [vmem:[#allocation6_spill] sm:$0xff] }
 0x3d9   : > { %2256 = vrot.lane.b32.xlu0 %v4465_v45, %s3184_s25  ;;  %2128 = vrot.lane.b32.xlu1 %v4465_v45, %s3183_s24 }
 0x3dd   : > { %2162 = vrot.lane.b32.xlu0 %v4475_v10, %s3182_s23  ;;  %2224 = vrot.lane.b32.xlu1 %v4465_v45, %s3185_s26 }
 0x3e1   : > { %2258 = vrot.lane.b32.xlu0 %v4475_v10, %s3184_s25  ;;  %2194 = vrot.lane.b32.xlu1 %v4475_v10, %s3181_s22 }
 0x3e3   : > { %v2044_v26 = vpop.f32.mrf.mxu0 }
 0x3e4   : > { %v2045_v52 = vadd.f32 %v2044_v26, %v1831_v13 }
 0x3e5   : > { %2226 = vrot.lane.b32.xlu0 %v4475_v10, %s3185_s26  ;;  %2130 = vrot.lane.b32.xlu1 %v4475_v10, %s3183_s24  ;;  %v2046_v36 = vpop.f32.mrf.mxu0 }
 0x3e6   : > { %v4513_v58 = vmax.f32 %v2045_v52, 0.0  ;;  %v2047_v42 = vadd.f32 %v2046_v36, %v1831_v13 }
 0x3e8   : > { %5143 = vst [vmem:[#allocation31_spill] sm:$0xff] %v4513_v58  ;;  %v4523_v59 = vmax.f32 %v2047_v42, 0.0 }
 0x3e9   : > { %2196 = vrot.lane.b32.xlu0 %v4489_v50, %s3181_s22  ;;  %2164 = vrot.lane.b32.xlu1 %v4489_v50, %s3182_s23 }
 0x3ea   : > { %5144 = vst [vmem:[#allocation32_spill] sm:$0xff] %v4523_v59 }
 0x3eb   : > { %v2115_v27 = vpop.f32.mrf.mxu1 }
 0x3ec   : > { %v2116_v51 = vadd.f32 %v2115_v27, %v1831_v13 }
 0x3ed   : > { %2132 = vrot.lane.b32.xlu0 %v4489_v50, %s3183_s24  ;;  %2260 = vrot.lane.b32.xlu1 %v4489_v50, %s3184_s25  ;;  %v2117_v44 = vpop.f32.mrf.mxu1 }
 0x3ee   : > { %v4525_v3 = vmax.f32 %v2116_v51, 0.0  ;;  %v2118_v5 = vadd.f32 %v2117_v44, %v1831_v13  ;;  %v3108_v13 = vld [vmem:[%s4903_s4 + $0x10] sm:$0xff] }
 0x3f0   : > { %5145 = vst [vmem:[#allocation41_spill] sm:$0xff] %v4525_v3  ;;  %v4535_v40 = vmax.f32 %v2118_v5, 0.0 }
 0x3f1   : > { %2166 = vrot.lane.b32.xlu0 %v4499_v12, %s3182_s23  ;;  %2228 = vrot.lane.b32.xlu1 %v4489_v50, %s3185_s26 }
 0x3f2   : > { %5146 = vst [vmem:[#allocation38_spill] sm:$0xff] %v4535_v40 }
 0x3f5   : > { %2262 = vrot.lane.b32.xlu0 %v4499_v12, %s3184_s25  ;;  %2198 = vrot.lane.b32.xlu1 %v4499_v12, %s3181_s22 }
 0x3f9   : > { %2230 = vrot.lane.b32.xlu0 %v4499_v12, %s3185_s26  ;;  %2134 = vrot.lane.b32.xlu1 %v4499_v12, %s3183_s24 }
 0x3fd   : > { %2200 = vrot.lane.b32.xlu0 %v4513_v58, %s3181_s22  ;;  %2168 = vrot.lane.b32.xlu1 %v4513_v58, %s3182_s23 }
 0x401   : > { %2136 = vrot.lane.b32.xlu0 %v4513_v58, %s3183_s24  ;;  %2264 = vrot.lane.b32.xlu1 %v4513_v58, %s3184_s25 }
 0x405   : > { %2204 = vrot.lane.b32.xlu0 %v4525_v3, %s3181_s22  ;;  %2202 = vrot.lane.b32.xlu1 %v4523_v59, %s3181_s22 }
 0x409   : > { %2172 = vrot.lane.b32.xlu0 %v4525_v3, %s3182_s23  ;;  %2170 = vrot.lane.b32.xlu1 %v4523_v59, %s3182_s23 }
 0x40d   : > { %2206 = vrot.lane.b32.xlu0 %v4535_v40, %s3181_s22  ;;  %2238 = vrot.lane.b32.xlu1 %v4535_v40, %s3185_s26 }
 0x411   : > { %2140 = vrot.lane.b32.xlu0 %v4525_v3, %s3183_s24  ;;  %2174 = vrot.lane.b32.xlu1 %v4535_v40, %s3182_s23 }
 0x415   : > { %2142 = vrot.lane.b32.xlu0 %v4535_v40, %s3183_s24  ;;  %2138 = vrot.lane.b32.xlu1 %v4523_v59, %s3183_s24 }
 0x419   : > { %2268 = vrot.lane.b32.xlu0 %v4525_v3, %s3184_s25  ;;  %2266 = vrot.lane.b32.xlu1 %v4523_v59, %s3184_s25 }
 0x41d   : > { %2232 = vrot.lane.b32.xlu0 %v4513_v58, %s3185_s26  ;;  %2270 = vrot.lane.b32.xlu1 %v4535_v40, %s3184_s25  ;;  %v5158_v58 = vld [vmem:[#allocation18_spill] sm:$0xff] }
 0x421   : > { %2236 = vrot.lane.b32.xlu0 %v4525_v3, %s3185_s26  ;;  %2234 = vrot.lane.b32.xlu1 %v4523_v59, %s3185_s26  ;;  %s3120_s26 = sshll.u32 %s5209_s11, 5 }
 0x422   : > { %s4862_s27 = scalar_lea.vmem %s4907_s8, %s3120_s26 }
 0x425   : > { %2318 = vperm.xlu1 %3154, %v3108_v13   ;;  %v2617_v13 = vld [vmem:[#allocation4] sm:$0x1] }
 0x440   : > { %426 = vadd.xlane.f32.xlu0 %v5147_v25 }
 0x444   : > { %444 = vadd.xlane.f32.xlu0 %v5148_v23 }
 0x447   : > { %v4574_v28 = vpop.permute.xlu0 %2160  ;;  %v4576_v19 = vpop.permute.xlu1 %2192 }
 0x448   : > { %453 = vadd.xlane.f32.xlu0 %v5149_v29 }
 0x449   : > { %435 = vadd.xlane.f32.xlu1 %v5150_v24 }
 0x44b   : > { %v4580_v26 = vpop.permute.xlu0 %2256  ;;  %v4582_v52 = vpop.permute.xlu1 %2128 }
 0x44f   : > { %v2163_v36 = vpop.permute.xlu0 %2162  ;;  %v4584_v27 = vpop.permute.xlu1 %2224 }
 0x450   : > { %v4604_v18 = vsel %vm896_vm2, %v4574_v28, %v2163_v36 }
 0x453   : > { %v2259_v42 = vpop.permute.xlu0 %2258  ;;  %v2195_v51 = vpop.permute.xlu1 %2194 }
 0x454   : > { %v4591_v25 = vsel %vm972_vm1, %v4576_v19, %v2195_v51  ;;  %v2278_v0 = vsel %vm1124_vm4, %v4580_v26, %v2259_v42 }
 0x455   : > { %v2304_v17 = vmul.f32 %v4591_v25, %v5152_v8  ;;  %v2280_v46 = vmul.f32 %v2278_v0, %v5158_v58 }
 0x457   : > { %v4586_v44 = vpop.permute.xlu0 %2226  ;;  %v2131_v5 = vpop.permute.xlu1 %2130 }
 0x45a   : > { %2620 = vperm.xlu1 %3154, %v2617_v13   ;;  %v5151_v13 = vld [vmem:[#allocation12_spill] sm:$0xff] }
 0x45b   : > { %v2197_v23 = vpop.permute.xlu0 %2196  ;;  %v2165_v29 = vpop.permute.xlu1 %2164 }
 0x45c   : > { %v4595_v24 = vsel %vm972_vm1, %v2195_v51, %v2197_v23  ;;  %v4599_v32 = vsel %vm896_vm2, %v2163_v36, %v2165_v29  ;;  %v4613_v51 = vsel %vm821_vm3, %v4582_v52, %v2131_v5  ;;  %v2296_v36 = vmul.f32 %v4604_v18, %v5154_v4  ;;  %v5157_v4 = vld [vmem:[#allocation17_spill] sm:$0xff] }
 0x45d   : > { %v2305_v14 = vmul.f32 %v4595_v24, %v5151_v13  ;;  %v2297_v1 = vmul.f32 %v4599_v32, %v5153_v60 }
 0x45f   : > { %v2133_v37 = vpop.permute.xlu0 %2132  ;;  %2338 = vmatprep.subr.mxu0 %v2305_v14  ;;  %v2261_v9 = vpop.permute.xlu1 %2260  ;;  %v5156_v14 = vld [vmem:[#allocation15_spill] sm:$0xff] }
 0x460   : > { %v4621_v13 = vsel %vm821_vm3, %v2131_v5, %v2133_v37  ;;  %v2277_v8 = vsel %vm1124_vm4, %v2259_v42, %v2261_v9  ;;  %2339 = vmatpush1.msra.mxu0 %v2304_v17  ;;  %v2288_v3 = vmul.f32 %v4613_v51, %v5156_v14  ;;  %v2246_v17 = vsel %vm1048_vm5, %v4584_v27, %v4586_v44  ;;  %v5163_v14 = vld [vmem:[#allocation21_spill] sm:$0xff] }
 0x461   : > { %v2289_v60 = vmul.f32 %v4621_v13, %v5155_v61  ;;  %2340 = vmatprep.subr.mxu0 %v2297_v1  ;;  %v2281_v16 = vmul.f32 %v2277_v8, %v5157_v4  ;;  %v5159_v61 = vld [vmem:[#allocation19_spill] sm:$0xff] }
 0x462   : > { %2341 = vmatpush1.msra.mxu0 %v2296_v36  ;;  %v2249_v1 = vmul.f32 %v2246_v17, %v5159_v61  ;;  %v5164_v61 = vld [vmem:[#allocation22_spill] sm:$0xff] }
 0x463   : > { %v2167_v5 = vpop.permute.xlu0 %2166  ;;  %2342 = vmatprep.subr.mxu0 %v2289_v60  ;;  %v2229_v40 = vpop.permute.xlu1 %2228 }
 0x464   : > { %2343 = vmatpush1.msra.mxu0 %v2288_v3 }
 0x465   : > { %2344 = vmatprep.subr.mxu0 %v2281_v16 }
 0x466   : > { %2345 = vmatpush1.msra.mxu0 %v2280_v46 }
 0x467   : > { %v2263_v42 = vpop.permute.xlu0 %2262  ;;  %2346 = vmatprep.subr.mxu0 %v4475_v10  ;;  %v2199_v36 = vpop.permute.xlu1 %2198  ;;  %v5162_v10 = vld [vmem:[#allocation20_spill] sm:$0xff] }
 0x468   : > { %2347 = vmatpush1.msra.mxu0 %v4465_v45  ;;  %v2212_v58 = vsel %vm972_vm1, %v2197_v23, %v2199_v36  ;;  %v2180_v45 = vsel %vm896_vm2, %v2165_v29, %v2167_v5 }
 0x469   : > { %2348 = vmatprep.subr.mxu0 %v2249_v1  ;;  %v2306_v4 = vmul.f32 %v2212_v58, %v5163_v14  ;;  %v2298_v59 = vmul.f32 %v2180_v45, %v5165_v43  ;;  %v5167_v14 = vld [vmem:[#allocation25_spill] sm:$0xff]  ;;  %v5168_v43 = vld [vmem:[#allocation26_spill] sm:$0xff] }
 0x46b   : > { %v4641_v8 = vpop.permute.xlu0 %2230  ;;  %v2135_v0 = vpop.permute.xlu1 %2134 }
 0x46c   : > { %v2148_v17 = vsel %vm821_vm3, %v2133_v37, %v2135_v0  ;;  %v2276_v37 = vsel %vm1124_vm4, %v2261_v9, %v2263_v42  ;;  %v2245_v9 = vsel %vm1048_vm5, %v4586_v44, %v2229_v40 }
 0x46d   : > { %v2282_v62 = vmul.f32 %v2276_v37, %v5169_v41  ;;  %v2219_v41 = vmul.f32 %v2212_v58, %v5115_v15  ;;  %v2218_v37 = vmul.f32 %v4595_v24, %v5118_v38  ;;  %v2155_v15 = vmul.f32 %v2148_v17, %v5122_v6 }
 0x46f   : > { %v4645_v60 = vpop.permute.xlu0 %2200  ;;  %v4647_v3 = vpop.permute.xlu1 %2168 }
 0x470   : > { %v4652_v16 = vsel %vm972_vm1, %v2199_v36, %v4645_v60  ;;  %v4657_v46 = vsel %vm896_vm2, %v2167_v5, %v4647_v3 }
 0x471   : > { %5160 = vst [vmem:[#allocation33_spill] sm:$0xff] %v4652_v16  ;;  %5161 = vst [vmem:[#allocation44_spill] sm:$0xff] %v4657_v46  ;;  %v2307_v23 = vmul.f32 %v4652_v16, %v5162_v10  ;;  %v2299_v1 = vmul.f32 %v4657_v46, %v5164_v61  ;;  %v5166_v10 = vld [vmem:[#allocation24_spill] sm:$0xff]  ;;  %v2290_v61 = vmul.f32 %v2148_v17, %v5167_v14 }
 0x473   : > { %v4668_v36 = vpop.permute.xlu0 %2136  ;;  %2409 = vmatprep.subr.mxu1 %v2307_v23  ;;  %v4670_v33 = vpop.permute.xlu1 %2264 }
 0x474   : > { %v4676_v29 = vsel %vm821_vm3, %v2135_v0, %v4668_v36  ;;  %v2275_v5 = vsel %vm1124_vm4, %v2263_v42, %v4670_v33  ;;  %2410 = vmatpush1.msra.mxu1 %v2306_v4  ;;  %v2244_v4 = vsel %vm1048_vm5, %v2229_v40, %v4641_v8  ;;  %v5170_v42 = vld [vmem:[#allocation30_spill] sm:$0xff]  ;;  %v2187_v40 = vmul.f32 %v2180_v45, %v5120_v7 }
 0x475   : > { %v2291_v23 = vmul.f32 %v4676_v29, %v5166_v10  ;;  %2411 = vmatprep.subr.mxu1 %v2299_v1  ;;  %v2283_v46 = vmul.f32 %v2275_v5, %v5168_v43  ;;  %v2250_v10 = vmul.f32 %v2245_v9, %v5112_v22  ;;  %v2154_v7 = vmul.f32 %v4621_v13, %v5123_v55  ;;  %v5175_v43 = vld [vmem:[#allocation51_spill] sm:$0xff] }
 0x476   : > { %2412 = vmatpush1.msra.mxu1 %v2298_v59  ;;  %v2251_v59 = vmul.f32 %v2244_v4, %v5170_v42  ;;  %v5176_v4 = vld [vmem:[#allocation45_spill] sm:$0xff] }
 0x477   : > { %v2205_v16 = vpop.permute.xlu0 %2204  ;;  %2413 = vmatprep.subr.mxu1 %v2291_v23  ;;  %v2203_v0 = vpop.permute.xlu1 %2202 }
 0x478   : > { %2414 = vmatpush1.msra.mxu1 %v2290_v61 }
 0x479   : > { %2415 = vmatprep.subr.mxu1 %v2283_v46  ;;  %v2185_v46 = vmul.f32 %v4604_v18, %v5117_v48  ;;  %v2153_v48 = vmul.f32 %v4613_v51, %v3793_v57 }
 0x47a   : > { %2416 = vmatpush1.msra.mxu1 %v2282_v62 }
 0x47b   : > { %v2173_v1 = vpop.permute.xlu0 %2172  ;;  %2417 = vmatprep.subr.mxu1 %v4499_v12  ;;  %v2171_v5 = vpop.permute.xlu1 %2170  ;;  %v2186_v12 = vmul.f32 %v4599_v32, %v5121_v30  ;;  %v5172_v30 = vld [vmem:[#allocation29_spill] sm:$0xff] }
 0x47c   : > { %2418 = vmatpush1.msra.mxu1 %v4489_v50  ;;  %v5171_v50 = vld [vmem:[#allocation28_spill] sm:$0xff]  ;;  %v2217_v32 = vmul.f32 %v4591_v25, %v5172_v30  ;;  %v4767_v18 = vsel %vm896_vm2, %v2171_v5, %v2173_v1 }
 0x47d   : > { %2419 = vmatprep.subr.mxu1 %v2251_v59 }
 0x47e   : > { %2420 = vmatpush1.msra.mxu1 %v2250_v10 }
 0x47f   : > { %v2207_v62 = vpop.permute.xlu0 %2206  ;;  %2421 = vmatprep.subr.mxu1 %v2219_v41  ;;  %v4702_v44 = vpop.permute.xlu1 %2238 }
 0x480   : > { %v2247_v22 = vsel %vm1048_vm5, %v4702_v44, %v4584_v27  ;;  %2422 = vmatpush1.msra.mxu1 %v2218_v37  ;;  %v2215_v38 = vsel %vm972_vm1, %v2207_v62, %v4576_v19  ;;  %v4721_v27 = vsel %vm972_vm1, %v2205_v16, %v2207_v62  ;;  %v4726_v19 = vld [vmem:[%s4902_s3 + $0x10] sm:$0xff] }
 0x481   : > { %2423 = vmatprep.subr.mxu1 %v2187_v40  ;;  %v2248_v24 = vmul.f32 %v2247_v22, %v5171_v50  ;;  %v2216_v55 = vmul.f32 %v2215_v38, %v5116_v47  ;;  %v2311_v45 = vmul.f32 %v2215_v38, %v5125_v63  ;;  %v2310_v47 = vmul.f32 %v4721_v27, %v5124_v11 }
 0x482   : > { %2424 = vmatpush1.msra.mxu1 %v2186_v12  ;;  %v4751_v63 = vsel %vm972_vm1, %v2203_v0, %v2205_v16  ;;  %v4756_v11 = vsel %vm972_vm1, %v4645_v60, %v2203_v0  ;;  %v5174_v16 = vld [vmem:[#allocation50_spill] sm:$0xff] }
 0x483   : > { %v2141_v58 = vpop.permute.xlu0 %2140  ;;  %2425 = vmatprep.subr.mxu1 %v2155_v15  ;;  %v2175_v6 = vpop.permute.xlu1 %2174  ;;  %2349 = vmatpush1.msra.mxu0 %v2248_v24  ;;  %v2309_v0 = vmul.f32 %v4751_v63, %v5175_v43  ;;  %v2308_v9 = vmul.f32 %v4756_v11, %v5176_v4  ;;  %v5178_v15 = vld [vmem:[#allocation54_spill] sm:$0xff]  ;;  %v5196_v4 = vld [vmem:[#allocation44_spill] sm:$0xff] }
 0x484   : > { %v4731_v13 = vsel %vm896_vm2, %v2173_v1, %v2175_v6  ;;  %v2183_v25 = vsel %vm896_vm2, %v2175_v6, %v4574_v28  ;;  %2426 = vmatpush1.msra.mxu1 %v2154_v7  ;;  %2350 = vmatprep.subr.mxu0 %v2217_v32  ;;  %v5173_v28 = vld [vmem:[#allocation47_spill] sm:$0xff]  ;;  %v5177_v1 = vld [vmem:[#allocation52_spill] sm:$0xff]  ;;  %v5194_v43 = vld [vmem:[#allocation46_spill] sm:$0xff] }
 0x485   : > { %v2184_v17 = vmul.f32 %v2183_v25, %v5119_v2  ;;  %v2303_v23 = vmul.f32 %v2183_v25, %v3833_v31  ;;  %v2302_v14 = vmul.f32 %v4731_v13, %v3825_v39  ;;  %2351 = vmatpush1.msra.mxu0 %v2216_v55  ;;  %3110 = vmatmul.mubr.msk.f32.vlgmr.msra.gmra.mxu1 %vm1344_vm6, %v4726_v19  ;;  %v5180_v32 = vld [vmem:[#allocation32_spill] sm:$0xff]  ;;  %v5183_v25 = vld [vmem:[#allocation58_spill] sm:$0xff] }
 0x486   : > { %2551 = vmatprep.subr.mxu1 %v2311_v45  ;;  %2352 = vmatprep.subr.mxu0 %v2185_v46  ;;  %v2301_v10 = vmul.f32 %v4767_v18, %v5177_v1  ;;  %v5184_v45 = vld [vmem:[#allocation31_spill] sm:$0xff]  ;;  %v5199_v1 = vld [vmem:[#allocation66_spill] sm:$0xff] }
 0x487   : > { %v2143_v31 = vpop.permute.xlu0 %2142  ;;  %v2139_v2 = vpop.permute.xlu1 %2138  ;;  %2552 = vmatpush1.msra.mxu1 %v2310_v47  ;;  %2353 = vmatpush1.msra.mxu0 %v2184_v17  ;;  %v5185_v17 = vld [vmem:[#allocation38_spill] sm:$0xff]  ;;  %v5187_v47 = vld [vmem:[#allocation41_spill] sm:$0xff] }
 0x488   : > { %v4760_v39 = vsel %vm821_vm3, %v2141_v58, %v2143_v31  ;;  %v2151_v57 = vsel %vm821_vm3, %v2143_v31, %v4582_v52  ;;  %2553 = vmatprep.subr.mxu1 %v2303_v23  ;;  %v2178_v52 = vsel %vm896_vm2, %v4647_v3, %v2171_v5  ;;  %2354 = vmatprep.subr.mxu0 %v2153_v48  ;;  %v5189_v48 = vld [vmem:[#allocation60_spill] sm:$0xff] }
 0x489   : > { %v2152_v51 = vmul.f32 %v2151_v57, %v5173_v28  ;;  %v2294_v60 = vmul.f32 %v4760_v39, %v5174_v16  ;;  %v2295_v61 = vmul.f32 %v2151_v57, %v5127_v20  ;;  %2554 = vmatpush1.msra.mxu1 %v2302_v14  ;;  %v4782_v42 = vsel %vm821_vm3, %v2139_v2, %v2141_v58  ;;  %v5181_v58 = vld [vmem:[#allocation56_spill] sm:$0xff]  ;;  %v5188_v14 = vld [vmem:[#allocation61_spill] sm:$0xff] }
 0x48a   : > { %v2146_v3 = vsel %vm821_vm3, %v4668_v36, %v2139_v2  ;;  %v2300_v5 = vmul.f32 %v2178_v52, %v5128_v35  ;;  %v2293_v37 = vmul.f32 %v4782_v42, %v5126_v49  ;;  %2601 = vmatprep.mubr.f32.mxu1 %v5073_v53  ;;  %v2221_v34 = vmul.f32 %v4756_v11, %v5188_v14  ;;  %v5190_v2 = vld [vmem:[#allocation39_spill] sm:$0xff]  ;;  %v5191_v57 = vld [vmem:[#allocation33_spill] sm:$0xff]  ;;  %v5195_v11 = vld [vmem:[#allocation40_spill] sm:$0xff] }
 0x48b   : > { %v2269_v59 = vpop.permute.xlu0 %2268  ;;  %2355 = vmatpush1.msra.mxu0 %v2152_v51  ;;  %2555 = vmatprep.subr.mxu1 %v2295_v61  ;;  %v2267_v20 = vpop.permute.xlu1 %2266  ;;  %v2292_v36 = vmul.f32 %v2146_v3, %v3890_v54  ;;  %v5179_v54 = vld [vmem:[#allocation55_spill] sm:$0xff]  ;;  %v2223_v31 = vmul.f32 %v4721_v27, %v5189_v48  ;;  %v2220_v28 = vmul.f32 %v5191_v57, %v5190_v2 }
 0x48c   : > { %3109 = vmatmul.mubr.msk.f32.vlgmr.msra.gmra.mxu0 %vm1344_vm6, %v4726_v19  ;;  %2480 = vmatprep.subr.mxu0 %v2309_v0  ;;  %v2273_v41 = vsel %vm1124_vm4, %v2267_v20, %v2269_v59  ;;  %v2274_v40 = vsel %vm1124_vm4, %v4670_v33, %v2267_v20  ;;  %v5192_v51 = vld [vmem:[#allocation59_spill] sm:$0xff]  ;;  %v2191_v0 = vmul.f32 %v4731_v13, %v5194_v43  ;;  %v5198_v20 = vld [vmem:[#allocation65_spill] sm:$0xff] }
 0x48d   : > { %2556 = vmatpush1.msra.mxu1 %v2294_v60  ;;  %2481 = vmatpush1.msra.mxu0 %v2308_v9  ;;  %v2285_v12 = vmul.f32 %v2273_v41, %v3935_v56  ;;  %v2284_v33 = vmul.f32 %v2274_v40, %v3931_v21  ;;  %v2222_v16 = vmul.f32 %v4751_v63, %v5192_v51  ;;  %v5193_v60 = vld [vmem:[#allocation63_spill] sm:$0xff]  ;;  %v5197_v9 = vld [vmem:[#allocation64_spill] sm:$0xff] }
 0x48e   : > { %2482 = vmatprep.subr.mxu0 %v2301_v10  ;;  %2530 = vmatprep.mubr.f32.mxu0 %v5073_v53  ;;  %v2189_v61 = vmul.f32 %v2178_v52, %v5193_v60  ;;  %v2188_v27 = vmul.f32 %v5196_v4, %v5195_v11  ;;  %v2159_v63 = vmul.f32 %v4760_v39, %v5198_v20  ;;  %v5200_v52 = vld [vmem:[#allocation68_spill] sm:$0xff]  ;;  %v416_v39 = vld [vmem:[#allocation2 + $0x8] sm:$0xff]  ;;  %v3186_v4 = vmov 1966171168  }
 0x48f   : > { %v2233_v62 = vpop.permute.xlu0 %2232  ;;  %2483 = vmatpush1.msra.mxu0 %v2300_v5  ;;  %v2271_v35 = vpop.permute.xlu1 %2270  ;;  %v2157_v10 = vmul.f32 %v2146_v3, %v5199_v1  ;;  %v2156_v13 = vmul.f32 %v4676_v29, %v5200_v52  ;;  %v5201_v5 = vld [vmem:[#allocation67_spill] sm:$0xff] }
 0x490   : > { %v2272_v22 = vsel %vm1124_vm4, %v2269_v59, %v2271_v35  ;;  %v2279_v49 = vsel %vm1124_vm4, %v2271_v35, %v4580_v26  ;;  %2484 = vmatprep.subr.mxu0 %v2293_v37  ;;  %v2243_v56 = vsel %vm1048_vm5, %v4641_v8, %v2233_v62  ;;  %v5182_v8 = vld [vmem:[#allocation57_spill] sm:$0xff]  ;;  %v2190_v59 = vmul.f32 %v4767_v18, %v5197_v9 }
 0x491   : > { %v2286_v38 = vmul.f32 %v2272_v22, %v5178_v15  ;;  %v2287_v7 = vmul.f32 %v2279_v49, %v5179_v54  ;;  %2485 = vmatpush1.msra.mxu0 %v2292_v36  ;;  %v2158_v41 = vmul.f32 %v4782_v42, %v5201_v5  ;;  %v2616_v49 = vld [vmem:[%s4904_s5] sm:$0x1] }
 0x492   : > { %2486 = vmatprep.subr.mxu0 %v2285_v12 }
 0x493   : > { %v2237_v50 = vpop.permute.xlu0 %2236  ;;  %2487 = vmatpush1.msra.mxu0 %v2284_v33  ;;  %2557 = vmatprep.subr.mxu1 %v2287_v7  ;;  %v2235_v24 = vpop.permute.xlu1 %2234 }
 0x494   : > { %v2240_v26 = vsel %vm1048_vm5, %v2237_v50, %v4702_v44  ;;  %v2241_v21 = vsel %vm1048_vm5, %v2235_v24, %v2237_v50  ;;  %v2242_v30 = vsel %vm1048_vm5, %v2233_v62, %v2235_v24  ;;  %2488 = vmatprep.subr.mxu0 %v5180_v32  ;;  %2558 = vmatpush1.msra.mxu1 %v2286_v38  ;;  %v5186_v44 = vld [vmem:[#allocation62_spill] sm:$0xff] }
 0x495   : > { %v2255_v6 = vmul.f32 %v2240_v26, %v5181_v58  ;;  %v2253_v55 = vmul.f32 %v2242_v30, %v5182_v8  ;;  %v2254_v46 = vmul.f32 %v2241_v21, %v5183_v25  ;;  %2489 = vmatpush1.msra.mxu0 %v5184_v45  ;;  %2559 = vmatprep.subr.mxu1 %v5185_v17  ;;  %v417_v17 = vld [vmem:[#allocation2 + $0x10] sm:$0xff] }
 0x496   : > { %v2252_v23 = vmul.f32 %v2243_v56, %v5186_v44  ;;  %2560 = vmatpush1.msra.mxu1 %v5187_v47 }
 0x497   : > { %2490 = vmatprep.subr.mxu0 %v2253_v55  ;;  %2561 = vmatprep.subr.mxu1 %v2255_v6 }
 0x498   : > { %2491 = vmatpush1.msra.mxu0 %v2252_v23  ;;  %2562 = vmatpush1.msra.mxu1 %v2254_v46 }
 0x499   : > { %2492 = vmatprep.subr.mxu0 %v2221_v34  ;;  %2563 = vmatprep.subr.mxu1 %v2223_v31  ;;  %v418_v34 = vld [vmem:[#allocation2 + $0x18] sm:$0xff] }
 0x49a   : > { %2493 = vmatpush1.msra.mxu0 %v2220_v28  ;;  %2564 = vmatpush1.msra.mxu1 %v2222_v16 }
 0x49b   : > { %2494 = vmatprep.subr.mxu0 %v2189_v61  ;;  %2565 = vmatprep.subr.mxu1 %v2191_v0  ;;  %v5202_v0 = vld [vmem:[#allocation10_spill] sm:$0xff] }
 0x49c   : > { %2495 = vmatpush1.msra.mxu0 %v2188_v27  ;;  %2566 = vmatpush1.msra.mxu1 %v2190_v59  ;;  %v2928_v27 = vunpack.c.l.s4 %v3186_v4 }
 0x49d   : > { %2496 = vmatprep.subr.mxu0 %v2157_v10  ;;  %2567 = vmatprep.subr.mxu1 %v2159_v63 }
 0x49e   : > { %2497 = vmatpush1.msra.mxu0 %v2156_v13  ;;  %2568 = vmatpush1.msra.mxu1 %v2158_v41  ;;  %v2929_v20 = vunpack.c.0.s8 %v2928_v27  ;;  %v5203_v13 = vld [vmem:[#allocation9_spill] sm:$0xff] }
 0x49f   : > { %3111 = vmatmul.mubr.msk.f32.vlgmr.msra.gmra.mxu0 %vm1344_vm6, %v4726_v19  ;;  %3112 = vmatmul.mubr.msk.f32.vlgmr.msra.gmra.mxu1 %vm1344_vm6, %v4726_v19 }
 0x4a0   : > { %2766 = vmatprep.mubr.f32.mxu1 %v5073_v53  ;;  %2695 = vmatprep.mubr.f32.mxu0 %v5073_v53  ;;  %v2319_v29 = vpop.permute.xlu1 %2318  ;;  %v2932_v5 = vsub.s32 %v2929_v20, %v5203_v13 }
 0x4c9   : > { %v427_v46 = vpop.xlane.xlu0 %426 }
 0x4cd   : > { %v445_v44 = vpop.xlane.xlu0 %444 }
 0x4ce   : > { %v457_v23 = vadd.f32 %v445_v44, %v417_v17 }
 0x4d0   : > { %462 = vst.msk [vmem:[#allocation2 + $0x10] sm:$0xff] %vm378_vm7, %v457_v23 }
 0x4d1   : > { %v454_v48 = vpop.xlane.xlu0 %453 }
 0x4d2   : > { %v436_v18 = vpop.xlane.xlu1 %435  ;;  %v458_v31 = vadd.f32 %v454_v48, %v418_v34 }
 0x4d3   : > { %v456_v42 = vadd.f32 %v436_v18, %v416_v39 }
 0x4d4   : > { %463 = vst.msk [vmem:[#allocation2 + $0x18] sm:$0xff] %vm378_vm7, %v458_v31 }
 0x4d5   : > { %461 = vst.msk [vmem:[#allocation2 + $0x8] sm:$0xff] %vm378_vm7, %v456_v42 }
 0x4d6   : > { %v2621_v60 = vpop.permute.xlu1 %2620 }
 0x4d7   : > { %v785_v2 = vld [vmem:[#allocation2 + $0x10] sm:$0xff]  ;;  %v2626_v11 = vrot.slane %v2621_v60, %v5202_v0 }
 0x4d8   : > { %v789_v57 = vmul.f32 0.0009765625, %v785_v2 }
 0x4da   : > { %793 = vst.msk [vmem:[%s4862_s27 + $0x10] sm:$0xff] %vm378_vm7, %v789_v57 }
 0x4db   : > { %v786_v28 = vld [vmem:[#allocation2 + $0x18] sm:$0xff] }
 0x4dc   : > { %v784_v3 = vld [vmem:[#allocation2 + $0x8] sm:$0xff]  ;;  %v790_v51 = vmul.f32 0.0009765625, %v786_v28 }
 0x4dd   : > { %v788_v37 = vmul.f32 0.0009765625, %v784_v3 }
 0x4de   : > { %794 = vst.msk [vmem:[%s4862_s27 + $0x18] sm:$0xff] %vm378_vm7, %v790_v51 }
 0x4df   : > { %792 = vst.msk [vmem:[%s4862_s27 + $0x8] sm:$0xff] %vm378_vm7, %v788_v37 }
 0x545   : > { %v2461_v19 = vpop.f32.mrf.mxu1 }
 0x546   : > { %v2462_v40 = vadd.f32 %v2461_v19, %v2319_v29 }
 0x547   : > { %v2463_v36 = vpop.f32.mrf.mxu1 }
 0x548   : > { %v2464_v62 = vadd.f32 %v2463_v36, %v2319_v29  ;;  %v2610_v12 = vmax.f32 %v2462_v40, 0.0 }
 0x54a   : > { %v2611_v35 = vmax.f32 %v2464_v62, 0.0 }
 0x54c   : > { %v2390_v22 = vpop.f32.mrf.mxu0  ;;  %2732 = vmatprep.subr.mxu1 %v2611_v35 }
 0x54d   : > { %v2391_v33 = vadd.f32 %v2390_v22, %v2319_v29  ;;  %2733 = vmatpush1.msra.mxu1 %v2610_v12 }
 0x54e   : > { %v2392_v15 = vpop.f32.mrf.mxu0  ;;  %3114 = vmatmul.mubr.msk.f32.vlgmr.msra.gmra.mxu1 %vm2627_vm8, %v2616_v49 }
 0x54f   : > { %v2393_v38 = vadd.f32 %v2392_v15, %v2319_v29  ;;  %2908 = vmatprep.mubr.f32.mxu1 %v5073_v53  ;;  %v2608_v7 = vmax.f32 %v2391_v33, 0.0 }
 0x551   : > { %v2609_v54 = vmax.f32 %v2393_v38, 0.0 }
 0x553   : > { %2661 = vmatprep.subr.mxu0 %v2609_v54 }
 0x554   : > { %2662 = vmatpush1.msra.mxu0 %v2608_v7 }
 0x555   : > { %3113 = vmatmul.mubr.msk.f32.vlgmr.msra.gmra.mxu0 %vm2627_vm8, %v2616_v49 }
 0x556   : > { %2837 = vmatprep.mubr.f32.mxu0 %v5073_v53  ;;  %v415_v53 = vld [vmem:[#allocation2] sm:$0xff] }
 0x557   : > { %v455_v45 = vadd.f32 %v427_v46, %v415_v53 }
 0x559   : > { %460 = vst.msk [vmem:[#allocation2] sm:$0xff] %vm378_vm7, %v455_v45 }
 0x55f   : > { %v2532_v56 = vpop.f32.mrf.mxu0  ;;  %v2603_v50 = vpop.f32.mrf.mxu1 }
 0x560   : > { %v2533_v24 = vadd.f32 %v2532_v56, %v2319_v29  ;;  %v2604_v26 = vadd.f32 %v2603_v50, %v2319_v29  ;;  %v783_v47 = vld [vmem:[#allocation2] sm:$0xff] }
 0x561   : > { %v2534_v21 = vpop.f32.mrf.mxu0  ;;  %v2605_v30 = vpop.f32.mrf.mxu1  ;;  %v787_v14 = vmul.f32 0.0009765625, %v783_v47 }
 0x562   : > { %v2535_v32 = vadd.f32 %v2534_v21, %v2319_v29  ;;  %v2606_v58 = vadd.f32 %v2605_v30, %v2319_v29  ;;  %v2612_v55 = vmax.f32 %v2533_v24, 0.0  ;;  %v2614_v25 = vmax.f32 %v2604_v26, 0.0 }
 0x563   : > { %791 = vst.msk [vmem:[%s4862_s27] sm:$0xff] %vm378_vm7, %v787_v14 }
 0x564   : > { %v2613_v6 = vmax.f32 %v2535_v32, 0.0  ;;  %v2615_v8 = vmax.f32 %v2606_v58, 0.0 }
 0x566   : > { %2803 = vmatprep.subr.mxu0 %v2613_v6  ;;  %2874 = vmatprep.subr.mxu1 %v2615_v8 }
 0x567   : > { %2804 = vmatpush1.msra.mxu0 %v2612_v55  ;;  %2875 = vmatpush1.msra.mxu1 %v2614_v25 }
 0x568   : > { %3115 = vmatmul.mubr.msk.f32.vlgmr.msra.gmra.mxu0 %vm2627_vm8, %v2616_v49  ;;  %3116 = vmatmul.mubr.msk.f32.vlgmr.msra.gmra.mxu1 %vm2627_vm8, %v2616_v49 }
 0x60e   : > { %v2768_v61 = vpop.f32.mrf.mxu1 }
 0x60f   : > { %v2769_v52 = vadd.f32 %v2768_v61, %v2626_v11 }
 0x610   : > { %v2770_v9 = vpop.f32.mrf.mxu1 }
 0x611   : > { %v2771_v1 = vadd.f32 %v2770_v9, %v2626_v11 }
 0x613   : > { %v2924_v39 = vcombine.low %v2769_v52, %v2771_v1 }
 0x615   : > { %v2697_v16 = vpop.f32.mrf.mxu0  ;;  %v2940_v62 = vrot.slane %v2924_v39, %v2932_v5 }
 0x616   : > { %v2698_v63 = vadd.f32 %v2697_v16, %v2626_v11 }
 0x617   : > { %v2699_v43 = vpop.f32.mrf.mxu0 }
 0x618   : > { %v2700_v59 = vadd.f32 %v2699_v43, %v2626_v11 }
 0x61a   : > { %v2923_v10 = vcombine.low %v2698_v63, %v2700_v59 }
 0x61c   : > { %v2933_v18 = vrot.slane %v2923_v10, %v2932_v5 }
 0x61e   : > { %v2955_v22 = vcombine.low %v2933_v18, %v2940_v62 }
 0x620   : > { %v2963_v38 = vrot.slane %v2955_v22, %v2932_v5 }
 0x628   : > { %v2839_v41 = vpop.f32.mrf.mxu0  ;;  %v2910_v29 = vpop.f32.mrf.mxu1 }
 0x629   : > { %v2840_v37 = vadd.f32 %v2839_v41, %v2626_v11  ;;  %v2911_v19 = vadd.f32 %v2910_v29, %v2626_v11 }
 0x62a   : > { %v2841_v42 = vpop.f32.mrf.mxu0  ;;  %v2912_v3 = vpop.f32.mrf.mxu1 }
 0x62b   : > { %v2842_v40 = vadd.f32 %v2841_v42, %v2626_v11  ;;  %v2913_v36 = vadd.f32 %v2912_v3, %v2626_v11 }
 0x62d   : > { %v2925_v35 = vcombine.low %v2840_v37, %v2842_v40  ;;  %v2926_v12 = vcombine.low %v2911_v19, %v2913_v36 }
 0x62f   : > { %v2947_v49 = vrot.slane %v2925_v35, %v2932_v5  ;;  %v2954_v33 = vrot.slane %v2926_v12, %v2932_v5 }
 0x631   : > { %v2956_v15 = vcombine.low %v2947_v49, %v2954_v33 }
 0x633   : > { %v2970_v54 = vrot.slane %v2956_v15, %v2932_v5 }
 0x635   : > { %v2971_v7 = vcombine.low %v2963_v38, %v2970_v54 }
 0x637   : > { %2973 = vst [vmem:[%s373_s15] sm:$0xff] %v2971_v7 }
 0x638 PF: > { %s22_s13 = sadd.s32 1, %s3177_s13   ;;  %s5204_s11 = smov %s3173_s12 }
 0x639   : > { %p19_p5 = scmp.ge.s32.totalorder %s22_s13, 4   ;;  %s5205_s12 = smov %s5207_s6 }
 0x63b   :  { %21 = sbr.rel (!%p19_p5) target bundleno = 3 (0x3), region = 114 }

</bundles_post_ra>
